<compile_context>
chip_gen: v7x
topology: tpu7x:2x2x1
jax: 0.10.0
libtpu: 0.0.40
codegen_flags: <defaults>
</compile_context>

<pallas_src>
import jax
import jax.numpy as jnp
from jax.experimental import pallas as pl
from jax.experimental.pallas import tpu as pltpu


def _round_up(x, m):
    return (x + m - 1) // m * m


def _autoenc_kernel(s_ref, a_ref, w1_ref, whh_ref, w4_ref, w5_ref, w8_ref,
                    b_ref, out_ref):
    f32 = jnp.float32
    bf16 = jnp.bfloat16
    Z = w4_ref.shape[1]        # latent width (20)
    NOUT = w8_ref.shape[1]     # lane-padded output width (128)

    def dense_relu(x16, w, b):
        # bf16 operands on the MXU, f32 accumulation + bias; ReLU fused with
        # the cast back to bf16 so inter-layer VMEM traffic is halved.
        y = jnp.dot(x16, w, preferred_element_type=f32) + b
        return jnp.maximum(y, 0.0).astype(bf16)

    # ---- layer-1 input: in-kernel lane concat of [s | a] (single MXU pass) ----
    x = jnp.concatenate([s_ref[...], a_ref[...]], axis=1)      # (bm, IN) bf16

    # ---- ENC ----
    h = dense_relu(x, w1_ref[...], b_ref[0:1, :])              # (bm, H)
    h = dense_relu(h, whh_ref[0], b_ref[1:2, :])               # (bm, H)
    h = dense_relu(h, whh_ref[1], b_ref[2:3, :])               # (bm, H)
    z = dense_relu(h, w4_ref[...], b_ref[3:4, :Z])             # (bm, Z) relu(ENC(x))

    # ---- DEC ----
    h = dense_relu(z, w5_ref[...], b_ref[4:5, :])              # (bm, H)
    h = dense_relu(h, whh_ref[2], b_ref[5:6, :])               # (bm, H)
    h = dense_relu(h, whh_ref[3], b_ref[6:7, :])               # (bm, H)
    y = jnp.tanh(jnp.dot(h, w8_ref[...], preferred_element_type=f32)
                 + b_ref[7:8, :NOUT])                          # (bm, NOUT) f32

    out_ref[...] = y.astype(out_ref.dtype)


_BM_MAX = 1024   # row-tile cap; VMEM at bm=1024 is only a few MiB


def _pick_tiling(B):
    """Return (bm, n_steps) with Bp = bm * n_steps >= B and small padding."""
    if B <= 256:
        return _round_up(max(B, 16), 16), 1
    # At least 2 grid steps so the "parallel" axis shards across both v7x
    # TensorCores; tiles never exceed _BM_MAX.
    n_steps = max(2, -(-B // _BM_MAX))
    base = -(-B // n_steps)
    # Prefer MXU-aligned tiles (256 on v6e/v7x, 128 on v5e) when that adds at
    # most ~16 padded rows per step; otherwise fall back to a multiple of 16
    # (bf16 sublane packing) so padding never balloons.
    for align in (256, 128, 16):
        bm = _round_up(base, align)
        if bm * n_steps - B <= 16 * n_steps:
            return bm, n_steps
    return _round_up(base, 16), n_steps   # unreachable: align=16 always fits


def autoencreg_forward(s, a, params, *, block_m=None):
    """s: (B, obs), a: (B, act) -> (B, obs + act)."""
    B, obs = s.shape
    _, act = a.shape
    IN = obs + act
    H = params["w2"].shape[0]          # hidden = 256
    Z = params["w4"].shape[1]          # latent = 20
    assert params["w1"].shape == (IN, H)
    assert params["w8"].shape == (H, IN)

    f32, bf16 = jnp.float32, jnp.bfloat16

    NOUT = _round_up(IN, 128)          # lane-dense output width
    assert H >= NOUT and H >= Z, "bias packing assumes hidden >= padded widths"

    # ---- batch tiling / padding policy ----
    if block_m is not None:
        bm = _round_up(block_m, 16)
        n_steps = -(-B // bm)
    else:
        bm, n_steps = _pick_tiling(B)
    Bp = bm * n_steps
    if Bp != B:
        pad = Bp - B
        s = jnp.pad(s, ((0, pad), (0, 0)))
        a = jnp.pad(a, ((0, pad), (0, 0)))

    # ---- operand prep: bf16 matmul operands, packed resident params ----
    s16 = s.astype(bf16)
    a16 = a.astype(bf16)
    w1 = params["w1"].astype(bf16)                                    # (IN, H)
    w_hh = jnp.stack([params["w2"], params["w3"],
                      params["w6"], params["w7"]], 0).astype(bf16)    # (4, H, H)
    w4 = params["w4"].astype(bf16)                                    # (H, Z)
    w5 = params["w5"].astype(bf16)                                    # (Z, H)
    w8 = jnp.pad(params["w8"], ((0, 0), (0, NOUT - IN))).astype(bf16)  # (H, NOUT)

    def _brow(b):
        b = b.astype(f32)
        return jnp.pad(b, (0, H - b.shape[0]))
    b_all = jnp.stack([_brow(params["b1"]), _brow(params["b2"]),
                       _brow(params["b3"]), _brow(params["b4"]),
                       _brow(params["b5"]), _brow(params["b6"]),
                       _brow(params["b7"]), _brow(params["b8"])], 0)   # (8, H) f32

    def tile(shape):       # batch-tiled operand
        return pl.BlockSpec(shape, lambda i: (i, 0))

    def resident(shape):   # constant index_map -> stays resident in VMEM
        nd = len(shape)
        return pl.BlockSpec(shape, lambda i, _nd=nd: (0,) * _nd)

    out = pl.pallas_call(
        _autoenc_kernel,
        out_shape=jax.ShapeDtypeStruct((Bp, NOUT), f32),
        grid_spec=pltpu.PrefetchScalarGridSpec(
            num_scalar_prefetch=0,
            grid=(n_steps,),
            in_specs=[
                tile((bm, obs)),            # s tile
                tile((bm, act)),            # a tile
                resident((IN, H)),          # w1
                resident((4, H, H)),        # w2, w3, w6, w7 packed
                resident((H, Z)),           # w4
                resident((Z, H)),           # w5
                resident((H, NOUT)),        # w8 (lane-padded)
                resident((8, H)),           # packed biases (f32)
            ],
            out_specs=pl.BlockSpec((bm, NOUT), lambda i: (i, 0)),
        ),
        compiler_params=pltpu.CompilerParams(
            dimension_semantics=("parallel",)),
    )(s16, a16, w1, w_hh, w4, w5, w8, b_all)

    return out[:B, :IN]


def init_params(key, obs_dim, act_dim, hidden=256, latent=20):
    """PyTorch-style (uniform +/- 1/sqrt(fan_in)) init; weights stored (in, out)."""
    in_dim = obs_dim + act_dim

    def linear(k, fan_in, fan_out):
        kw, kb = jax.random.split(k)
        bound = 1.0 / jnp.sqrt(fan_in)
        w = jax.random.uniform(kw, (fan_in, fan_out), jnp.float32, -bound, bound)
        b = jax.random.uniform(kb, (fan_out,), jnp.float32, -bound, bound)
        return w, b

    ks = jax.random.split(key, 8)
    w1, b1 = linear(ks[0], in_dim, hidden)
    w2, b2 = linear(ks[1], hidden, hidden)
    w3, b3 = linear(ks[2], hidden, hidden)
    w4, b4 = linear(ks[3], hidden, latent)
    w5, b5 = linear(ks[4], latent, hidden)
    w6, b6 = linear(ks[5], hidden, hidden)
    w7, b7 = linear(ks[6], hidden, hidden)
    w8, b8 = linear(ks[7], hidden, in_dim)
    return dict(w1=w1, b1=b1, w2=w2, b2=b2, w3=w3, b3=b3, w4=w4, b4=b4,
                w5=w5, b5=b5, w6=w6, b6=b6, w7=w7, b7=b7, w8=w8, b8=b8)


def _reference(s, a, p):
    """JAX reference with the same bf16-operand / f32-accumulate numerics."""
    f32, bf16 = jnp.float32, jnp.bfloat16

    def lin(x, w, b):
        return jnp.dot(x.astype(bf16), w.astype(bf16),
                       preferred_element_type=f32) + b

    x = jnp.concatenate([s, a], axis=1)
    h = jnp.maximum(lin(x, p["w1"], p["b1"]), 0.0)
    h = jnp.maximum(lin(h, p["w2"], p["b2"]), 0.0)
    h = jnp.maximum(lin(h, p["w3"], p["b3"]), 0.0)
    z = jnp.maximum(lin(h, p["w4"], p["b4"]), 0.0)
    h = jnp.maximum(lin(z, p["w5"], p["b5"]), 0.0)
    h = jnp.maximum(lin(h, p["w6"], p["b6"]), 0.0)
    h = jnp.maximum(lin(h, p["w7"], p["b7"]), 0.0)
    return jnp.tanh(lin(h, p["w8"], p["b8"]))


if __name__ == "__main__":
    obs_dim, act_dim = 16, 4
    key = jax.random.PRNGKey(0)
    k_data, k_p = jax.random.split(key)
    params = init_params(k_p, obs_dim, act_dim)

    # Two shapes: a 256-aligned 2-step grid (exercises double-buffering and the
    # megacore-friendly tiling) and a small ragged batch (exercises padding).
    for batch in (512, 100):
        k_s, k_a = jax.random.split(jax.random.fold_in(k_data, batch))
        s = jax.random.normal(k_s, (batch, obs_dim), jnp.float32)
        a = jax.random.normal(k_a, (batch, act_dim), jnp.float32)

        out = jax.block_until_ready(autoencreg_forward(s, a, params))
        ref = _reference(s, a, params)
        assert out.shape == (batch, obs_dim + act_dim)
        assert jnp.allclose(out, ref, atol=5e-3, rtol=5e-3), \
            f"mismatch vs JAX reference at B={batch}"

    print("KERNEL_OK")
</pallas_src>

<mosaic_0001>
module attributes {stable_mosaic.version = 11 : i64} {
  func.func @_autoenc_kernel(%arg0: i32, %arg1: memref<256x16xbf16, #tpu.memory_space<vmem>>, %arg2: memref<256x4xbf16, #tpu.memory_space<vmem>>, %arg3: memref<20x256xbf16, #tpu.memory_space<vmem>>, %arg4: memref<4x256x256xbf16, #tpu.memory_space<vmem>>, %arg5: memref<256x20xbf16, #tpu.memory_space<vmem>>, %arg6: memref<20x256xbf16, #tpu.memory_space<vmem>>, %arg7: memref<256x128xbf16, #tpu.memory_space<vmem>>, %arg8: memref<8x256xf32, #tpu.memory_space<vmem>>, %arg9: memref<256x128xf32, #tpu.memory_space<vmem>>) attributes {dimension_semantics = [#tpu.dimension_semantics<parallel>], iteration_bounds = array<i64: 2>, scalar_prefetch = 0 : i64, scratch_operands = 0 : i64, tpu.core_type = #tpu.core_type<tc>, window_params = [{transform_indices = @transform_0, window_bounds = array<i64: 256, 16>}, {transform_indices = @transform_1, window_bounds = array<i64: 256, 4>}, {pipeline_mode = #tpu.pipeline_mode<synchronous>, transform_indices = @transform_2, window_bounds = array<i64: 20, 256>}, {pipeline_mode = #tpu.pipeline_mode<synchronous>, transform_indices = @transform_3, window_bounds = array<i64: 4, 256, 256>}, {pipeline_mode = #tpu.pipeline_mode<synchronous>, transform_indices = @transform_4, window_bounds = array<i64: 256, 20>}, {pipeline_mode = #tpu.pipeline_mode<synchronous>, transform_indices = @transform_5, window_bounds = array<i64: 20, 256>}, {pipeline_mode = #tpu.pipeline_mode<synchronous>, transform_indices = @transform_6, window_bounds = array<i64: 256, 128>}, {pipeline_mode = #tpu.pipeline_mode<synchronous>, transform_indices = @transform_7, window_bounds = array<i64: 8, 256>}, {transform_indices = @transform_8, window_bounds = array<i64: 256, 128>}]} {
    %c0 = arith.constant 0 : index
    %c0_0 = arith.constant 0 : index
    %0 = vector.load %arg1[%c0, %c0_0] : memref<256x16xbf16, #tpu.memory_space<vmem>>, vector<256x16xbf16>
    %c0_1 = arith.constant 0 : index
    %c0_2 = arith.constant 0 : index
    %1 = vector.load %arg2[%c0_1, %c0_2] : memref<256x4xbf16, #tpu.memory_space<vmem>>, vector<256x4xbf16>
    %2 = tpu.concatenate %0, %1 in 1 : vector<256x16xbf16>, vector<256x4xbf16> -> vector<256x20xbf16>
    %c0_3 = arith.constant 0 : index
    %c0_4 = arith.constant 0 : index
    %3 = vector.load %arg3[%c0_3, %c0_4] : memref<20x256xbf16, #tpu.memory_space<vmem>>, vector<20x256xbf16>
    %c0_5 = arith.constant 0 : index
    %c0_6 = arith.constant 0 : index
    %4 = vector.load %arg8[%c0_5, %c0_6] : memref<8x256xf32, #tpu.memory_space<vmem>>, vector<1x256xf32>
    %cst = arith.constant dense<0.000000e+00> : vector<256x256xf32>
    %5 = tpu.matmul %2, %3, %cst {dimension_numbers = #tpu.dot_dimension_numbers<[1], [0], [0], [1], [0, 0, 1, 1], [], []>} : vector<256x20xbf16>, vector<20x256xbf16>, vector<256x256xf32> -> vector<256x256xf32>
    %6 = vector.broadcast %4 : vector<1x256xf32> to vector<256x256xf32>
    %7 = arith.addf %5, %6 : vector<256x256xf32>
    %cst_7 = arith.constant 0.000000e+00 : f32
    %8 = vector.broadcast %cst_7 : f32 to vector<256x256xf32>
    %9 = arith.maximumf %7, %8 : vector<256x256xf32>
    %10 = arith.truncf %9 : vector<256x256xf32> to vector<256x256xbf16>
    %c0_8 = arith.constant 0 : index
    %c0_9 = arith.constant 0 : index
    %c0_10 = arith.constant 0 : index
    %11 = vector.load %arg4[%c0_8, %c0_9, %c0_10] : memref<4x256x256xbf16, #tpu.memory_space<vmem>>, vector<1x256x256xbf16>
    %12 = vector.shape_cast %11 : vector<1x256x256xbf16> to vector<256x256xbf16>
    %c1 = arith.constant 1 : index
    %c0_11 = arith.constant 0 : index
    %13 = vector.load %arg8[%c1, %c0_11] : memref<8x256xf32, #tpu.memory_space<vmem>>, vector<1x256xf32>
    %cst_12 = arith.constant dense<0.000000e+00> : vector<256x256xf32>
    %14 = tpu.matmul %10, %12, %cst_12 {dimension_numbers = #tpu.dot_dimension_numbers<[1], [0], [0], [1], [0, 0, 1, 1], [], []>} : vector<256x256xbf16>, vector<256x256xbf16>, vector<256x256xf32> -> vector<256x256xf32>
    %15 = vector.broadcast %13 : vector<1x256xf32> to vector<256x256xf32>
    %16 = arith.addf %14, %15 : vector<256x256xf32>
    %cst_13 = arith.constant 0.000000e+00 : f32
    %17 = vector.broadcast %cst_13 : f32 to vector<256x256xf32>
    %18 = arith.maximumf %16, %17 : vector<256x256xf32>
    %19 = arith.truncf %18 : vector<256x256xf32> to vector<256x256xbf16>
    %c1_14 = arith.constant 1 : index
    %c0_15 = arith.constant 0 : index
    %c0_16 = arith.constant 0 : index
    %20 = vector.load %arg4[%c1_14, %c0_15, %c0_16] : memref<4x256x256xbf16, #tpu.memory_space<vmem>>, vector<1x256x256xbf16>
    %21 = vector.shape_cast %20 : vector<1x256x256xbf16> to vector<256x256xbf16>
    %c2 = arith.constant 2 : index
    %c0_17 = arith.constant 0 : index
    %22 = vector.load %arg8[%c2, %c0_17] : memref<8x256xf32, #tpu.memory_space<vmem>>, vector<1x256xf32>
    %cst_18 = arith.constant dense<0.000000e+00> : vector<256x256xf32>
    %23 = tpu.matmul %19, %21, %cst_18 {dimension_numbers = #tpu.dot_dimension_numbers<[1], [0], [0], [1], [0, 0, 1, 1], [], []>} : vector<256x256xbf16>, vector<256x256xbf16>, vector<256x256xf32> -> vector<256x256xf32>
    %24 = vector.broadcast %22 : vector<1x256xf32> to vector<256x256xf32>
    %25 = arith.addf %23, %24 : vector<256x256xf32>
    %cst_19 = arith.constant 0.000000e+00 : f32
    %26 = vector.broadcast %cst_19 : f32 to vector<256x256xf32>
    %27 = arith.maximumf %25, %26 : vector<256x256xf32>
    %28 = arith.truncf %27 : vector<256x256xf32> to vector<256x256xbf16>
    %c0_20 = arith.constant 0 : index
    %c0_21 = arith.constant 0 : index
    %29 = vector.load %arg5[%c0_20, %c0_21] : memref<256x20xbf16, #tpu.memory_space<vmem>>, vector<256x20xbf16>
    %c3 = arith.constant 3 : index
    %c0_22 = arith.constant 0 : index
    %30 = vector.load %arg8[%c3, %c0_22] : memref<8x256xf32, #tpu.memory_space<vmem>>, vector<1x20xf32>
    %cst_23 = arith.constant dense<0.000000e+00> : vector<256x20xf32>
    %31 = tpu.matmul %28, %29, %cst_23 {dimension_numbers = #tpu.dot_dimension_numbers<[1], [0], [0], [1], [0, 0, 1, 1], [], []>} : vector<256x256xbf16>, vector<256x20xbf16>, vector<256x20xf32> -> vector<256x20xf32>
    %32 = vector.broadcast %30 : vector<1x20xf32> to vector<256x20xf32>
    %33 = arith.addf %31, %32 : vector<256x20xf32>
    %cst_24 = arith.constant 0.000000e+00 : f32
    %34 = vector.broadcast %cst_24 : f32 to vector<256x20xf32>
    %35 = arith.maximumf %33, %34 : vector<256x20xf32>
    %36 = arith.truncf %35 : vector<256x20xf32> to vector<256x20xbf16>
    %c0_25 = arith.constant 0 : index
    %c0_26 = arith.constant 0 : index
    %37 = vector.load %arg6[%c0_25, %c0_26] : memref<20x256xbf16, #tpu.memory_space<vmem>>, vector<20x256xbf16>
    %c4 = arith.constant 4 : index
    %c0_27 = arith.constant 0 : index
    %38 = vector.load %arg8[%c4, %c0_27] : memref<8x256xf32, #tpu.memory_space<vmem>>, vector<1x256xf32>
    %cst_28 = arith.constant dense<0.000000e+00> : vector<256x256xf32>
    %39 = tpu.matmul %36, %37, %cst_28 {dimension_numbers = #tpu.dot_dimension_numbers<[1], [0], [0], [1], [0, 0, 1, 1], [], []>} : vector<256x20xbf16>, vector<20x256xbf16>, vector<256x256xf32> -> vector<256x256xf32>
    %40 = vector.broadcast %38 : vector<1x256xf32> to vector<256x256xf32>
    %41 = arith.addf %39, %40 : vector<256x256xf32>
    %cst_29 = arith.constant 0.000000e+00 : f32
    %42 = vector.broadcast %cst_29 : f32 to vector<256x256xf32>
    %43 = arith.maximumf %41, %42 : vector<256x256xf32>
    %44 = arith.truncf %43 : vector<256x256xf32> to vector<256x256xbf16>
    %c2_30 = arith.constant 2 : index
    %c0_31 = arith.constant 0 : index
    %c0_32 = arith.constant 0 : index
    %45 = vector.load %arg4[%c2_30, %c0_31, %c0_32] : memref<4x256x256xbf16, #tpu.memory_space<vmem>>, vector<1x256x256xbf16>
    %46 = vector.shape_cast %45 : vector<1x256x256xbf16> to vector<256x256xbf16>
    %c5 = arith.constant 5 : index
    %c0_33 = arith.constant 0 : index
    %47 = vector.load %arg8[%c5, %c0_33] : memref<8x256xf32, #tpu.memory_space<vmem>>, vector<1x256xf32>
    %cst_34 = arith.constant dense<0.000000e+00> : vector<256x256xf32>
    %48 = tpu.matmul %44, %46, %cst_34 {dimension_numbers = #tpu.dot_dimension_numbers<[1], [0], [0], [1], [0, 0, 1, 1], [], []>} : vector<256x256xbf16>, vector<256x256xbf16>, vector<256x256xf32> -> vector<256x256xf32>
    %49 = vector.broadcast %47 : vector<1x256xf32> to vector<256x256xf32>
    %50 = arith.addf %48, %49 : vector<256x256xf32>
    %cst_35 = arith.constant 0.000000e+00 : f32
    %51 = vector.broadcast %cst_35 : f32 to vector<256x256xf32>
    %52 = arith.maximumf %50, %51 : vector<256x256xf32>
    %53 = arith.truncf %52 : vector<256x256xf32> to vector<256x256xbf16>
    %c3_36 = arith.constant 3 : index
    %c0_37 = arith.constant 0 : index
    %c0_38 = arith.constant 0 : index
    %54 = vector.load %arg4[%c3_36, %c0_37, %c0_38] : memref<4x256x256xbf16, #tpu.memory_space<vmem>>, vector<1x256x256xbf16>
    %55 = vector.shape_cast %54 : vector<1x256x256xbf16> to vector<256x256xbf16>
    %c6 = arith.constant 6 : index
    %c0_39 = arith.constant 0 : index
    %56 = vector.load %arg8[%c6, %c0_39] : memref<8x256xf32, #tpu.memory_space<vmem>>, vector<1x256xf32>
    %cst_40 = arith.constant dense<0.000000e+00> : vector<256x256xf32>
    %57 = tpu.matmul %53, %55, %cst_40 {dimension_numbers = #tpu.dot_dimension_numbers<[1], [0], [0], [1], [0, 0, 1, 1], [], []>} : vector<256x256xbf16>, vector<256x256xbf16>, vector<256x256xf32> -> vector<256x256xf32>
    %58 = vector.broadcast %56 : vector<1x256xf32> to vector<256x256xf32>
    %59 = arith.addf %57, %58 : vector<256x256xf32>
    %cst_41 = arith.constant 0.000000e+00 : f32
    %60 = vector.broadcast %cst_41 : f32 to vector<256x256xf32>
    %61 = arith.maximumf %59, %60 : vector<256x256xf32>
    %62 = arith.truncf %61 : vector<256x256xf32> to vector<256x256xbf16>
    %c0_42 = arith.constant 0 : index
    %c0_43 = arith.constant 0 : index
    %63 = vector.load %arg7[%c0_42, %c0_43] : memref<256x128xbf16, #tpu.memory_space<vmem>>, vector<256x128xbf16>
    %cst_44 = arith.constant dense<0.000000e+00> : vector<256x128xf32>
    %64 = tpu.matmul %62, %63, %cst_44 {dimension_numbers = #tpu.dot_dimension_numbers<[1], [0], [0], [1], [0, 0, 1, 1], [], []>} : vector<256x256xbf16>, vector<256x128xbf16>, vector<256x128xf32> -> vector<256x128xf32>
    %c7 = arith.constant 7 : index
    %c0_45 = arith.constant 0 : index
    %65 = vector.load %arg8[%c7, %c0_45] : memref<8x256xf32, #tpu.memory_space<vmem>>, vector<1x128xf32>
    %66 = vector.broadcast %65 : vector<1x128xf32> to vector<256x128xf32>
    %67 = arith.addf %64, %66 : vector<256x128xf32>
    %68 = math.tanh %67 : vector<256x128xf32>
    %c0_46 = arith.constant 0 : index
    %c0_47 = arith.constant 0 : index
    %69 = vector.load %arg9[%c0_46, %c0_47] : memref<256x128xf32, #tpu.memory_space<vmem>>, vector<256x128xf32>
    tpu.vector_store %arg9[%c0_46, %c0_47], %68 {strides = array<i32>} : memref<256x128xf32, #tpu.memory_space<vmem>>, vector<256x128xf32>,
    return
  }
  func.func @transform_0(%arg0: i32) -> (i32, i32) {
    %c0_i32 = arith.constant 0 : i32
    %c0_i32_0 = arith.constant 0 : i32
    return %arg0, %c0_i32 : i32, i32
  }
  func.func @transform_1(%arg0: i32) -> (i32, i32) {
    %c0_i32 = arith.constant 0 : i32
    %c0_i32_0 = arith.constant 0 : i32
    return %arg0, %c0_i32 : i32, i32
  }
  func.func @transform_2(%arg0: i32) -> (i32, i32) {
    %c0_i32 = arith.constant 0 : i32
    %c0_i32_0 = arith.constant 0 : i32
    %c0_i32_1 = arith.constant 0 : i32
    return %c0_i32, %c0_i32_0 : i32, i32
  }
  func.func @transform_3(%arg0: i32) -> (i32, i32, i32) {
    %c0_i32 = arith.constant 0 : i32
    %c0_i32_0 = arith.constant 0 : i32
    %c0_i32_1 = arith.constant 0 : i32
    %c0_i32_2 = arith.constant 0 : i32
    return %c0_i32, %c0_i32_0, %c0_i32_1 : i32, i32, i32
  }
  func.func @transform_4(%arg0: i32) -> (i32, i32) {
    %c0_i32 = arith.constant 0 : i32
    %c0_i32_0 = arith.constant 0 : i32
    %c0_i32_1 = arith.constant 0 : i32
    return %c0_i32, %c0_i32_0 : i32, i32
  }
  func.func @transform_5(%arg0: i32) -> (i32, i32) {
    %c0_i32 = arith.constant 0 : i32
    %c0_i32_0 = arith.constant 0 : i32
    %c0_i32_1 = arith.constant 0 : i32
    return %c0_i32, %c0_i32_0 : i32, i32
  }
  func.func @transform_6(%arg0: i32) -> (i32, i32) {
    %c0_i32 = arith.constant 0 : i32
    %c0_i32_0 = arith.constant 0 : i32
    %c0_i32_1 = arith.constant 0 : i32
    return %c0_i32, %c0_i32_0 : i32, i32
  }
  func.func @transform_7(%arg0: i32) -> (i32, i32) {
    %c0_i32 = arith.constant 0 : i32
    %c0_i32_0 = arith.constant 0 : i32
    %c0_i32_1 = arith.constant 0 : i32
    return %c0_i32, %c0_i32_0 : i32, i32
  }
  func.func @transform_8(%arg0: i32) -> (i32, i32) {
    %c0_i32 = arith.constant 0 : i32
    %c0_i32_0 = arith.constant 0 : i32
    return %arg0, %c0_i32 : i32, i32
  }
}

</mosaic_0001>

<bundles_post_ra>
// kernel: tpu_custom_call.1
= control target key start
LH: loop header
LB: loop body
LE: loop exit
PB: predicated region body
PF: predicated region fallthrough
CT: control target
= control target key end

     0   :  { %13 = vsyncpa [#allocation3], 0  ;;  %s6136_s0 = inlined_call_operand.vmem [shape: bf16[512,16], index: 0, kind: input, shape index: {}]   ;;  %s6137_s1 = inlined_call_operand.vmem [shape: bf16[512,4], index: 1, kind: input, shape index: {}]   ;;  %s6138_s2 = inlined_call_operand.vmem [shape: bf16[20,256], index: 2, kind: input, shape index: {}]   ;;  %s6139_s3 = inlined_call_operand.hbm [shape: bf16[4,256,256], index: 3, kind: input, shape index: {}]   ;;  %s6140_s4 = inlined_call_operand.vmem [shape: bf16[256,20], index: 4, kind: input, shape index: {}]   ;;  %s6141_s5 = inlined_call_operand.vmem [shape: bf16[20,256], index: 5, kind: input, shape index: {}]   ;;  %s6142_s6 = inlined_call_operand.vmem [shape: bf16[256,128], index: 6, kind: input, shape index: {}]   ;;  %s6143_s7 = inlined_call_operand.vmem [shape: f32[8,256], index: 7, kind: input, shape index: {}]   ;;  %s6144_s8 = inlined_call_operand.hbm [shape: f32[512,128], index: 8, kind: output, shape index: {}]  }
   0x1   :  { %14 = vsyncpa [#allocation4], 0 }
   0x2   :  { %16 = vsyncpa [#allocation4 + $0x1], 0  ;;  %s5185_s27 = smov 0   ;;  %s5187_s28 = smov 0  }
   0x3   :  { %s5189_s29 = smov 0   ;;  %s5191_s30 = smov 0  }
   0x4 LB: > { %s5206_s9 = sadd.s32 4294967295, %s5130_s30   ;;  %s4154_s10 = sadd.s32 4294967294, %s5130_s30   ;;  %s5130_s30 = sphi %s5191_s30, %s6160_s30   ;;  %s5126_s29 = sphi %s5189_s29, %s6159_s29   ;;  %s5122_s28 = sphi %s5187_s28, %s6158_s28   ;;  %s5118_s27 = sphi %s5185_s27, %s6157_s27  }
   0x5   : > { %s5210_s11 = sadd.s32 1, %s5130_s30   ;;  %s207_s12 = sadd.s32 1, %s5126_s29 }
   0x6   : > { %s204_s13 = ssub.s32 %s5130_s30, %s5210_s11  ;;  %p217_p0 = scmp.ne.s32.totalorder %s5126_s29, %s5122_s28 }
   0x7   : > { %p205_p1 = scmp.eq.s32.totalorder %s204_s13, 0  ;;  %p218_p2 = scmp.eq.s32.totalorder %s5206_s9, 1 }
   0x8   : > { %p223_p3 = scmp.ne.s32.totalorder %s5122_s28, %s5118_s27  ;;  %p224_p4 = scmp.eq.s32.totalorder %s4154_s10, 1 }
   0x9   : > { %s5221_s14 = scalar_select %p205_p1, %s5126_s29, %s207_s12  }
   0xa   : > { %p5223_p5 = por %p218_p2, %p217_p0  ;;  %p5227_p6 = por %p224_p4, %p223_p3 }
   0xb   : > { %p4155_p7 = scmp.ge.s32.totalorder %s5130_s30, 1  ;;  %p231_p8 = scmp.lt.s32.totalorder %s5130_s30, 3 }
   0xc   : > { %s6148_s15 = scalar_select %p5223_p5, 1, 0 }
   0xd   : > { %s6149_s16 = scalar_select %p5227_p6, 1, 0 }
   0xe   : > { %p6145_p9 = scmp.eq.s32.totalorder %s5206_s9, 0  ;;  %p5234_p10 = pnand %p4155_p7, %p231_p8 }
   0xf   : > { %s5132_s18 = smov [#allocation2]   ;;  %s5036_s23 = scalar_lea.hbm %s6139_s3, 16384 }
  0x10   : > { %s6150_s17 = scalar_select %p5234_p10, 1, 0 }
  0x11   : > { %s246_s19 = sshll.u32 %s5132_s18, 4  ;;  %p4656_p11 = pneg %p5234_p10  ;;  %s247_s19 = int_to_ptr.vmem [resolvable:$true] %s246_s19 }
  0x12   : > { %p5037_p13 = scmp.ne.s32.totalorder %s6139_s3, %s5036_s23  ;;  %p5043_p3 = scmp.lt.u32.totalorder %s5036_s23, %s6139_s3 }
  0x13   : > { %p5242_p12 = pnand %p6145_p9, %p4656_p11 }
  0x15   : > { %p5038_p0 = pneg %p5242_p12 }
  0x17   : > { %p5039_p1 = pnand %p5038_p0, %p5037_p13 }
  0x19   : > { %p5040_p2 = pneg %p5039_p1 }
  0x1b   : > { %p5045_p4 = pnand %p5043_p3, %p5040_p2 }
  0x1d   : > { %5048 = shalt.err (!%p5045_p4)
}
  0x1e   : > { %s5049_s12 = scalar_lea.vmem %s247_s19, 16384  ;;  %p5057_p9 = scmp.lt.s32.totalorder %s247_s19, %s247_s19 }
  0x1f   : > { %p5050_p7 = scmp.ne.s32.totalorder %s247_s19, %s5049_s12  ;;  %p5058_p6 = scmp.lt.s32.totalorder %s5049_s12, %s5049_s12 }
  0x21   : > { %p5052_p8 = pnand %p5050_p7, %p5038_p0  ;;  %p5059_p5 = por %p5058_p6, %p5057_p9 }
  0x23   : > { %p5053_p11 = pneg %p5052_p8 }
  0x25   : > { %p5060_p10 = pnand %p5059_p5, %p5053_p11 }
  0x27   : > { %5063 = shalt.err (!%p5060_p10)
}
  0x28   : > { %s5133_s13 = smov 128   ;;  %s5134_s18 = smov 8  }
  0x29   : > { %4659 = dma.hbm_to_vmem [thread:$0]  (!%p5242_p12), %s6139_s3, 16384, %s247_s19, [#allocation3], %s5133_s13, %s5133_s13, %s5134_s18  }
  0x2a   : > { %p6152_p13 = scmp.ne.s32.totalorder %s6150_s17, 0 }
  0x2b   : > { %p6153_p1 = scmp.eq.s32.totalorder (!%p6152_p13), %s5206_s9, 0 }
  0x2c   : > { %292 = sbr.rel (%p6152_p13) target bundleno = 2095 (0x82f), region = 52 }
  0x33   : > { %5109 = dma.done.wait (%p6153_p1), [#allocation3], 16384   ;;  %p6154_p0 = pmov %p6153_p1 }
  0x34   : > { %s4161_s23 = sshll.u32 %s5206_s9, 5  ;;  %v5135_v0 = vmov 0   ;;  %s5136_s17 = smov 16   ;;  %v4720_v10 = vld [vmem:[%s6138_s2 + $0x4] ss:$8 sps:$4 sm:$0xff]   ;;  %vm713_vm0 = vcmask 1041408  }
  0x35   : > { %5111 = vsyncadd (%p6154_p0), [#allocation3], 4294950912  ;;  %p332_p5 = scmp.lt.s32.totalorder %s4161_s23, 63  ;;  %752 = vmatprep.mubr.bf16.mxu0 %v5135_v0  ;;  %v4722_v11 = vld [vmem:[%s6138_s2] ss:$8 sps:$4 sm:$0xff]   ;;  %720 = vmatprep.subr.bf16.mxu0 %v4720_v10  ;;  %vm601_vm1 = vcmask 130048  }
  0x36   : > { %v652_v12 = vld [vmem:[%s6138_s2 + $0x10] sm:$0x33]  ;;  %721 = vmatpush1.bf16.msra.mxu0 %v4722_v11  ;;  %v4743_v23 = vld [vmem:[#allocation2 + $0x4] ss:$8 sps:$4 sm:$0xff]   ;;  %v4745_v24 = vld [vmem:[#allocation2] ss:$8 sps:$4 sm:$0xff]  }
  0x37   : > { %s6162_s23 = smov (!%p332_p5, %s4161_s23), 63  ;;  %v4200_v14 = vcombine.high %v652_v12, %v652_v12  ;;  %v4199_v15 = vcombine.low %v652_v12, %v652_v12  ;;  %v4746_v25 = vld [vmem:[#allocation2 + $0x14] ss:$8 sps:$4 sm:$0xff]   ;;  %1214 = vmatprep.subr.bf16.mxu1 %v4743_v23  ;;  %v4748_v27 = vld [vmem:[#allocation2 + $0x10] ss:$8 sps:$4 sm:$0xff]   ;;  %vm680_vm2 = vcmask 162816  }
  0x38   : > { %s4162_s20 = sshll.u32 %s6162_s23, 2  ;;  %1215 = vmatpush1.bf16.msra.mxu1 %v4745_v24  ;;  %v4749_v28 = vld [vmem:[#allocation2 + $0x24] ss:$8 sps:$4 sm:$0xff]   ;;  %v4751_v31 = vld [vmem:[#allocation2 + $0x20] ss:$8 sps:$4 sm:$0xff]   ;;  %s4409_s23 = sshll.u32 %s5206_s9, 12 }
  0x39   : > { %s5273_s19 = scalar_lea.vmem %s6137_s1, %s4162_s20  ;;  %s5297_s18 = scalar_lea.vmem %s6136_s0, %s4162_s20  ;;  %4201 = vmatprep.subr.msk.bf16.mxu0 %vm713_vm0, %v4200_v14  ;;  %v715_v17 = vsel %vm713_vm0, %v4199_v15, 0  ;;  %1216 = vmatprep.subr.bf16.mxu1 %v4746_v25  ;;  %v4752_v32 = vld [vmem:[#allocation2 + $0x34] ss:$8 sps:$4 sm:$0xff]   ;;  %v4754_v35 = vld [vmem:[#allocation2 + $0x30] ss:$8 sps:$4 sm:$0xff]  }
  0x3a   : > { %v4706_v1 = vld [vmem:[%s5273_s19] sm:$0xff]   ;;  %v4707_v2 = vld [vmem:[%s5273_s19 + $0x8] sm:$0xff]   ;;  %v4708_v3 = vld [vmem:[%s5273_s19 + $0x10] sm:$0xff]   ;;  %723 = vmatpush1.bf16.msra.mxu0 %v715_v17  ;;  %p6155_p9 = scmp.ne.s32.totalorder %s6148_s15, 0  ;;  %s5137_s9 = smov [#allocation5]  }
  0x3b   : > { %569 = vrot.lane.b32.xlu0 %v4706_v1, %s5136_s17  ;;  %573 = vrot.lane.b32.xlu1 %v4708_v3, %s5136_s17  ;;  %v4709_v4 = vld [vmem:[%s5273_s19 + $0x18] sm:$0xff]   ;;  %v4710_v5 = vld [vmem:[%s5273_s19 + $0x20] sm:$0xff]   ;;  %s5068_s10 = sshll.u32 %s5137_s9, 4  ;;  %s5069_s10 = int_to_ptr.vmem [resolvable:$false] %s5068_s10 }
  0x3c   : > { %v4711_v6 = vld [vmem:[%s5273_s19 + $0x28] sm:$0xff]   ;;  %v4712_v7 = vld [vmem:[%s5273_s19 + $0x30] sm:$0xff]   ;;  %v4713_v8 = vld [vmem:[%s5273_s19 + $0x38] sm:$0xff]   ;;  %1217 = vmatpush1.bf16.msra.mxu1 %v4748_v27  ;;  %s5070_s12 = scalar_lea.vmem %s5069_s10, 8192 }
  0x3d   : > { %v4714_v9 = vld [vmem:[%s5273_s19 + $0x40] sm:$0xff]   ;;  %v4715_v13 = vld [vmem:[%s5273_s19 + $0x48] sm:$0xff]   ;;  %v4716_v16 = vld [vmem:[%s5273_s19 + $0x50] sm:$0xff]   ;;  %1218 = vmatprep.subr.bf16.mxu1 %v4749_v28 }
  0x3e   : > { %v4717_v18 = vld [vmem:[%s5273_s19 + $0x58] sm:$0xff]   ;;  %v4718_v19 = vld [vmem:[%s5273_s19 + $0x60] sm:$0xff]   ;;  %v4719_v20 = vld [vmem:[%s5273_s19 + $0x68] sm:$0xff]  }
  0x3f   : > { %571 = vrot.lane.b32.xlu0 %v4707_v2, %s5136_s17  ;;  %575 = vrot.lane.b32.xlu1 %v4709_v4, %s5136_s17  ;;  %v4724_v21 = vld [vmem:[%s5273_s19 + $0x70] sm:$0xff]   ;;  %v4727_v22 = vld [vmem:[%s5273_s19 + $0x78] sm:$0xff]   ;;  %v4755_v36 = vld [vmem:[#allocation2 + $0x44] ss:$8 sps:$4 sm:$0xff]   ;;  %s6087_s19 = scalar_lea.hbm %s6144_s8, %s4409_s23 }
  0x40   : > { %v4726_v26 = vld [vmem:[%s5297_s18] sm:$0xff]   ;;  %v4728_v33 = vld [vmem:[%s5297_s18 + $0x8] sm:$0xff]   ;;  %1219 = vmatpush1.bf16.msra.mxu1 %v4751_v31  ;;  %v4758_v39 = vld [vmem:[#allocation2 + $0x54] ss:$8 sps:$4 sm:$0xff]  }
  0x41   : > { %1220 = vmatprep.subr.bf16.mxu1 %v4752_v32  ;;  %v4757_v38 = vld [vmem:[#allocation2 + $0x40] ss:$8 sps:$4 sm:$0xff]   ;;  %v4729_v40 = vld [vmem:[%s5297_s18 + $0x10] sm:$0xff]   ;;  %v4761_v43 = vld [vmem:[#allocation2 + $0x64] ss:$8 sps:$4 sm:$0xff]  }
  0x42   : > { %v4760_v42 = vld [vmem:[#allocation2 + $0x50] ss:$8 sps:$4 sm:$0xff]   ;;  %v4763_v45 = vld [vmem:[#allocation2 + $0x60] ss:$8 sps:$4 sm:$0xff]   ;;  %v4764_v46 = vld [vmem:[#allocation2 + $0x74] ss:$8 sps:$4 sm:$0xff]  }
  0x43   : > { %577 = vrot.lane.b32.xlu0 %v4710_v5, %s5136_s17  ;;  %579 = vrot.lane.b32.xlu1 %v4711_v6, %s5136_s17  ;;  %v4730_v47 = vld [vmem:[%s5297_s18 + $0x18] sm:$0xff]   ;;  %v4767_v50 = vld [vmem:[#allocation2 + $0x84] ss:$8 sps:$4 sm:$0xff]   ;;  %v4769_v52 = vld [vmem:[#allocation2 + $0x80] ss:$8 sps:$4 sm:$0xff]  }
  0x44   : > { %1221 = vmatpush1.bf16.msra.mxu1 %v4754_v35  ;;  %v4766_v49 = vld [vmem:[#allocation2 + $0x70] ss:$8 sps:$4 sm:$0xff]   ;;  %v4770_v53 = vld [vmem:[#allocation2 + $0x94] ss:$8 sps:$4 sm:$0xff]   ;;  %v4731_v54 = vld [vmem:[%s5297_s18 + $0x20] sm:$0xff]  }
  0x45   : > { %1222 = vmatprep.subr.bf16.mxu1 %v4755_v36  ;;  %v4772_v56 = vld [vmem:[#allocation2 + $0x90] ss:$8 sps:$4 sm:$0xff]   ;;  %v4773_v57 = vld [vmem:[#allocation2 + $0xa4] ss:$8 sps:$4 sm:$0xff]   ;;  %v4775_v59 = vld [vmem:[#allocation2 + $0xa0] ss:$8 sps:$4 sm:$0xff]  }
  0x46   : > { %v4776_v60 = vld [vmem:[#allocation2 + $0xb4] ss:$8 sps:$4 sm:$0xff]   ;;  %v4732_v61 = vld [vmem:[%s5297_s18 + $0x28] sm:$0xff]   ;;  %v4778_v63 = vld [vmem:[#allocation2 + $0xb0] ss:$8 sps:$4 sm:$0xff]  }
  0x47   : > { %581 = vrot.lane.b32.xlu0 %v4712_v7, %s5136_s17  ;;  %583 = vrot.lane.b32.xlu1 %v4713_v8, %s5136_s17  ;;  %v4779_v1 = vld [vmem:[#allocation2 + $0xc4] ss:$8 sps:$4 sm:$0xff]   ;;  %v4781_v3 = vld [vmem:[#allocation2 + $0xc0] ss:$8 sps:$4 sm:$0xff]   ;;  %v4782_v4 = vld [vmem:[#allocation2 + $0xd4] ss:$8 sps:$4 sm:$0xff]  }
  0x48   : > { %1223 = vmatpush1.bf16.msra.mxu1 %v4757_v38  ;;  %v4733_v5 = vld [vmem:[%s5297_s18 + $0x30] sm:$0xff]   ;;  %v4734_v8 = vld [vmem:[%s5297_s18 + $0x38] sm:$0xff]   ;;  %v4735_v11 = vld [vmem:[%s5297_s18 + $0x40] sm:$0xff]  }
  0x49   : > { %1224 = vmatprep.subr.bf16.mxu1 %v4758_v39  ;;  %v4736_v14 = vld [vmem:[%s5297_s18 + $0x48] sm:$0xff]   ;;  %v4737_v17 = vld [vmem:[%s5297_s18 + $0x50] sm:$0xff]   ;;  %v4739_v27 = vld [vmem:[%s5297_s18 + $0x60] sm:$0xff]  }
  0x4a   : > { %v4785_v23 = vld [vmem:[#allocation2 + $0xe4] ss:$8 sps:$4 sm:$0xff]   ;;  %v4787_v25 = vld [vmem:[#allocation2 + $0xe0] ss:$8 sps:$4 sm:$0xff]   ;;  %v4790_v28 = vld [vmem:[#allocation2 + $0xf0] ss:$8 sps:$4 sm:$0xff]  }
  0x4b   : > { %585 = vrot.lane.b32.xlu0 %v4714_v9, %s5136_s17  ;;  %587 = vrot.lane.b32.xlu1 %v4715_v13, %s5136_s17  ;;  %v4740_v31 = vld [vmem:[%s5297_s18 + $0x68] sm:$0xff]  }
  0x4c   : > { %1225 = vmatpush1.bf16.msra.mxu1 %v4760_v42  ;;  %v655_v42 = vlaneseq }
  0x4d   : > { %1226 = vmatprep.subr.bf16.mxu1 %v4761_v43  ;;  %v4794_v43 = vld [vmem:[#allocation2 + $0x110] ss:$8 sps:$4 sm:$0xff]  }
  0x4f   : > { %589 = vrot.lane.b32.xlu0 %v4716_v16, %s5136_s17  ;;  %591 = vrot.lane.b32.xlu1 %v4717_v18, %s5136_s17 }
  0x50   : > { %1227 = vmatpush1.bf16.msra.mxu1 %v4763_v45  ;;  %v656_v45 = vshrl.u32 %v655_v42, 7 }
  0x51   : > { %1228 = vmatprep.subr.bf16.mxu1 %v4764_v46 }
  0x52   : > { %v5386_v46 = vsub.s32 0, %v656_v45 }
  0x53   : > { %593 = vrot.lane.b32.xlu0 %v4718_v19, %s5136_s17  ;;  %595 = vrot.lane.b32.xlu1 %v4719_v20, %s5136_s17  ;;  %v4738_v20 = vld [vmem:[%s5297_s18 + $0x58] sm:$0xff]  }
  0x54   : > { %1229 = vmatpush1.bf16.msra.mxu1 %v4766_v49  ;;  %v4797_v49 = vld [vmem:[#allocation2 + $0x120] ss:$8 sps:$4 sm:$0xff]  }
  0x55   : > { %1230 = vmatprep.subr.bf16.mxu1 %v4767_v50  ;;  %v4799_v50 = vld [vmem:[#allocation2 + $0x124] ss:$8 sps:$4 sm:$0xff]  }
  0x57   : > { %597 = vrot.lane.b32.xlu0 %v4724_v21, %s5136_s17  ;;  %599 = vrot.lane.b32.xlu1 %v4727_v22, %s5136_s17  ;;  %v4784_v21 = vld [vmem:[#allocation2 + $0xd0] ss:$8 sps:$4 sm:$0xff]  }
  0x58   : > { %1231 = vmatpush1.bf16.msra.mxu1 %v4769_v52 }
  0x59   : > { %1232 = vmatprep.subr.bf16.mxu1 %v4770_v53 }
  0x5c   : > { %1233 = vmatpush1.bf16.msra.mxu1 %v4772_v56 }
  0x5d   : > { %1234 = vmatprep.subr.bf16.mxu1 %v4773_v57 }
  0x60   : > { %1235 = vmatpush1.bf16.msra.mxu1 %v4775_v59 }
  0x61   : > { %1236 = vmatprep.subr.bf16.mxu1 %v4776_v60 }
  0x64   : > { %1237 = vmatpush1.bf16.msra.mxu1 %v4778_v63  ;;  %v4805_v63 = vld [vmem:[#allocation2 + $0x144] ss:$8 sps:$4 sm:$0xff]  }
  0x65   : > { %1238 = vmatprep.subr.bf16.mxu1 %v4779_v1 }
  0x68   : > { %1239 = vmatpush1.bf16.msra.mxu1 %v4781_v3 }
  0x69   : > { %1240 = vmatprep.subr.bf16.mxu1 %v4782_v4 }
  0x6c   : > { %1241 = vmatpush1.bf16.msra.mxu1 %v4784_v21 }
  0x6d   : > { %1242 = vmatprep.subr.bf16.mxu1 %v4785_v23 }
  0x70   : > { %1243 = vmatpush1.bf16.msra.mxu1 %v4787_v25 }
  0xad   : > { %v570_v29 = vpop.permute.xlu0 %569  ;;  %v574_v41 = vpop.permute.xlu1 %573 }
  0xae   : > { %v604_v30 = vsel %vm601_vm1, %v4726_v26, %v570_v29  ;;  %v610_v44 = vsel %vm601_vm1, %v4729_v40, %v574_v41  ;;  %v4788_v26 = vld [vmem:[#allocation2 + $0xf4] ss:$8 sps:$4 sm:$0xff]   ;;  %v4791_v40 = vld [vmem:[#allocation2 + $0x100] ss:$8 sps:$4 sm:$0xff]   ;;  %v4793_v41 = vld [vmem:[#allocation2 + $0x104] ss:$8 sps:$4 sm:$0xff]  }
  0xaf   : > { %4202 = vmatmul.mubr.msk.bf16.vlgmr.msra.gmra.mrb[0].mxu0 %vm680_vm2, %v604_v30  ;;  %1244 = vmatprep.subr.bf16.mxu1 %v4788_v26  ;;  %v4812_v26 = vld [vmem:[#allocation2 + $0x170] ss:$8 sps:$4 sm:$0xff]  }
  0xb0   : > { %762 = vmatprep.mubr.bf16.mxu0 %v5135_v0  ;;  %1245 = vmatpush1.bf16.msra.mxu1 %v4790_v28 }
  0xb1   : > { %v572_v34 = vpop.permute.xlu0 %571  ;;  %v576_v48 = vpop.permute.xlu1 %575  ;;  %1709 = vmatprep.subr.bf16.mxu0 %v4793_v41 }
  0xb2   : > { %v607_v37 = vsel %vm601_vm1, %v4728_v33, %v572_v34  ;;  %v613_v51 = vsel %vm601_vm1, %v4730_v47, %v576_v48  ;;  %v4741_v34 = vld [vmem:[%s5297_s18 + $0x70] sm:$0xff]   ;;  %1710 = vmatpush1.bf16.msra.mxu0 %v4791_v40  ;;  %v653_v47 = vld [vmem:[%s6143_s7] ss:$8 sm:$0x3]  ;;  %v5391_v48 = vsub.s32 1, %v656_v45 }
  0xb4   : > { %v5397_v52 = vrot.slane %v653_v47, %v5391_v48 }
  0xb5   : > { %v578_v55 = vpop.permute.xlu0 %577  ;;  %v580_v62 = vpop.permute.xlu1 %579 }
  0xb6   : > { %v616_v58 = vsel %vm601_vm1, %v4731_v54, %v578_v55  ;;  %v619_v2 = vsel %vm601_vm1, %v4732_v61, %v580_v62  ;;  %v4800_v54 = vld [vmem:[#allocation2 + $0x130] ss:$8 sps:$4 sm:$0xff]   ;;  %v4802_v55 = vld [vmem:[#allocation2 + $0x134] ss:$8 sps:$4 sm:$0xff]   ;;  %v4803_v62 = vld [vmem:[#allocation2 + $0x140] ss:$8 sps:$4 sm:$0xff]  }
  0xb7   : > { %4203 = vmatmul.mubr.msk.bf16.gmra.mrb[4].mxu0 %vm680_vm2, %v607_v37  ;;  %v4742_v37 = vld [vmem:[%s5297_s18 + $0x78] sm:$0xff]   ;;  %s328_s18 = sand.u32 1, %s5122_s28  }
  0xb8   : > { %772 = vmatprep.mubr.bf16.mxu0 %v5135_v0  ;;  %s4160_s21 = sshll.u32 %s328_s18, 8  ;;  %s6095_s17 = scalar_lea.sflag [#allocation4], %s328_s18 }
  0xb9   : > { %v582_v6 = vpop.permute.xlu0 %581  ;;  %v584_v9 = vpop.permute.xlu1 %583  ;;  %s6022_s22 = scalar_lea.vmem [#allocation5], %s4160_s21 }
  0xba   : > { %v622_v7 = vsel %vm601_vm1, %v4733_v5, %v582_v6  ;;  %v625_v10 = vsel %vm601_vm1, %v4734_v8, %v584_v9  ;;  %v4806_v8 = vld [vmem:[#allocation2 + $0x150] ss:$8 sps:$4 sm:$0xff]   ;;  %s4068_s24 = sshll.u32 %s6022_s22, 4  ;;  %s6089_s24 = int_to_ptr.vmem [resolvable:$true] %s4068_s24 }
  0xbb   : > { %s5064_s26 = scalar_lea.vmem %s6089_s24, 4096  ;;  %p5071_p2 = scmp.lt.s32.totalorder %s6089_s24, %s5069_s10 }
  0xbc   : > { %p5065_p6 = scmp.ne.s32.totalorder %s6089_s24, %s5064_s26  ;;  %p5072_p3 = scmp.lt.s32.totalorder %s5070_s12, %s5064_s26 }
  0xbd   : > { %v586_v12 = vpop.permute.xlu0 %585  ;;  %v588_v15 = vpop.permute.xlu1 %587 }
  0xbe   : > { %v628_v13 = vsel %vm601_vm1, %v4735_v11, %v586_v12  ;;  %v631_v16 = vsel %vm601_vm1, %v4736_v14, %v588_v15  ;;  %v4811_v11 = vld [vmem:[#allocation2 + $0x164] ss:$8 sps:$4 sm:$0xff]   ;;  %p5066_p10 = pnand %p5065_p6, %p6155_p9  ;;  %p5073_p4 = por %p5072_p3, %p5071_p2 }
  0xbf   : > { %4204 = vmatmul.mubr.msk.bf16.gmra.mrb[8].mxu0 %vm680_vm2, %v610_v44  ;;  %v4796_v44 = vld [vmem:[#allocation2 + $0x114] ss:$8 sps:$4 sm:$0xff]  }
  0xc0   : > { %782 = vmatprep.mubr.bf16.mxu0 %v5135_v0  ;;  %1711 = vmatprep.subr.bf16.mxu0 %v4796_v44  ;;  %v4818_v44 = vld [vmem:[#allocation2 + $0x190] ss:$8 sps:$4 sm:$0xff]   ;;  %p5067_p12 = pneg %p5066_p10 }
  0xc1   : > { %v590_v18 = vpop.permute.xlu0 %589  ;;  %v592_v22 = vpop.permute.xlu1 %591  ;;  %1712 = vmatpush1.bf16.msra.mxu0 %v4794_v43 }
  0xc2   : > { %v634_v19 = vsel %vm601_vm1, %v4737_v17, %v590_v18  ;;  %v637_v24 = vsel %vm601_vm1, %v4738_v20, %v592_v22  ;;  %1713 = vmatprep.subr.bf16.mxu0 %v4799_v50  ;;  %v4809_v18 = vld [vmem:[#allocation2 + $0x160] ss:$8 sps:$4 sm:$0xff]   ;;  %v4814_v20 = vld [vmem:[#allocation2 + $0x174] ss:$8 sps:$4 sm:$0xff]   ;;  %p5074_p7 = pnand %p5073_p4, %p5067_p12 }
  0xc5   : > { %v594_v29 = vpop.permute.xlu0 %593  ;;  %v596_v32 = vpop.permute.xlu1 %595  ;;  %1714 = vmatpush1.bf16.msra.mxu0 %v4797_v49  ;;  %v4823_v49 = vld [vmem:[#allocation2 + $0x1a4] ss:$8 sps:$4 sm:$0xff]  }
  0xc6   : > { %v640_v30 = vsel %vm601_vm1, %v4739_v27, %v594_v29  ;;  %v643_v33 = vsel %vm601_vm1, %v4740_v31, %v596_v32  ;;  %1715 = vmatprep.subr.bf16.mxu0 %v4802_v55  ;;  %v4817_v29 = vld [vmem:[#allocation2 + $0x184] ss:$8 sps:$4 sm:$0xff]  }
  0xc7   : > { %4205 = vmatmul.mubr.msk.bf16.gmra.mrb[12].mxu0 %vm680_vm2, %v613_v51  ;;  %v5394_v51 = vrot.slane %v653_v47, %v5386_v46 }
  0xc8   : > { %792 = vmatprep.mubr.bf16.mxu0 %v5135_v0 }
  0xc9   : > { %v598_v35 = vpop.permute.xlu0 %597  ;;  %v600_v38 = vpop.permute.xlu1 %599  ;;  %1716 = vmatpush1.bf16.msra.mxu0 %v4800_v54 }
  0xca   : > { %v646_v36 = vsel %vm601_vm1, %v4741_v34, %v598_v35  ;;  %v649_v39 = vsel %vm601_vm1, %v4742_v37, %v600_v38  ;;  %1717 = vmatprep.subr.bf16.mxu0 %v4805_v63  ;;  %v4820_v38 = vld [vmem:[#allocation2 + $0x194] ss:$8 sps:$4 sm:$0xff]  }
  0xcd   : > { %1718 = vmatpush1.bf16.msra.mxu0 %v4803_v62 }
  0xcf   : > { %4206 = vmatmul.mubr.msk.bf16.gmra.mrb[16].mxu0 %vm680_vm2, %v616_v58 }
  0xd0   : > { %802 = vmatprep.mubr.bf16.mxu0 %v5135_v0 }
  0xd7   : > { %4207 = vmatmul.mubr.msk.bf16.gmra.mrb[20].mxu0 %vm680_vm2, %v619_v2  ;;  %v4808_v2 = vld [vmem:[#allocation2 + $0x154] ss:$8 sps:$4 sm:$0xff]  }
  0xd8   : > { %812 = vmatprep.mubr.bf16.mxu0 %v5135_v0  ;;  %1719 = vmatprep.subr.bf16.mxu0 %v4808_v2 }
  0xd9   : > { %1720 = vmatpush1.bf16.msra.mxu0 %v4806_v8 }
  0xda   : > { %1721 = vmatprep.subr.bf16.mxu0 %v4811_v11 }
  0xdd   : > { %1722 = vmatpush1.bf16.msra.mxu0 %v4809_v18 }
  0xde   : > { %1723 = vmatprep.subr.bf16.mxu0 %v4814_v20 }
  0xdf   : > { %4208 = vmatmul.mubr.msk.bf16.gmra.mrb[24].mxu0 %vm680_vm2, %v622_v7 }
  0xe0   : > { %822 = vmatprep.mubr.bf16.mxu0 %v5135_v0 }
  0xe1   : > { %1724 = vmatpush1.bf16.msra.mxu0 %v4812_v26 }
  0xe2   : > { %1725 = vmatprep.subr.bf16.mxu0 %v4817_v29 }
  0xe7   : > { %4209 = vmatmul.mubr.msk.bf16.gmra.mrb[28].mxu0 %vm680_vm2, %v625_v10 }
  0xe8   : > { %832 = vmatprep.mubr.bf16.mxu0 %v5135_v0 }
  0xef   : > { %4210 = vmatmul.mubr.msk.bf16.gmra.mrb[32].mxu0 %vm680_vm2, %v628_v13 }
  0xf0   : > { %842 = vmatprep.mubr.bf16.mxu0 %v5135_v0 }
  0xf7   : > { %4211 = vmatmul.mubr.msk.bf16.gmra.mrb[36].mxu0 %vm680_vm2, %v631_v16 }
  0xf8   : > { %852 = vmatprep.mubr.bf16.mxu0 %v5135_v0 }
  0xff   : > { %4212 = vmatmul.mubr.msk.bf16.gmra.mrb[40].mxu0 %vm680_vm2, %v634_v19 }
 0x100   : > { %862 = vmatprep.mubr.bf16.mxu0 %v5135_v0 }
 0x107   : > { %4213 = vmatmul.mubr.msk.bf16.gmra.mrb[44].mxu0 %vm680_vm2, %v637_v24 }
 0x108   : > { %872 = vmatprep.mubr.bf16.mxu0 %v5135_v0 }
 0x10f   : > { %4214 = vmatmul.mubr.msk.bf16.gmra.mrb[48].mxu0 %vm680_vm2, %v640_v30 }
 0x110   : > { %882 = vmatprep.mubr.bf16.mxu0 %v5135_v0 }
 0x117   : > { %4215 = vmatmul.mubr.msk.bf16.gmra.mrb[52].mxu0 %vm680_vm2, %v643_v33 }
 0x118   : > { %892 = vmatprep.mubr.bf16.mxu0 %v5135_v0 }
 0x11f   : > { %4216 = vmatmul.mubr.msk.bf16.gmra.mrb[56].mxu0 %vm680_vm2, %v646_v36  ;;  %v4815_v36 = vld [vmem:[#allocation2 + $0x180] ss:$8 sps:$4 sm:$0xff]  }
 0x120   : > { %902 = vmatprep.mubr.bf16.mxu0 %v5135_v0  ;;  %1726 = vmatpush1.bf16.msra.mxu0 %v4815_v36 }
 0x121   : > { %1727 = vmatprep.subr.bf16.mxu0 %v4820_v38 }
 0x124   : > { %1728 = vmatpush1.bf16.msra.mxu0 %v4818_v44 }
 0x125   : > { %1729 = vmatprep.subr.bf16.mxu0 %v4823_v49 }
 0x127   : > { %4217 = vmatmul.mubr.msk.bf16.gmra.mrb[60].mxu0 %vm680_vm2, %v649_v39 }
 0x182   : > { %v754_v53 = vpop.f32.mrb[0].mxu0 }
 0x183   : > { %v755_v56 = vadd.f32 %v754_v53, %v5394_v51  ;;  %v756_v57 = vpop.f32.mrb[1].mxu0 }
 0x184   : > { %v758_v58 = vpop.f32.mrb[2].mxu0  ;;  %v757_v59 = vadd.f32 %v756_v57, %v5397_v52 }
 0x185   : > { %v759_v60 = vadd.f32 %v758_v58, %v5394_v51  ;;  %v760_v61 = vpop.f32.mrb[3].mxu0  ;;  %v913_v3 = vmax.f32 %v755_v56, 0.0  ;;  %v4821_v58 = vld [vmem:[#allocation2 + $0x1a0] ss:$8 sps:$4 sm:$0xff]  }
 0x186   : > { %v761_v1 = vadd.f32 %v760_v61, %v5397_v52  ;;  %v914_v5 = vmax.f32 %v757_v59, 0.0  ;;  %1730 = vmatpush1.bf16.msra.mxu0 %v4821_v58 }
 0x187   : > { %v915_v4 = vmax.f32 %v759_v60, 0.0  ;;  %v4826_v60 = vld [vmem:[#allocation2 + $0x1b4] ss:$8 sps:$4 sm:$0xff]  }
 0x188   : > { %v916_v6 = vmax.f32 %v761_v1, 0.0  ;;  %1731 = vmatprep.subr.bf16.mxu0 %v4826_v60 }
 0x189   : > { %v977_v7 = vpack.c.bf16 %v915_v4, %v913_v3  ;;  %v4824_v3 = vld [vmem:[#allocation2 + $0x1b0] ss:$8 sps:$4 sm:$0xff]  }
 0x18a   : > { %v764_v9 = vpop.f32.mrb[4].mxu0  ;;  %v978_v10 = vpack.c.bf16 %v916_v6, %v914_v5  ;;  %v4829_v6 = vld [vmem:[#allocation2 + $0x1c4] ss:$8 sps:$4 sm:$0xff]   ;;  %1732 = vmatpush1.bf16.msra.mxu0 %v4824_v3 }
 0x18b   : > { %v765_v12 = vadd.f32 %v764_v9, %v5394_v51  ;;  %v766_v13 = vpop.f32.mrb[5].mxu0  ;;  %1733 = vmatprep.subr.bf16.mxu0 %v4829_v6 }
 0x18c   : > { %v767_v14 = vadd.f32 %v766_v13, %v5397_v52  ;;  %v768_v15 = vpop.f32.mrb[6].mxu0  ;;  %1246 = vmatprep.mubr.bf16.mxu1 %v978_v10  ;;  %v4827_v13 = vld [vmem:[#allocation2 + $0x1c0] ss:$8 sps:$4 sm:$0xff]  }
 0x18d   : > { %v769_v16 = vadd.f32 %v768_v15, %v5394_v51  ;;  %v770_v17 = vpop.f32.mrb[7].mxu0  ;;  %1247 = vmatmul.mubr.bf16.vlgmr.msra.gmra.mrb[0].mxu1 %v977_v7  ;;  %v917_v21 = vmax.f32 %v765_v12, 0.0  ;;  %v4832_v15 = vld [vmem:[#allocation2 + $0x1d4] ss:$8 sps:$4 sm:$0xff]  }
 0x18e   : > { %v771_v19 = vadd.f32 %v770_v17, %v5397_v52  ;;  %v918_v23 = vmax.f32 %v767_v14, 0.0  ;;  %1734 = vmatpush1.bf16.msra.mxu0 %v4827_v13 }
 0x18f   : > { %v919_v22 = vmax.f32 %v769_v16, 0.0  ;;  %1735 = vmatprep.subr.bf16.mxu0 %v4832_v15 }
 0x190   : > { %v920_v24 = vmax.f32 %v771_v19, 0.0 }
 0x191   : > { %v979_v25 = vpack.c.bf16 %v919_v22, %v917_v21  ;;  %v4830_v21 = vld [vmem:[#allocation2 + $0x1d0] ss:$8 sps:$4 sm:$0xff]  }
 0x192   : > { %v774_v27 = vpop.f32.mrb[8].mxu0  ;;  %v980_v28 = vpack.c.bf16 %v920_v24, %v918_v23  ;;  %v4835_v24 = vld [vmem:[#allocation2 + $0x1e4] ss:$8 sps:$4 sm:$0xff]   ;;  %1736 = vmatpush1.bf16.msra.mxu0 %v4830_v21 }
 0x193   : > { %v775_v30 = vadd.f32 %v774_v27, %v5394_v51  ;;  %v776_v31 = vpop.f32.mrb[9].mxu0  ;;  %1737 = vmatprep.subr.bf16.mxu0 %v4835_v24 }
 0x194   : > { %v777_v32 = vadd.f32 %v776_v31, %v5397_v52  ;;  %v778_v33 = vpop.f32.mrb[10].mxu0  ;;  %1256 = vmatprep.mubr.bf16.mxu1 %v980_v28  ;;  %v4833_v31 = vld [vmem:[#allocation2 + $0x1e0] ss:$8 sps:$4 sm:$0xff]  }
 0x195   : > { %v779_v34 = vadd.f32 %v778_v33, %v5394_v51  ;;  %v780_v35 = vpop.f32.mrb[11].mxu0  ;;  %1257 = vmatmul.mubr.bf16.gmra.mrb[4].mxu1 %v979_v25  ;;  %v921_v39 = vmax.f32 %v775_v30, 0.0 }
 0x196   : > { %v781_v37 = vadd.f32 %v780_v35, %v5397_v52  ;;  %v922_v41 = vmax.f32 %v777_v32, 0.0  ;;  %1738 = vmatpush1.bf16.msra.mxu0 %v4833_v31 }
 0x197   : > { %v923_v40 = vmax.f32 %v779_v34, 0.0 }
 0x198   : > { %v924_v42 = vmax.f32 %v781_v37, 0.0 }
 0x199   : > { %v981_v43 = vpack.c.bf16 %v923_v40, %v921_v39 }
 0x19a   : > { %v784_v45 = vpop.f32.mrb[12].mxu0  ;;  %v982_v47 = vpack.c.bf16 %v924_v42, %v922_v41 }
 0x19b   : > { %v785_v50 = vadd.f32 %v784_v45, %v5394_v51  ;;  %v786_v53 = vpop.f32.mrb[13].mxu0 }
 0x19c   : > { %v787_v54 = vadd.f32 %v786_v53, %v5397_v52  ;;  %v788_v55 = vpop.f32.mrb[14].mxu0  ;;  %1266 = vmatprep.mubr.bf16.mxu1 %v982_v47 }
 0x19d   : > { %v789_v56 = vadd.f32 %v788_v55, %v5394_v51  ;;  %v790_v57 = vpop.f32.mrb[15].mxu0  ;;  %1267 = vmatmul.mubr.bf16.gmra.mrb[8].mxu1 %v981_v43  ;;  %v925_v61 = vmax.f32 %v785_v50, 0.0 }
 0x19e   : > { %v791_v59 = vadd.f32 %v790_v57, %v5397_v52  ;;  %v926_v63 = vmax.f32 %v787_v54, 0.0 }
 0x19f   : > { %v927_v62 = vmax.f32 %v789_v56, 0.0 }
 0x1a0   : > { %v928_v1 = vmax.f32 %v791_v59, 0.0 }
 0x1a1   : > { %v983_v2 = vpack.c.bf16 %v927_v62, %v925_v61 }
 0x1a2   : > { %v984_v4 = vpack.c.bf16 %v928_v1, %v926_v63  ;;  %v794_v5 = vpop.f32.mrb[16].mxu0 }
 0x1a3   : > { %v795_v7 = vadd.f32 %v794_v5, %v5394_v51  ;;  %v796_v8 = vpop.f32.mrb[17].mxu0 }
 0x1a4   : > { %v797_v9 = vadd.f32 %v796_v8, %v5397_v52  ;;  %v798_v10 = vpop.f32.mrb[18].mxu0  ;;  %1276 = vmatprep.mubr.bf16.mxu1 %v984_v4 }
 0x1a5   : > { %v799_v11 = vadd.f32 %v798_v10, %v5394_v51  ;;  %v800_v12 = vpop.f32.mrb[19].mxu0  ;;  %1277 = vmatmul.mubr.bf16.gmra.mrb[12].mxu1 %v983_v2  ;;  %v929_v16 = vmax.f32 %v795_v7, 0.0 }
 0x1a6   : > { %v801_v14 = vadd.f32 %v800_v12, %v5397_v52  ;;  %v930_v18 = vmax.f32 %v797_v9, 0.0 }
 0x1a7   : > { %v931_v17 = vmax.f32 %v799_v11, 0.0 }
 0x1a8   : > { %v932_v19 = vmax.f32 %v801_v14, 0.0 }
 0x1a9   : > { %v985_v20 = vpack.c.bf16 %v931_v17, %v929_v16 }
 0x1aa   : > { %v986_v22 = vpack.c.bf16 %v932_v19, %v930_v18  ;;  %v804_v23 = vpop.f32.mrb[20].mxu0 }
 0x1ab   : > { %v805_v25 = vadd.f32 %v804_v23, %v5394_v51  ;;  %v806_v26 = vpop.f32.mrb[21].mxu0 }
 0x1ac   : > { %v807_v27 = vadd.f32 %v806_v26, %v5397_v52  ;;  %v808_v28 = vpop.f32.mrb[22].mxu0  ;;  %1286 = vmatprep.mubr.bf16.mxu1 %v986_v22 }
 0x1ad   : > { %v809_v29 = vadd.f32 %v808_v28, %v5394_v51  ;;  %v810_v30 = vpop.f32.mrb[23].mxu0  ;;  %1287 = vmatmul.mubr.bf16.gmra.mrb[16].mxu1 %v985_v20  ;;  %v933_v33 = vmax.f32 %v805_v25, 0.0 }
 0x1ae   : > { %v811_v32 = vadd.f32 %v810_v30, %v5397_v52  ;;  %v934_v35 = vmax.f32 %v807_v27, 0.0 }
 0x1af   : > { %v935_v34 = vmax.f32 %v809_v29, 0.0 }
 0x1b0   : > { %v936_v36 = vmax.f32 %v811_v32, 0.0 }
 0x1b1   : > { %v987_v37 = vpack.c.bf16 %v935_v34, %v933_v33 }
 0x1b2   : > { %v988_v38 = vpack.c.bf16 %v936_v36, %v934_v35  ;;  %v814_v39 = vpop.f32.mrb[24].mxu0 }
 0x1b3   : > { %v815_v40 = vadd.f32 %v814_v39, %v5394_v51  ;;  %v816_v41 = vpop.f32.mrb[25].mxu0 }
 0x1b4   : > { %v817_v42 = vadd.f32 %v816_v41, %v5397_v52  ;;  %v818_v43 = vpop.f32.mrb[26].mxu0  ;;  %1296 = vmatprep.mubr.bf16.mxu1 %v988_v38 }
 0x1b5   : > { %v819_v44 = vadd.f32 %v818_v43, %v5394_v51  ;;  %v820_v45 = vpop.f32.mrb[27].mxu0  ;;  %1297 = vmatmul.mubr.bf16.gmra.mrb[20].mxu1 %v987_v37  ;;  %v937_v49 = vmax.f32 %v815_v40, 0.0 }
 0x1b6   : > { %v821_v47 = vadd.f32 %v820_v45, %v5397_v52  ;;  %v938_v53 = vmax.f32 %v817_v42, 0.0 }
 0x1b7   : > { %v939_v50 = vmax.f32 %v819_v44, 0.0 }
 0x1b8   : > { %v940_v54 = vmax.f32 %v821_v47, 0.0 }
 0x1b9   : > { %v989_v55 = vpack.c.bf16 %v939_v50, %v937_v49 }
 0x1ba   : > { %v990_v56 = vpack.c.bf16 %v940_v54, %v938_v53  ;;  %v824_v57 = vpop.f32.mrb[28].mxu0 }
 0x1bb   : > { %v825_v58 = vadd.f32 %v824_v57, %v5394_v51  ;;  %v826_v59 = vpop.f32.mrb[29].mxu0 }
 0x1bc   : > { %v827_v60 = vadd.f32 %v826_v59, %v5397_v52  ;;  %v828_v61 = vpop.f32.mrb[30].mxu0  ;;  %1306 = vmatprep.mubr.bf16.mxu1 %v990_v56 }
 0x1bd   : > { %v829_v62 = vadd.f32 %v828_v61, %v5394_v51  ;;  %v830_v63 = vpop.f32.mrb[31].mxu0  ;;  %1307 = vmatmul.mubr.bf16.gmra.mrb[24].mxu1 %v989_v55  ;;  %v941_v2 = vmax.f32 %v825_v58, 0.0 }
 0x1be   : > { %v831_v1 = vadd.f32 %v830_v63, %v5397_v52  ;;  %v942_v4 = vmax.f32 %v827_v60, 0.0 }
 0x1bf   : > { %v943_v3 = vmax.f32 %v829_v62, 0.0 }
 0x1c0   : > { %v944_v5 = vmax.f32 %v831_v1, 0.0 }
 0x1c1   : > { %v991_v6 = vpack.c.bf16 %v943_v3, %v941_v2 }
 0x1c2   : > { %v992_v7 = vpack.c.bf16 %v944_v5, %v942_v4  ;;  %v834_v8 = vpop.f32.mrb[32].mxu0 }
 0x1c3   : > { %v835_v9 = vadd.f32 %v834_v8, %v5394_v51  ;;  %v836_v10 = vpop.f32.mrb[33].mxu0 }
 0x1c4   : > { %v837_v11 = vadd.f32 %v836_v10, %v5397_v52  ;;  %v838_v12 = vpop.f32.mrb[34].mxu0  ;;  %1316 = vmatprep.mubr.bf16.mxu1 %v992_v7 }
 0x1c5   : > { %v839_v13 = vadd.f32 %v838_v12, %v5394_v51  ;;  %v840_v14 = vpop.f32.mrb[35].mxu0  ;;  %1317 = vmatmul.mubr.bf16.gmra.mrb[28].mxu1 %v991_v6  ;;  %v945_v16 = vmax.f32 %v835_v9, 0.0  ;;  %v4838_v12 = vld [vmem:[#allocation2 + $0x1f4] ss:$8 sps:$4 sm:$0xff]  }
 0x1c6   : > { %v841_v15 = vadd.f32 %v840_v14, %v5397_v52  ;;  %v946_v18 = vmax.f32 %v837_v11, 0.0  ;;  %v4836_v14 = vld [vmem:[#allocation2 + $0x1f0] ss:$8 sps:$4 sm:$0xff]   ;;  %1739 = vmatprep.subr.bf16.mxu0 %v4838_v12 }
 0x1c7   : > { %v947_v17 = vmax.f32 %v839_v13, 0.0  ;;  %1740 = vmatpush1.bf16.msra.mxu0 %v4836_v14 }
 0x1c8   : > { %v948_v19 = vmax.f32 %v841_v15, 0.0 }
 0x1c9   : > { %v993_v20 = vpack.c.bf16 %v947_v17, %v945_v16 }
 0x1ca   : > { %v994_v21 = vpack.c.bf16 %v948_v19, %v946_v18  ;;  %v844_v22 = vpop.f32.mrb[36].mxu0 }
 0x1cb   : > { %v845_v23 = vadd.f32 %v844_v22, %v5394_v51  ;;  %v846_v24 = vpop.f32.mrb[37].mxu0 }
 0x1cc   : > { %v847_v25 = vadd.f32 %v846_v24, %v5397_v52  ;;  %v848_v26 = vpop.f32.mrb[38].mxu0  ;;  %1326 = vmatprep.mubr.bf16.mxu1 %v994_v21 }
 0x1cd   : > { %v849_v27 = vadd.f32 %v848_v26, %v5394_v51  ;;  %v850_v28 = vpop.f32.mrb[39].mxu0  ;;  %1327 = vmatmul.mubr.bf16.gmra.mrb[32].mxu1 %v993_v20  ;;  %v949_v30 = vmax.f32 %v845_v23, 0.0 }
 0x1ce   : > { %v851_v29 = vadd.f32 %v850_v28, %v5397_v52  ;;  %v950_v32 = vmax.f32 %v847_v25, 0.0 }
 0x1cf   : > { %v951_v31 = vmax.f32 %v849_v27, 0.0 }
 0x1d0   : > { %v952_v33 = vmax.f32 %v851_v29, 0.0 }
 0x1d1   : > { %v995_v34 = vpack.c.bf16 %v951_v31, %v949_v30 }
 0x1d2   : > { %v996_v35 = vpack.c.bf16 %v952_v33, %v950_v32  ;;  %v854_v36 = vpop.f32.mrb[40].mxu0 }
 0x1d3   : > { %v855_v37 = vadd.f32 %v854_v36, %v5394_v51  ;;  %v856_v38 = vpop.f32.mrb[41].mxu0 }
 0x1d4   : > { %v857_v39 = vadd.f32 %v856_v38, %v5397_v52  ;;  %v858_v40 = vpop.f32.mrb[42].mxu0  ;;  %1336 = vmatprep.mubr.bf16.mxu1 %v996_v35 }
 0x1d5   : > { %v859_v41 = vadd.f32 %v858_v40, %v5394_v51  ;;  %v860_v42 = vpop.f32.mrb[43].mxu0  ;;  %1337 = vmatmul.mubr.bf16.gmra.mrb[36].mxu1 %v995_v34  ;;  %v953_v44 = vmax.f32 %v855_v37, 0.0 }
 0x1d6   : > { %v861_v43 = vadd.f32 %v860_v42, %v5397_v52  ;;  %v954_v47 = vmax.f32 %v857_v39, 0.0 }
 0x1d7   : > { %v955_v45 = vmax.f32 %v859_v41, 0.0 }
 0x1d8   : > { %v956_v49 = vmax.f32 %v861_v43, 0.0 }
 0x1d9   : > { %v997_v50 = vpack.c.bf16 %v955_v45, %v953_v44 }
 0x1da   : > { %v998_v53 = vpack.c.bf16 %v956_v49, %v954_v47  ;;  %v864_v54 = vpop.f32.mrb[44].mxu0 }
 0x1db   : > { %v865_v55 = vadd.f32 %v864_v54, %v5394_v51  ;;  %v866_v56 = vpop.f32.mrb[45].mxu0 }
 0x1dc   : > { %v867_v57 = vadd.f32 %v866_v56, %v5397_v52  ;;  %v868_v58 = vpop.f32.mrb[46].mxu0  ;;  %1346 = vmatprep.mubr.bf16.mxu1 %v998_v53 }
 0x1dd   : > { %v869_v59 = vadd.f32 %v868_v58, %v5394_v51  ;;  %v870_v60 = vpop.f32.mrb[47].mxu0  ;;  %1347 = vmatmul.mubr.bf16.gmra.mrb[40].mxu1 %v997_v50  ;;  %v957_v62 = vmax.f32 %v865_v55, 0.0 }
 0x1de   : > { %v871_v61 = vadd.f32 %v870_v60, %v5397_v52  ;;  %v958_v1 = vmax.f32 %v867_v57, 0.0 }
 0x1df   : > { %v959_v63 = vmax.f32 %v869_v59, 0.0 }
 0x1e0   : > { %v960_v2 = vmax.f32 %v871_v61, 0.0 }
 0x1e1   : > { %v999_v3 = vpack.c.bf16 %v959_v63, %v957_v62 }
 0x1e2   : > { %v1000_v4 = vpack.c.bf16 %v960_v2, %v958_v1  ;;  %v874_v5 = vpop.f32.mrb[48].mxu0 }
 0x1e3   : > { %v875_v6 = vadd.f32 %v874_v5, %v5394_v51  ;;  %v876_v7 = vpop.f32.mrb[49].mxu0  ;;  %v4841_v5 = vld [vmem:[%s6140_s4 + $0x48] sm:$0xff]  }
 0x1e4   : > { %v877_v8 = vadd.f32 %v876_v7, %v5397_v52  ;;  %v878_v9 = vpop.f32.mrb[50].mxu0  ;;  %1356 = vmatprep.mubr.bf16.mxu1 %v1000_v4  ;;  %v4839_v4 = vld [vmem:[%s6140_s4 + $0x40] sm:$0xff]  }
 0x1e5   : > { %v879_v10 = vadd.f32 %v878_v9, %v5394_v51  ;;  %v880_v11 = vpop.f32.mrb[51].mxu0  ;;  %1357 = vmatmul.mubr.bf16.gmra.mrb[44].mxu1 %v999_v3  ;;  %v961_v15 = vmax.f32 %v875_v6, 0.0  ;;  %4410 = vmatprep.subr.bf16.mxu0 %v4839_v4  ;;  %v4842_v6 = vld [vmem:[%s6140_s4 + $0x8] sm:$0xff]  }
 0x1e6   : > { %v881_v13 = vadd.f32 %v880_v11, %v5397_v52  ;;  %v962_v17 = vmax.f32 %v877_v8, 0.0  ;;  %4634 = vmatprep.subr.bf16.mxu1 %v4839_v4  ;;  %v4854_v4 = vld [vmem:[%s6140_s4 + $0x38] sm:$0xff]  }
 0x1e7   : > { %v963_v16 = vmax.f32 %v879_v10, 0.0 }
 0x1e8   : > { %v964_v18 = vmax.f32 %v881_v13, 0.0 }
 0x1e9   : > { %v1001_v19 = vpack.c.bf16 %v963_v16, %v961_v15  ;;  %v4843_v16 = vld [vmem:[%s6140_s4 + $0x50] sm:$0xff]  }
 0x1ea   : > { %v1002_v20 = vpack.c.bf16 %v964_v18, %v962_v17  ;;  %v884_v21 = vpop.f32.mrb[52].mxu0  ;;  %v4844_v18 = vld [vmem:[%s6140_s4 + $0x10] sm:$0xff]  }
 0x1eb   : > { %v885_v22 = vadd.f32 %v884_v21, %v5394_v51  ;;  %v886_v23 = vpop.f32.mrb[53].mxu0  ;;  %v4845_v21 = vld [vmem:[%s6140_s4 + $0x58] sm:$0xff]  }
 0x1ec   : > { %v887_v24 = vadd.f32 %v886_v23, %v5397_v52  ;;  %v888_v25 = vpop.f32.mrb[54].mxu0  ;;  %1366 = vmatprep.mubr.bf16.mxu1 %v1002_v20 }
 0x1ed   : > { %v889_v26 = vadd.f32 %v888_v25, %v5394_v51  ;;  %v890_v27 = vpop.f32.mrb[55].mxu0  ;;  %1367 = vmatmul.mubr.bf16.gmra.mrb[48].mxu1 %v1001_v19  ;;  %v965_v29 = vmax.f32 %v885_v22, 0.0 }
 0x1ee   : > { %v891_v28 = vadd.f32 %v890_v27, %v5397_v52  ;;  %v966_v31 = vmax.f32 %v887_v24, 0.0  ;;  %v4846_v27 = vld [vmem:[%s6140_s4 + $0x18] sm:$0xff]  }
 0x1ef   : > { %v967_v30 = vmax.f32 %v889_v26, 0.0 }
 0x1f0   : > { %v968_v32 = vmax.f32 %v891_v28, 0.0 }
 0x1f1   : > { %v1003_v33 = vpack.c.bf16 %v967_v30, %v965_v29  ;;  %v4847_v30 = vld [vmem:[%s6140_s4 + $0x60] sm:$0xff]  }
 0x1f2   : > { %v1004_v34 = vpack.c.bf16 %v968_v32, %v966_v31  ;;  %v894_v35 = vpop.f32.mrb[56].mxu0 }
 0x1f3   : > { %v895_v36 = vadd.f32 %v894_v35, %v5394_v51  ;;  %v896_v37 = vpop.f32.mrb[57].mxu0 }
 0x1f4   : > { %v897_v38 = vadd.f32 %v896_v37, %v5397_v52  ;;  %v898_v39 = vpop.f32.mrb[58].mxu0  ;;  %1376 = vmatprep.mubr.bf16.mxu1 %v1004_v34 }
 0x1f5   : > { %v899_v40 = vadd.f32 %v898_v39, %v5394_v51  ;;  %v900_v41 = vpop.f32.mrb[59].mxu0  ;;  %1377 = vmatmul.mubr.bf16.gmra.mrb[52].mxu1 %v1003_v33  ;;  %v969_v43 = vmax.f32 %v895_v36, 0.0  ;;  %v4848_v36 = vld [vmem:[%s6140_s4 + $0x20] sm:$0xff]   ;;  %v4849_v39 = vld [vmem:[%s6140_s4 + $0x68] sm:$0xff]  }
 0x1f6   : > { %v901_v42 = vadd.f32 %v900_v41, %v5397_v52  ;;  %v970_v45 = vmax.f32 %v897_v38, 0.0 }
 0x1f7   : > { %v971_v44 = vmax.f32 %v899_v40, 0.0 }
 0x1f8   : > { %v972_v47 = vmax.f32 %v901_v42, 0.0 }
 0x1f9   : > { %v1005_v49 = vpack.c.bf16 %v971_v44, %v969_v43 }
 0x1fa   : > { %v1006_v50 = vpack.c.bf16 %v972_v47, %v970_v45  ;;  %v904_v53 = vpop.f32.mrb[60].mxu0  ;;  %v4850_v45 = vld [vmem:[%s6140_s4 + $0x28] sm:$0xff]  }
 0x1fb   : > { %v905_v54 = vadd.f32 %v904_v53, %v5394_v51  ;;  %v906_v55 = vpop.f32.mrb[61].mxu0 }
 0x1fc   : > { %v907_v56 = vadd.f32 %v906_v55, %v5397_v52  ;;  %v908_v57 = vpop.f32.mrb[62].mxu0  ;;  %1386 = vmatprep.mubr.bf16.mxu1 %v1006_v50  ;;  %v4851_v50 = vld [vmem:[%s6140_s4 + $0x70] sm:$0xff]  }
 0x1fd   : > { %v909_v58 = vadd.f32 %v908_v57, %v5394_v51  ;;  %v910_v59 = vpop.f32.mrb[63].mxu0  ;;  %1387 = vmatmul.mubr.bf16.gmra.mrb[56].mxu1 %v1005_v49  ;;  %v973_v61 = vmax.f32 %v905_v54, 0.0  ;;  %v4840_v51 = vld [vmem:[%s6140_s4] sm:$0xff]  }
 0x1fe   : > { %v911_v60 = vadd.f32 %v910_v59, %v5397_v52  ;;  %v974_v63 = vmax.f32 %v907_v56, 0.0  ;;  %4642 = vmatpush3.bf16.msra.mxu1 %v4840_v51  ;;  %v4218_v52 = vld [vmem:[%s6143_s7 + $0x1] ss:$8 sm:$0x3] }
 0x1ff   : > { %v975_v62 = vmax.f32 %v909_v58, 0.0  ;;  %v5479_v7 = vrot.slane %v4218_v52, %v5386_v46  ;;  %4635 = vmatprep.subr.bf16.mxu1 %v4841_v5  ;;  %v5482_v8 = vrot.slane %v4218_v52, %v5391_v48  ;;  %v4852_v58 = vld [vmem:[%s6140_s4 + $0x30] sm:$0xff]  }
 0x200   : > { %v976_v1 = vmax.f32 %v911_v60, 0.0 }
 0x201   : > { %v1007_v2 = vpack.c.bf16 %v975_v62, %v973_v61  ;;  %v4853_v61 = vld [vmem:[%s6140_s4 + $0x78] sm:$0xff]  }
 0x202   : > { %v1008_v3 = vpack.c.bf16 %v976_v1, %v974_v63  ;;  %4643 = vmatpush3.bf16.msra.mxu1 %v4842_v6 }
 0x203   : > { %4636 = vmatprep.subr.bf16.mxu1 %v4843_v16 }
 0x204   : > { %1396 = vmatprep.mubr.bf16.mxu1 %v1008_v3 }
 0x205   : > { %1397 = vmatmul.mubr.bf16.gmra.mrb[60].mxu1 %v1007_v2 }
 0x206   : > { %4644 = vmatpush3.bf16.msra.mxu1 %v4844_v18 }
 0x207   : > { %4637 = vmatprep.subr.bf16.mxu1 %v4845_v21 }
 0x20a   : > { %4645 = vmatpush3.bf16.msra.mxu1 %v4846_v27 }
 0x20b   : > { %4638 = vmatprep.subr.bf16.mxu1 %v4847_v30 }
 0x20e   : > { %4646 = vmatpush3.bf16.msra.mxu1 %v4848_v36 }
 0x20f   : > { %4639 = vmatprep.subr.bf16.mxu1 %v4849_v39 }
 0x212   : > { %4647 = vmatpush3.bf16.msra.mxu1 %v4850_v45 }
 0x213   : > { %4640 = vmatprep.subr.bf16.mxu1 %v4851_v50 }
 0x216   : > { %4648 = vmatpush3.bf16.msra.mxu1 %v4852_v58 }
 0x217   : > { %4641 = vmatprep.subr.bf16.mxu1 %v4853_v61 }
 0x21a   : > { %4649 = vmatpush3.bf16.msra.mxu1 %v4854_v4 }
 0x260   : > { %v1248_v9 = vpop.f32.mrb[0].mxu1 }
 0x261   : > { %v1249_v10 = vadd.f32 %v1248_v9, %v5479_v7  ;;  %v1250_v11 = vpop.f32.mrb[1].mxu1 }
 0x262   : > { %v1251_v12 = vadd.f32 %v1250_v11, %v5482_v8  ;;  %v1252_v13 = vpop.f32.mrb[2].mxu1 }
 0x263   : > { %v1253_v14 = vadd.f32 %v1252_v13, %v5479_v7  ;;  %v1254_v15 = vpop.f32.mrb[3].mxu1  ;;  %v1407_v19 = vmax.f32 %v1249_v10, 0.0 }
 0x264   : > { %v1255_v17 = vadd.f32 %v1254_v15, %v5482_v8  ;;  %v1408_v22 = vmax.f32 %v1251_v12, 0.0 }
 0x265   : > { %v1409_v20 = vmax.f32 %v1253_v14, 0.0 }
 0x266   : > { %v1410_v23 = vmax.f32 %v1255_v17, 0.0 }
 0x267   : > { %v1471_v24 = vpack.c.bf16 %v1409_v20, %v1407_v19 }
 0x268   : > { %v1472_v25 = vpack.c.bf16 %v1410_v23, %v1408_v22  ;;  %v1258_v26 = vpop.f32.mrb[4].mxu1 }
 0x269   : > { %v1259_v28 = vadd.f32 %v1258_v26, %v5479_v7  ;;  %v1260_v29 = vpop.f32.mrb[5].mxu1 }
 0x26a   : > { %v1261_v31 = vadd.f32 %v1260_v29, %v5482_v8  ;;  %v1262_v32 = vpop.f32.mrb[6].mxu1  ;;  %1741 = vmatprep.mubr.bf16.mxu0 %v1472_v25 }
 0x26b   : > { %v1263_v33 = vadd.f32 %v1262_v32, %v5479_v7  ;;  %v1264_v34 = vpop.f32.mrb[7].mxu1  ;;  %1742 = vmatmul.mubr.bf16.vlgmr.msra.gmra.mrb[64].mxu0 %v1471_v24  ;;  %v1411_v37 = vmax.f32 %v1259_v28, 0.0 }
 0x26c   : > { %v1265_v35 = vadd.f32 %v1264_v34, %v5482_v8  ;;  %4411 = vmatpush3.bf16.msra.mxu0 %v4840_v51  ;;  %v1412_v40 = vmax.f32 %v1261_v31, 0.0 }
 0x26d   : > { %v1413_v38 = vmax.f32 %v1263_v33, 0.0  ;;  %4412 = vmatprep.subr.bf16.mxu0 %v4841_v5 }
 0x26e   : > { %v1414_v41 = vmax.f32 %v1265_v35, 0.0 }
 0x26f   : > { %v1473_v42 = vpack.c.bf16 %v1413_v38, %v1411_v37 }
 0x270   : > { %v1474_v43 = vpack.c.bf16 %v1414_v41, %v1412_v40  ;;  %v1268_v44 = vpop.f32.mrb[8].mxu1  ;;  %4413 = vmatpush3.bf16.msra.mxu0 %v4842_v6 }
 0x271   : > { %v1269_v47 = vadd.f32 %v1268_v44, %v5479_v7  ;;  %v1270_v49 = vpop.f32.mrb[9].mxu1  ;;  %4414 = vmatprep.subr.bf16.mxu0 %v4843_v16 }
 0x272   : > { %v1271_v53 = vadd.f32 %v1270_v49, %v5482_v8  ;;  %v1272_v54 = vpop.f32.mrb[10].mxu1  ;;  %1751 = vmatprep.mubr.bf16.mxu0 %v1474_v43 }
 0x273   : > { %v1273_v55 = vadd.f32 %v1272_v54, %v5479_v7  ;;  %v1274_v56 = vpop.f32.mrb[11].mxu1  ;;  %1752 = vmatmul.mubr.bf16.gmra.mrb[68].mxu0 %v1473_v42  ;;  %v1415_v59 = vmax.f32 %v1269_v47, 0.0 }
 0x274   : > { %v1275_v57 = vadd.f32 %v1274_v56, %v5482_v8  ;;  %4415 = vmatpush3.bf16.msra.mxu0 %v4844_v18  ;;  %v1416_v62 = vmax.f32 %v1271_v53, 0.0 }
 0x275   : > { %v1417_v60 = vmax.f32 %v1273_v55, 0.0  ;;  %4416 = vmatprep.subr.bf16.mxu0 %v4845_v21 }
 0x276   : > { %v1418_v63 = vmax.f32 %v1275_v57, 0.0 }
 0x277   : > { %v1475_v1 = vpack.c.bf16 %v1417_v60, %v1415_v59 }
 0x278   : > { %v1476_v2 = vpack.c.bf16 %v1418_v63, %v1416_v62  ;;  %v1278_v3 = vpop.f32.mrb[12].mxu1  ;;  %4417 = vmatpush3.bf16.msra.mxu0 %v4846_v27 }
 0x279   : > { %v1279_v51 = vadd.f32 %v1278_v3, %v5479_v7  ;;  %v1280_v52 = vpop.f32.mrb[13].mxu1  ;;  %4418 = vmatprep.subr.bf16.mxu0 %v4847_v30 }
 0x27a   : > { %v1281_v5 = vadd.f32 %v1280_v52, %v5482_v8  ;;  %v1282_v6 = vpop.f32.mrb[14].mxu1  ;;  %1761 = vmatprep.mubr.bf16.mxu0 %v1476_v2 }
 0x27b   : > { %v1283_v9 = vadd.f32 %v1282_v6, %v5479_v7  ;;  %v1284_v10 = vpop.f32.mrb[15].mxu1  ;;  %1762 = vmatmul.mubr.bf16.gmra.mrb[72].mxu0 %v1475_v1  ;;  %v1419_v12 = vmax.f32 %v1279_v51, 0.0 }
 0x27c   : > { %v1285_v11 = vadd.f32 %v1284_v10, %v5482_v8  ;;  %4419 = vmatpush3.bf16.msra.mxu0 %v4848_v36  ;;  %v1420_v14 = vmax.f32 %v1281_v5, 0.0 }
 0x27d   : > { %v1421_v13 = vmax.f32 %v1283_v9, 0.0  ;;  %4420 = vmatprep.subr.bf16.mxu0 %v4849_v39 }
 0x27e   : > { %v1422_v15 = vmax.f32 %v1285_v11, 0.0 }
 0x27f   : > { %v1477_v16 = vpack.c.bf16 %v1421_v13, %v1419_v12 }
 0x280   : > { %v1478_v17 = vpack.c.bf16 %v1422_v15, %v1420_v14  ;;  %v1288_v18 = vpop.f32.mrb[16].mxu1  ;;  %4421 = vmatpush3.bf16.msra.mxu0 %v4850_v45 }
 0x281   : > { %v1289_v19 = vadd.f32 %v1288_v18, %v5479_v7  ;;  %v1290_v20 = vpop.f32.mrb[17].mxu1  ;;  %4422 = vmatprep.subr.bf16.mxu0 %v4851_v50 }
 0x282   : > { %v1291_v21 = vadd.f32 %v1290_v20, %v5482_v8  ;;  %v1292_v22 = vpop.f32.mrb[18].mxu1  ;;  %1771 = vmatprep.mubr.bf16.mxu0 %v1478_v17 }
 0x283   : > { %v1293_v23 = vadd.f32 %v1292_v22, %v5479_v7  ;;  %v1294_v24 = vpop.f32.mrb[19].mxu1  ;;  %1772 = vmatmul.mubr.bf16.gmra.mrb[76].mxu0 %v1477_v16  ;;  %v1423_v26 = vmax.f32 %v1289_v19, 0.0 }
 0x284   : > { %v1295_v25 = vadd.f32 %v1294_v24, %v5482_v8  ;;  %4423 = vmatpush3.bf16.msra.mxu0 %v4852_v58  ;;  %v1424_v28 = vmax.f32 %v1291_v21, 0.0 }
 0x285   : > { %v1425_v27 = vmax.f32 %v1293_v23, 0.0  ;;  %4424 = vmatprep.subr.bf16.mxu0 %v4853_v61 }
 0x286   : > { %v1426_v29 = vmax.f32 %v1295_v25, 0.0 }
 0x287   : > { %v1479_v30 = vpack.c.bf16 %v1425_v27, %v1423_v26 }
 0x288   : > { %v1480_v31 = vpack.c.bf16 %v1426_v29, %v1424_v28  ;;  %v1298_v32 = vpop.f32.mrb[20].mxu1  ;;  %4425 = vmatpush3.bf16.msra.mxu0 %v4854_v4 }
 0x289   : > { %v1299_v33 = vadd.f32 %v1298_v32, %v5479_v7  ;;  %v1300_v34 = vpop.f32.mrb[21].mxu1 }
 0x28a   : > { %v1301_v35 = vadd.f32 %v1300_v34, %v5482_v8  ;;  %v1302_v36 = vpop.f32.mrb[22].mxu1  ;;  %1781 = vmatprep.mubr.bf16.mxu0 %v1480_v31 }
 0x28b   : > { %v1303_v37 = vadd.f32 %v1302_v36, %v5479_v7  ;;  %v1304_v38 = vpop.f32.mrb[23].mxu1  ;;  %1782 = vmatmul.mubr.bf16.gmra.mrb[80].mxu0 %v1479_v30  ;;  %v1427_v40 = vmax.f32 %v1299_v33, 0.0 }
 0x28c   : > { %v1305_v39 = vadd.f32 %v1304_v38, %v5482_v8  ;;  %v1428_v42 = vmax.f32 %v1301_v35, 0.0 }
 0x28d   : > { %v1429_v41 = vmax.f32 %v1303_v37, 0.0 }
 0x28e   : > { %v1430_v43 = vmax.f32 %v1305_v39, 0.0 }
 0x28f   : > { %v1481_v44 = vpack.c.bf16 %v1429_v41, %v1427_v40 }
 0x290   : > { %v1482_v45 = vpack.c.bf16 %v1430_v43, %v1428_v42  ;;  %v1308_v47 = vpop.f32.mrb[24].mxu1 }
 0x291   : > { %v1309_v49 = vadd.f32 %v1308_v47, %v5479_v7  ;;  %v1310_v50 = vpop.f32.mrb[25].mxu1 }
 0x292   : > { %v1311_v53 = vadd.f32 %v1310_v50, %v5482_v8  ;;  %v1312_v54 = vpop.f32.mrb[26].mxu1  ;;  %1791 = vmatprep.mubr.bf16.mxu0 %v1482_v45 }
 0x293   : > { %v1313_v55 = vadd.f32 %v1312_v54, %v5479_v7  ;;  %v1314_v56 = vpop.f32.mrb[27].mxu1  ;;  %1792 = vmatmul.mubr.bf16.gmra.mrb[84].mxu0 %v1481_v44  ;;  %v1431_v58 = vmax.f32 %v1309_v49, 0.0 }
 0x294   : > { %v1315_v57 = vadd.f32 %v1314_v56, %v5482_v8  ;;  %v1432_v60 = vmax.f32 %v1311_v53, 0.0 }
 0x295   : > { %v1433_v59 = vmax.f32 %v1313_v55, 0.0 }
 0x296   : > { %v1434_v61 = vmax.f32 %v1315_v57, 0.0 }
 0x297   : > { %v1483_v62 = vpack.c.bf16 %v1433_v59, %v1431_v58 }
 0x298   : > { %v1484_v63 = vpack.c.bf16 %v1434_v61, %v1432_v60  ;;  %v1318_v1 = vpop.f32.mrb[28].mxu1 }
 0x299   : > { %v1319_v2 = vadd.f32 %v1318_v1, %v5479_v7  ;;  %v1320_v3 = vpop.f32.mrb[29].mxu1 }
 0x29a   : > { %v1321_v4 = vadd.f32 %v1320_v3, %v5482_v8  ;;  %v1322_v51 = vpop.f32.mrb[30].mxu1  ;;  %1801 = vmatprep.mubr.bf16.mxu0 %v1484_v63 }
 0x29b   : > { %v1323_v52 = vadd.f32 %v1322_v51, %v5479_v7  ;;  %v1324_v5 = vpop.f32.mrb[31].mxu1  ;;  %1802 = vmatmul.mubr.bf16.gmra.mrb[88].mxu0 %v1483_v62  ;;  %v1435_v9 = vmax.f32 %v1319_v2, 0.0 }
 0x29c   : > { %v1325_v6 = vadd.f32 %v1324_v5, %v5482_v8  ;;  %v1436_v11 = vmax.f32 %v1321_v4, 0.0 }
 0x29d   : > { %v1437_v10 = vmax.f32 %v1323_v52, 0.0 }
 0x29e   : > { %v1438_v12 = vmax.f32 %v1325_v6, 0.0 }
 0x29f   : > { %v1485_v13 = vpack.c.bf16 %v1437_v10, %v1435_v9 }
 0x2a0   : > { %v1486_v14 = vpack.c.bf16 %v1438_v12, %v1436_v11  ;;  %v1328_v15 = vpop.f32.mrb[32].mxu1 }
 0x2a1   : > { %v1329_v16 = vadd.f32 %v1328_v15, %v5479_v7  ;;  %v1330_v17 = vpop.f32.mrb[33].mxu1 }
 0x2a2   : > { %v1331_v18 = vadd.f32 %v1330_v17, %v5482_v8  ;;  %v1332_v19 = vpop.f32.mrb[34].mxu1  ;;  %1811 = vmatprep.mubr.bf16.mxu0 %v1486_v14 }
 0x2a3   : > { %v1333_v20 = vadd.f32 %v1332_v19, %v5479_v7  ;;  %v1334_v21 = vpop.f32.mrb[35].mxu1  ;;  %1812 = vmatmul.mubr.bf16.gmra.mrb[92].mxu0 %v1485_v13  ;;  %v1439_v23 = vmax.f32 %v1329_v16, 0.0 }
 0x2a4   : > { %v1335_v22 = vadd.f32 %v1334_v21, %v5482_v8  ;;  %v1440_v25 = vmax.f32 %v1331_v18, 0.0 }
 0x2a5   : > { %v1441_v24 = vmax.f32 %v1333_v20, 0.0 }
 0x2a6   : > { %v1442_v26 = vmax.f32 %v1335_v22, 0.0 }
 0x2a7   : > { %v1487_v27 = vpack.c.bf16 %v1441_v24, %v1439_v23 }
 0x2a8   : > { %v1488_v28 = vpack.c.bf16 %v1442_v26, %v1440_v25  ;;  %v1338_v29 = vpop.f32.mrb[36].mxu1 }
 0x2a9   : > { %v1339_v30 = vadd.f32 %v1338_v29, %v5479_v7  ;;  %v1340_v31 = vpop.f32.mrb[37].mxu1 }
 0x2aa   : > { %v1341_v32 = vadd.f32 %v1340_v31, %v5482_v8  ;;  %v1342_v33 = vpop.f32.mrb[38].mxu1  ;;  %1821 = vmatprep.mubr.bf16.mxu0 %v1488_v28 }
 0x2ab   : > { %v1343_v34 = vadd.f32 %v1342_v33, %v5479_v7  ;;  %v1344_v35 = vpop.f32.mrb[39].mxu1  ;;  %1822 = vmatmul.mubr.bf16.gmra.mrb[96].mxu0 %v1487_v27  ;;  %v1443_v37 = vmax.f32 %v1339_v30, 0.0 }
 0x2ac   : > { %v1345_v36 = vadd.f32 %v1344_v35, %v5482_v8  ;;  %v1444_v39 = vmax.f32 %v1341_v32, 0.0 }
 0x2ad   : > { %v1445_v38 = vmax.f32 %v1343_v34, 0.0 }
 0x2ae   : > { %v1446_v40 = vmax.f32 %v1345_v36, 0.0 }
 0x2af   : > { %v1489_v41 = vpack.c.bf16 %v1445_v38, %v1443_v37 }
 0x2b0   : > { %v1490_v42 = vpack.c.bf16 %v1446_v40, %v1444_v39  ;;  %v1348_v43 = vpop.f32.mrb[40].mxu1 }
 0x2b1   : > { %v1349_v44 = vadd.f32 %v1348_v43, %v5479_v7  ;;  %v1350_v45 = vpop.f32.mrb[41].mxu1 }
 0x2b2   : > { %v1351_v47 = vadd.f32 %v1350_v45, %v5482_v8  ;;  %v1352_v49 = vpop.f32.mrb[42].mxu1  ;;  %1831 = vmatprep.mubr.bf16.mxu0 %v1490_v42 }
 0x2b3   : > { %v1353_v50 = vadd.f32 %v1352_v49, %v5479_v7  ;;  %v1354_v53 = vpop.f32.mrb[43].mxu1  ;;  %1832 = vmatmul.mubr.bf16.gmra.mrb[100].mxu0 %v1489_v41  ;;  %v1447_v55 = vmax.f32 %v1349_v44, 0.0 }
 0x2b4   : > { %v1355_v54 = vadd.f32 %v1354_v53, %v5482_v8  ;;  %v1448_v57 = vmax.f32 %v1351_v47, 0.0 }
 0x2b5   : > { %v1449_v56 = vmax.f32 %v1353_v50, 0.0 }
 0x2b6   : > { %v1450_v58 = vmax.f32 %v1355_v54, 0.0 }
 0x2b7   : > { %v1491_v59 = vpack.c.bf16 %v1449_v56, %v1447_v55 }
 0x2b8   : > { %v1492_v60 = vpack.c.bf16 %v1450_v58, %v1448_v57  ;;  %v1358_v61 = vpop.f32.mrb[44].mxu1 }
 0x2b9   : > { %v1359_v62 = vadd.f32 %v1358_v61, %v5479_v7  ;;  %v1360_v63 = vpop.f32.mrb[45].mxu1 }
 0x2ba   : > { %v1361_v1 = vadd.f32 %v1360_v63, %v5482_v8  ;;  %v1362_v2 = vpop.f32.mrb[46].mxu1  ;;  %1841 = vmatprep.mubr.bf16.mxu0 %v1492_v60 }
 0x2bb   : > { %v1363_v3 = vadd.f32 %v1362_v2, %v5479_v7  ;;  %v1364_v4 = vpop.f32.mrb[47].mxu1  ;;  %1842 = vmatmul.mubr.bf16.gmra.mrb[104].mxu0 %v1491_v59  ;;  %v1451_v52 = vmax.f32 %v1359_v62, 0.0 }
 0x2bc   : > { %v1365_v51 = vadd.f32 %v1364_v4, %v5482_v8  ;;  %v1452_v6 = vmax.f32 %v1361_v1, 0.0 }
 0x2bd   : > { %v1453_v5 = vmax.f32 %v1363_v3, 0.0 }
 0x2be   : > { %v1454_v9 = vmax.f32 %v1365_v51, 0.0 }
 0x2bf   : > { %v1493_v10 = vpack.c.bf16 %v1453_v5, %v1451_v52 }
 0x2c0   : > { %v1494_v11 = vpack.c.bf16 %v1454_v9, %v1452_v6  ;;  %v1368_v12 = vpop.f32.mrb[48].mxu1  ;;  %v4251_v9 = vld [vmem:[%s6143_s7 + $0x2] ss:$8 sm:$0x3] }
 0x2c1   : > { %v1369_v13 = vadd.f32 %v1368_v12, %v5479_v7  ;;  %v1370_v14 = vpop.f32.mrb[49].mxu1 }
 0x2c2   : > { %v1371_v15 = vadd.f32 %v1370_v14, %v5482_v8  ;;  %v1372_v16 = vpop.f32.mrb[50].mxu1  ;;  %1851 = vmatprep.mubr.bf16.mxu0 %v1494_v11 }
 0x2c3   : > { %v1373_v17 = vadd.f32 %v1372_v16, %v5479_v7  ;;  %v1374_v18 = vpop.f32.mrb[51].mxu1  ;;  %1852 = vmatmul.mubr.bf16.gmra.mrb[108].mxu0 %v1493_v10  ;;  %v1455_v20 = vmax.f32 %v1369_v13, 0.0  ;;  %v5588_v10 = vrot.slane %v4251_v9, %v5386_v46 }
 0x2c4   : > { %v1375_v19 = vadd.f32 %v1374_v18, %v5482_v8  ;;  %v1456_v22 = vmax.f32 %v1371_v15, 0.0 }
 0x2c5   : > { %v1457_v21 = vmax.f32 %v1373_v17, 0.0  ;;  %v4857_v17 = vld [vmem:[%s6141_s5 + $0x4] ss:$8 sps:$4 sm:$0xff]  }
 0x2c6   : > { %v1458_v23 = vmax.f32 %v1375_v19, 0.0  ;;  %2421 = vmatprep.subr.bf16.mxu0 %v4857_v17 }
 0x2c7   : > { %v1495_v24 = vpack.c.bf16 %v1457_v21, %v1455_v20 }
 0x2c8   : > { %v1496_v25 = vpack.c.bf16 %v1458_v23, %v1456_v22  ;;  %v1378_v26 = vpop.f32.mrb[52].mxu1  ;;  %v5603_v23 = vld [vmem:[%s6141_s5 + $0x10] sm:$0x33] }
 0x2c9   : > { %v1379_v27 = vadd.f32 %v1378_v26, %v5479_v7  ;;  %v1380_v28 = vpop.f32.mrb[53].mxu1 }
 0x2ca   : > { %v1381_v29 = vadd.f32 %v1380_v28, %v5482_v8  ;;  %v1382_v30 = vpop.f32.mrb[54].mxu1  ;;  %1861 = vmatprep.mubr.bf16.mxu0 %v1496_v25 }
 0x2cb   : > { %v1383_v31 = vadd.f32 %v1382_v30, %v5479_v7  ;;  %v1384_v32 = vpop.f32.mrb[55].mxu1  ;;  %1862 = vmatmul.mubr.bf16.gmra.mrb[112].mxu0 %v1495_v24  ;;  %v1459_v34 = vmax.f32 %v1379_v27, 0.0  ;;  %v4855_v27 = vld [vmem:[%s6141_s5] ss:$8 sps:$4 sm:$0xff]   ;;  %v4304_v30 = vcombine.high %v5603_v23, %v5603_v23 }
 0x2cc   : > { %v1385_v33 = vadd.f32 %v1384_v32, %v5482_v8  ;;  %v1460_v36 = vmax.f32 %v1381_v29, 0.0 }
 0x2cd   : > { %v1461_v35 = vmax.f32 %v1383_v31, 0.0 }
 0x2ce   : > { %v1462_v37 = vmax.f32 %v1385_v33, 0.0 }
 0x2cf   : > { %v1497_v38 = vpack.c.bf16 %v1461_v35, %v1459_v34 }
 0x2d0   : > { %v1498_v39 = vpack.c.bf16 %v1462_v37, %v1460_v36  ;;  %v1388_v40 = vpop.f32.mrb[56].mxu1 }
 0x2d1   : > { %v1389_v41 = vadd.f32 %v1388_v40, %v5479_v7  ;;  %v1390_v42 = vpop.f32.mrb[57].mxu1 }
 0x2d2   : > { %v1391_v43 = vadd.f32 %v1390_v42, %v5482_v8  ;;  %v1392_v44 = vpop.f32.mrb[58].mxu1  ;;  %1871 = vmatprep.mubr.bf16.mxu0 %v1498_v39 }
 0x2d3   : > { %v1393_v45 = vadd.f32 %v1392_v44, %v5479_v7  ;;  %v1394_v47 = vpop.f32.mrb[59].mxu1  ;;  %1872 = vmatmul.mubr.bf16.gmra.mrb[116].mxu0 %v1497_v38  ;;  %v1463_v50 = vmax.f32 %v1389_v41, 0.0 }
 0x2d4   : > { %v1395_v49 = vadd.f32 %v1394_v47, %v5482_v8  ;;  %v1464_v54 = vmax.f32 %v1391_v43, 0.0 }
 0x2d5   : > { %v1465_v53 = vmax.f32 %v1393_v45, 0.0 }
 0x2d6   : > { %v1466_v55 = vmax.f32 %v1395_v49, 0.0 }
 0x2d7   : > { %v1499_v56 = vpack.c.bf16 %v1465_v53, %v1463_v50 }
 0x2d8   : > { %v1500_v57 = vpack.c.bf16 %v1466_v55, %v1464_v54  ;;  %v1398_v58 = vpop.f32.mrb[60].mxu1 }
 0x2d9   : > { %v1399_v59 = vadd.f32 %v1398_v58, %v5479_v7  ;;  %v1400_v60 = vpop.f32.mrb[61].mxu1 }
 0x2da   : > { %v1401_v61 = vadd.f32 %v1400_v60, %v5482_v8  ;;  %v1402_v62 = vpop.f32.mrb[62].mxu1  ;;  %1881 = vmatprep.mubr.bf16.mxu0 %v1500_v57 }
 0x2db   : > { %v1403_v63 = vadd.f32 %v1402_v62, %v5479_v7  ;;  %v1404_v1 = vpop.f32.mrb[63].mxu1  ;;  %1882 = vmatmul.mubr.bf16.gmra.mrb[120].mxu0 %v1499_v56  ;;  %v1467_v3 = vmax.f32 %v1399_v59, 0.0  ;;  %v5591_v7 = vrot.slane %v4251_v9, %v5391_v48 }
 0x2dc   : > { %v1405_v2 = vadd.f32 %v1404_v1, %v5482_v8  ;;  %v1468_v51 = vmax.f32 %v1401_v61, 0.0 }
 0x2dd   : > { %v1469_v4 = vmax.f32 %v1403_v63, 0.0 }
 0x2de   : > { %v1470_v52 = vmax.f32 %v1405_v2, 0.0 }
 0x2df   : > { %v1501_v5 = vpack.c.bf16 %v1469_v4, %v1467_v3 }
 0x2e0   : > { %v1502_v6 = vpack.c.bf16 %v1470_v52, %v1468_v51 }
 0x2e2   : > { %1891 = vmatprep.mubr.bf16.mxu0 %v1502_v6 }
 0x2e3   : > { %1892 = vmatmul.mubr.bf16.gmra.mrb[124].mxu0 %v1501_v5 }
 0x33e   : > { %v1743_v11 = vpop.f32.mrb[64].mxu0 }
 0x33f   : > { %v1744_v8 = vadd.f32 %v1743_v11, %v5588_v10  ;;  %v1745_v12 = vpop.f32.mrb[65].mxu0 }
 0x340   : > { %v1746_v13 = vadd.f32 %v1745_v12, %v5591_v7  ;;  %v1747_v14 = vpop.f32.mrb[66].mxu0 }
 0x341   : > { %v1748_v15 = vadd.f32 %v1747_v14, %v5588_v10  ;;  %v1749_v16 = vpop.f32.mrb[67].mxu0  ;;  %v1902_v19 = vmax.f32 %v1744_v8, 0.0 }
 0x342   : > { %v1750_v18 = vadd.f32 %v1749_v16, %v5591_v7  ;;  %v1903_v21 = vmax.f32 %v1746_v13, 0.0 }
 0x343   : > { %v1904_v20 = vmax.f32 %v1748_v15, 0.0 }
 0x344   : > { %v1905_v22 = vmax.f32 %v1750_v18, 0.0 }
 0x345   : > { %v1966_v24 = vpack.c.bf16 %v1904_v20, %v1902_v19 }
 0x346   : > { %v1967_v25 = vpack.c.bf16 %v1905_v22, %v1903_v21  ;;  %v1753_v26 = vpop.f32.mrb[68].mxu0 }
 0x347   : > { %v1754_v28 = vadd.f32 %v1753_v26, %v5588_v10  ;;  %v1755_v29 = vpop.f32.mrb[69].mxu0 }
 0x348   : > { %v1756_v31 = vadd.f32 %v1755_v29, %v5591_v7  ;;  %v1757_v32 = vpop.f32.mrb[70].mxu0  ;;  %2159 = vmatprep.mubr.bf16.mxu0 %v1967_v25 }
 0x349   : > { %v1758_v33 = vadd.f32 %v1757_v32, %v5588_v10  ;;  %v1759_v34 = vpop.f32.mrb[71].mxu0  ;;  %2160 = vmatmul.mubr.bf16.vlgmr.msra.gmra.mrb[128].mxu0 %v1966_v24  ;;  %v1906_v36 = vmax.f32 %v1754_v28, 0.0 }
 0x34a   : > { %v1760_v35 = vadd.f32 %v1759_v34, %v5591_v7  ;;  %2422 = vmatpush1.bf16.msra.mxu0 %v4855_v27  ;;  %v1907_v38 = vmax.f32 %v1756_v31, 0.0 }
 0x34b   : > { %v1908_v37 = vmax.f32 %v1758_v33, 0.0  ;;  %4305 = vmatprep.subr.msk.bf16.mxu0 %vm713_vm0, %v4304_v30 }
 0x34c   : > { %v1909_v39 = vmax.f32 %v1760_v35, 0.0 }
 0x34d   : > { %v1968_v40 = vpack.c.bf16 %v1908_v37, %v1906_v36 }
 0x34e   : > { %v1969_v41 = vpack.c.bf16 %v1909_v39, %v1907_v38  ;;  %v1763_v42 = vpop.f32.mrb[72].mxu0 }
 0x34f   : > { %v1764_v43 = vadd.f32 %v1763_v42, %v5588_v10  ;;  %v1765_v44 = vpop.f32.mrb[73].mxu0 }
 0x350   : > { %v1766_v45 = vadd.f32 %v1765_v44, %v5591_v7  ;;  %v1767_v47 = vpop.f32.mrb[74].mxu0  ;;  %2167 = vmatprep.mubr.bf16.mxu0 %v1969_v41 }
 0x351   : > { %v1768_v49 = vadd.f32 %v1767_v47, %v5588_v10  ;;  %v1769_v50 = vpop.f32.mrb[75].mxu0  ;;  %2168 = vmatmul.mubr.bf16.gmra.mrb[132].mxu0 %v1968_v40  ;;  %v1910_v54 = vmax.f32 %v1764_v43, 0.0 }
 0x352   : > { %v1770_v53 = vadd.f32 %v1769_v50, %v5591_v7  ;;  %v1911_v56 = vmax.f32 %v1766_v45, 0.0 }
 0x353   : > { %v1912_v55 = vmax.f32 %v1768_v49, 0.0 }
 0x354   : > { %v1913_v57 = vmax.f32 %v1770_v53, 0.0 }
 0x355   : > { %v1970_v58 = vpack.c.bf16 %v1912_v55, %v1910_v54 }
 0x356   : > { %v1971_v59 = vpack.c.bf16 %v1913_v57, %v1911_v56  ;;  %v1773_v60 = vpop.f32.mrb[76].mxu0 }
 0x357   : > { %v1774_v61 = vadd.f32 %v1773_v60, %v5588_v10  ;;  %v1775_v62 = vpop.f32.mrb[77].mxu0 }
 0x358   : > { %v1776_v63 = vadd.f32 %v1775_v62, %v5591_v7  ;;  %v1777_v1 = vpop.f32.mrb[78].mxu0  ;;  %2175 = vmatprep.mubr.bf16.mxu0 %v1971_v59 }
 0x359   : > { %v1778_v2 = vadd.f32 %v1777_v1, %v5588_v10  ;;  %v1779_v3 = vpop.f32.mrb[79].mxu0  ;;  %2176 = vmatmul.mubr.bf16.gmra.mrb[136].mxu0 %v1970_v58  ;;  %v1914_v51 = vmax.f32 %v1774_v61, 0.0 }
 0x35a   : > { %v1780_v4 = vadd.f32 %v1779_v3, %v5591_v7  ;;  %2453 = vmatprep.mubr.bf16.mxu0 %v5135_v0  ;;  %v1915_v5 = vmax.f32 %v1776_v63, 0.0 }
 0x35b   : > { %v1916_v52 = vmax.f32 %v1778_v2, 0.0 }
 0x35c   : > { %v1917_v6 = vmax.f32 %v1780_v4, 0.0 }
 0x35d   : > { %v1972_v9 = vpack.c.bf16 %v1916_v52, %v1914_v51 }
 0x35e   : > { %v1973_v11 = vpack.c.bf16 %v1917_v6, %v1915_v5  ;;  %v1783_v8 = vpop.f32.mrb[80].mxu0 }
 0x35f   : > { %v1784_v12 = vadd.f32 %v1783_v8, %v5588_v10  ;;  %v1785_v13 = vpop.f32.mrb[81].mxu0 }
 0x360   : > { %v1786_v14 = vadd.f32 %v1785_v13, %v5591_v7  ;;  %v1787_v15 = vpop.f32.mrb[82].mxu0  ;;  %2183 = vmatprep.mubr.bf16.mxu1 %v1973_v11 }
 0x361   : > { %v1788_v16 = vadd.f32 %v1787_v15, %v5588_v10  ;;  %v1789_v17 = vpop.f32.mrb[83].mxu0  ;;  %2184 = vmatmul.mubr.bf16.vlgmr.msra.gmra.mrb[64].mxu1 %v1972_v9  ;;  %v1918_v19 = vmax.f32 %v1784_v12, 0.0 }
 0x362   : > { %v1790_v18 = vadd.f32 %v1789_v17, %v5591_v7  ;;  %v1919_v21 = vmax.f32 %v1786_v14, 0.0 }
 0x363   : > { %v1920_v20 = vmax.f32 %v1788_v16, 0.0 }
 0x364   : > { %v1921_v22 = vmax.f32 %v1790_v18, 0.0 }
 0x365   : > { %v1974_v24 = vpack.c.bf16 %v1920_v20, %v1918_v19 }
 0x366   : > { %v1975_v25 = vpack.c.bf16 %v1921_v22, %v1919_v21  ;;  %v1793_v26 = vpop.f32.mrb[84].mxu0 }
 0x367   : > { %v1794_v27 = vadd.f32 %v1793_v26, %v5588_v10  ;;  %v1795_v28 = vpop.f32.mrb[85].mxu0 }
 0x368   : > { %v1796_v29 = vadd.f32 %v1795_v28, %v5591_v7  ;;  %v1797_v30 = vpop.f32.mrb[86].mxu0  ;;  %2191 = vmatprep.mubr.bf16.mxu1 %v1975_v25 }
 0x369   : > { %v1798_v31 = vadd.f32 %v1797_v30, %v5588_v10  ;;  %v1799_v32 = vpop.f32.mrb[87].mxu0  ;;  %2192 = vmatmul.mubr.bf16.gmra.mrb[68].mxu1 %v1974_v24  ;;  %v1922_v34 = vmax.f32 %v1794_v27, 0.0 }
 0x36a   : > { %v1800_v33 = vadd.f32 %v1799_v32, %v5591_v7  ;;  %v1923_v36 = vmax.f32 %v1796_v29, 0.0 }
 0x36b   : > { %v1924_v35 = vmax.f32 %v1798_v31, 0.0 }
 0x36c   : > { %v1925_v37 = vmax.f32 %v1800_v33, 0.0 }
 0x36d   : > { %v1976_v38 = vpack.c.bf16 %v1924_v35, %v1922_v34 }
 0x36e   : > { %v1977_v39 = vpack.c.bf16 %v1925_v37, %v1923_v36  ;;  %v1803_v40 = vpop.f32.mrb[88].mxu0 }
 0x36f   : > { %v1804_v41 = vadd.f32 %v1803_v40, %v5588_v10  ;;  %v1805_v42 = vpop.f32.mrb[89].mxu0 }
 0x370   : > { %v1806_v43 = vadd.f32 %v1805_v42, %v5591_v7  ;;  %v1807_v44 = vpop.f32.mrb[90].mxu0  ;;  %2199 = vmatprep.mubr.bf16.mxu1 %v1977_v39 }
 0x371   : > { %v1808_v45 = vadd.f32 %v1807_v44, %v5588_v10  ;;  %v1809_v47 = vpop.f32.mrb[91].mxu0  ;;  %2200 = vmatmul.mubr.bf16.gmra.mrb[72].mxu1 %v1976_v38  ;;  %v1926_v50 = vmax.f32 %v1804_v41, 0.0 }
 0x372   : > { %v1810_v49 = vadd.f32 %v1809_v47, %v5591_v7  ;;  %v1927_v54 = vmax.f32 %v1806_v43, 0.0 }
 0x373   : > { %v1928_v53 = vmax.f32 %v1808_v45, 0.0 }
 0x374   : > { %v1929_v55 = vmax.f32 %v1810_v49, 0.0 }
 0x375   : > { %v1978_v56 = vpack.c.bf16 %v1928_v53, %v1926_v50 }
 0x376   : > { %v1979_v57 = vpack.c.bf16 %v1929_v55, %v1927_v54  ;;  %v1813_v58 = vpop.f32.mrb[92].mxu0 }
 0x377   : > { %v1814_v59 = vadd.f32 %v1813_v58, %v5588_v10  ;;  %v1815_v60 = vpop.f32.mrb[93].mxu0 }
 0x378   : > { %v1816_v61 = vadd.f32 %v1815_v60, %v5591_v7  ;;  %v1817_v62 = vpop.f32.mrb[94].mxu0  ;;  %2207 = vmatprep.mubr.bf16.mxu1 %v1979_v57 }
 0x379   : > { %v1818_v63 = vadd.f32 %v1817_v62, %v5588_v10  ;;  %v1819_v1 = vpop.f32.mrb[95].mxu0  ;;  %2208 = vmatmul.mubr.bf16.gmra.mrb[76].mxu1 %v1978_v56  ;;  %v1930_v3 = vmax.f32 %v1814_v59, 0.0 }
 0x37a   : > { %v1820_v2 = vadd.f32 %v1819_v1, %v5591_v7  ;;  %v1931_v51 = vmax.f32 %v1816_v61, 0.0 }
 0x37b   : > { %v1932_v4 = vmax.f32 %v1818_v63, 0.0 }
 0x37c   : > { %v1933_v52 = vmax.f32 %v1820_v2, 0.0 }
 0x37d   : > { %v1980_v5 = vpack.c.bf16 %v1932_v4, %v1930_v3 }
 0x37e   : > { %v1981_v6 = vpack.c.bf16 %v1933_v52, %v1931_v51  ;;  %v1823_v9 = vpop.f32.mrb[96].mxu0  ;;  %v4303_v51 = vcombine.low %v5603_v23, %v5603_v23 }
 0x37f   : > { %v1824_v11 = vadd.f32 %v1823_v9, %v5588_v10  ;;  %v1825_v8 = vpop.f32.mrb[97].mxu0 }
 0x380   : > { %v1826_v12 = vadd.f32 %v1825_v8, %v5591_v7  ;;  %v1827_v13 = vpop.f32.mrb[98].mxu0  ;;  %2215 = vmatprep.mubr.bf16.mxu1 %v1981_v6  ;;  %v2416_v9 = vsel %vm713_vm0, %v4303_v51, 0 }
 0x381   : > { %v1828_v14 = vadd.f32 %v1827_v13, %v5588_v10  ;;  %v1829_v15 = vpop.f32.mrb[99].mxu0  ;;  %2216 = vmatmul.mubr.bf16.gmra.mrb[80].mxu1 %v1980_v5  ;;  %v1934_v17 = vmax.f32 %v1824_v11, 0.0  ;;  %2424 = vmatpush1.bf16.msra.mxu0 %v2416_v9 }
 0x382   : > { %v1830_v16 = vadd.f32 %v1829_v15, %v5591_v7  ;;  %v1935_v19 = vmax.f32 %v1826_v12, 0.0 }
 0x383   : > { %v1936_v18 = vmax.f32 %v1828_v14, 0.0 }
 0x384   : > { %v1937_v20 = vmax.f32 %v1830_v16, 0.0 }
 0x385   : > { %v1982_v21 = vpack.c.bf16 %v1936_v18, %v1934_v17 }
 0x386   : > { %v1983_v22 = vpack.c.bf16 %v1937_v20, %v1935_v19  ;;  %v1833_v24 = vpop.f32.mrb[100].mxu0 }
 0x387   : > { %v1834_v25 = vadd.f32 %v1833_v24, %v5588_v10  ;;  %v1835_v26 = vpop.f32.mrb[101].mxu0 }
 0x388   : > { %v1836_v27 = vadd.f32 %v1835_v26, %v5591_v7  ;;  %v1837_v28 = vpop.f32.mrb[102].mxu0  ;;  %2223 = vmatprep.mubr.bf16.mxu1 %v1983_v22 }
 0x389   : > { %v1838_v29 = vadd.f32 %v1837_v28, %v5588_v10  ;;  %v1839_v30 = vpop.f32.mrb[103].mxu0  ;;  %2224 = vmatmul.mubr.bf16.gmra.mrb[84].mxu1 %v1982_v21  ;;  %v1938_v32 = vmax.f32 %v1834_v25, 0.0 }
 0x38a   : > { %v1840_v31 = vadd.f32 %v1839_v30, %v5591_v7  ;;  %v1939_v34 = vmax.f32 %v1836_v27, 0.0 }
 0x38b   : > { %v1940_v33 = vmax.f32 %v1838_v29, 0.0 }
 0x38c   : > { %v1941_v35 = vmax.f32 %v1840_v31, 0.0 }
 0x38d   : > { %v1984_v36 = vpack.c.bf16 %v1940_v33, %v1938_v32 }
 0x38e   : > { %v1985_v37 = vpack.c.bf16 %v1941_v35, %v1939_v34  ;;  %v1843_v38 = vpop.f32.mrb[104].mxu0 }
 0x38f   : > { %v1844_v39 = vadd.f32 %v1843_v38, %v5588_v10  ;;  %v1845_v40 = vpop.f32.mrb[105].mxu0 }
 0x390   : > { %v1846_v41 = vadd.f32 %v1845_v40, %v5591_v7  ;;  %v1847_v42 = vpop.f32.mrb[106].mxu0  ;;  %2231 = vmatprep.mubr.bf16.mxu1 %v1985_v37 }
 0x391   : > { %v1848_v43 = vadd.f32 %v1847_v42, %v5588_v10  ;;  %v1849_v44 = vpop.f32.mrb[107].mxu0  ;;  %2232 = vmatmul.mubr.bf16.gmra.mrb[88].mxu1 %v1984_v36  ;;  %v1942_v47 = vmax.f32 %v1844_v39, 0.0 }
 0x392   : > { %v1850_v45 = vadd.f32 %v1849_v44, %v5591_v7  ;;  %v1943_v50 = vmax.f32 %v1846_v41, 0.0 }
 0x393   : > { %v1944_v49 = vmax.f32 %v1848_v43, 0.0 }
 0x394   : > { %v1945_v53 = vmax.f32 %v1850_v45, 0.0 }
 0x395   : > { %v1986_v54 = vpack.c.bf16 %v1944_v49, %v1942_v47 }
 0x396   : > { %v1987_v55 = vpack.c.bf16 %v1945_v53, %v1943_v50  ;;  %v1853_v56 = vpop.f32.mrb[108].mxu0 }
 0x397   : > { %v1854_v57 = vadd.f32 %v1853_v56, %v5588_v10  ;;  %v1855_v58 = vpop.f32.mrb[109].mxu0 }
 0x398   : > { %v1856_v59 = vadd.f32 %v1855_v58, %v5591_v7  ;;  %v1857_v60 = vpop.f32.mrb[110].mxu0  ;;  %2239 = vmatprep.mubr.bf16.mxu1 %v1987_v55 }
 0x399   : > { %v1858_v61 = vadd.f32 %v1857_v60, %v5588_v10  ;;  %v1859_v62 = vpop.f32.mrb[111].mxu0  ;;  %2240 = vmatmul.mubr.bf16.gmra.mrb[92].mxu1 %v1986_v54  ;;  %v1946_v1 = vmax.f32 %v1854_v57, 0.0 }
 0x39a   : > { %v1860_v63 = vadd.f32 %v1859_v62, %v5591_v7  ;;  %v1947_v3 = vmax.f32 %v1856_v59, 0.0 }
 0x39b   : > { %v1948_v2 = vmax.f32 %v1858_v61, 0.0 }
 0x39c   : > { %v1949_v4 = vmax.f32 %v1860_v63, 0.0 }
 0x39d   : > { %v1988_v52 = vpack.c.bf16 %v1948_v2, %v1946_v1 }
 0x39e   : > { %v1989_v5 = vpack.c.bf16 %v1949_v4, %v1947_v3  ;;  %v1863_v6 = vpop.f32.mrb[112].mxu0 }
 0x39f   : > { %v1864_v11 = vadd.f32 %v1863_v6, %v5588_v10  ;;  %v1865_v8 = vpop.f32.mrb[113].mxu0 }
 0x3a0   : > { %v1866_v12 = vadd.f32 %v1865_v8, %v5591_v7  ;;  %v1867_v13 = vpop.f32.mrb[114].mxu0  ;;  %2247 = vmatprep.mubr.bf16.mxu1 %v1989_v5  ;;  %v5678_v5 = vld [vmem:[%s6143_s7 + $0x3] ss:$0 sm:$0xff]  ;;  %v4862_v8 = vld [vmem:[#allocation2 + $0x204] ss:$8 sps:$4 sm:$0xff]  }
 0x3a1   : > { %v1868_v14 = vadd.f32 %v1867_v13, %v5588_v10  ;;  %v1869_v15 = vpop.f32.mrb[115].mxu0  ;;  %2248 = vmatmul.mubr.bf16.gmra.mrb[96].mxu1 %v1988_v52  ;;  %v1950_v23 = vmax.f32 %v1864_v11, 0.0  ;;  %v4860_v11 = vld [vmem:[#allocation2 + $0x200] ss:$8 sps:$4 sm:$0xff]   ;;  %2916 = vmatprep.subr.bf16.mxu1 %v4862_v8 }
 0x3a2   : > { %v1870_v16 = vadd.f32 %v1869_v15, %v5591_v7  ;;  %v1951_v18 = vmax.f32 %v1866_v12, 0.0  ;;  %2917 = vmatpush1.bf16.msra.mxu1 %v4860_v11  ;;  %v4863_v15 = vld [vmem:[#allocation2 + $0x210] ss:$8 sps:$4 sm:$0xff]  }
 0x3a3   : > { %v1952_v17 = vmax.f32 %v1868_v14, 0.0  ;;  %v4865_v14 = vld [vmem:[#allocation2 + $0x214] ss:$8 sps:$4 sm:$0xff]  }
 0x3a4   : > { %v1953_v19 = vmax.f32 %v1870_v16, 0.0  ;;  %2918 = vmatprep.subr.bf16.mxu1 %v4865_v14 }
 0x3a5   : > { %v1990_v20 = vpack.c.bf16 %v1952_v17, %v1950_v23  ;;  %v4868_v23 = vld [vmem:[#allocation2 + $0x224] ss:$8 sps:$4 sm:$0xff]  }
 0x3a6   : > { %v1991_v21 = vpack.c.bf16 %v1953_v19, %v1951_v18  ;;  %v1873_v22 = vpop.f32.mrb[116].mxu0  ;;  %2919 = vmatpush1.bf16.msra.mxu1 %v4863_v15  ;;  %v4887_v15 = vld [vmem:[#allocation2 + $0x290] ss:$8 sps:$4 sm:$0xff]  }
 0x3a7   : > { %v1874_v24 = vadd.f32 %v1873_v22, %v5588_v10  ;;  %v1875_v25 = vpop.f32.mrb[117].mxu0  ;;  %2920 = vmatprep.subr.bf16.mxu1 %v4868_v23  ;;  %v4892_v23 = vld [vmem:[#allocation2 + $0x2a4] ss:$8 sps:$4 sm:$0xff]  }
 0x3a8   : > { %v1876_v26 = vadd.f32 %v1875_v25, %v5591_v7  ;;  %v1877_v27 = vpop.f32.mrb[118].mxu0  ;;  %2255 = vmatprep.mubr.bf16.mxu1 %v1991_v21  ;;  %v4866_v21 = vld [vmem:[#allocation2 + $0x220] ss:$8 sps:$4 sm:$0xff]  }
 0x3a9   : > { %v1878_v28 = vadd.f32 %v1877_v27, %v5588_v10  ;;  %v1879_v29 = vpop.f32.mrb[119].mxu0  ;;  %2256 = vmatmul.mubr.bf16.gmra.mrb[100].mxu1 %v1990_v20  ;;  %v1954_v31 = vmax.f32 %v1874_v24, 0.0 }
 0x3aa   : > { %v1880_v30 = vadd.f32 %v1879_v29, %v5591_v7  ;;  %v1955_v33 = vmax.f32 %v1876_v26, 0.0  ;;  %v4871_v26 = vld [vmem:[#allocation2 + $0x234] ss:$8 sps:$4 sm:$0xff]   ;;  %2921 = vmatpush1.bf16.msra.mxu1 %v4866_v21  ;;  %v4890_v21 = vld [vmem:[#allocation2 + $0x2a0] ss:$8 sps:$4 sm:$0xff]  }
 0x3ab   : > { %v1956_v32 = vmax.f32 %v1878_v28, 0.0  ;;  %2922 = vmatprep.subr.bf16.mxu1 %v4871_v26  ;;  %v4895_v26 = vld [vmem:[#allocation2 + $0x2b4] ss:$8 sps:$4 sm:$0xff]  }
 0x3ac   : > { %v1957_v34 = vmax.f32 %v1880_v30, 0.0  ;;  %v4869_v30 = vld [vmem:[#allocation2 + $0x230] ss:$8 sps:$4 sm:$0xff]  }
 0x3ad   : > { %v1992_v35 = vpack.c.bf16 %v1956_v32, %v1954_v31  ;;  %v4874_v32 = vld [vmem:[#allocation2 + $0x244] ss:$8 sps:$4 sm:$0xff]  }
 0x3ae   : > { %v1993_v36 = vpack.c.bf16 %v1957_v34, %v1955_v33  ;;  %v1883_v37 = vpop.f32.mrb[120].mxu0  ;;  %2923 = vmatpush1.bf16.msra.mxu1 %v4869_v30  ;;  %v4893_v30 = vld [vmem:[#allocation2 + $0x2b0] ss:$8 sps:$4 sm:$0xff]  }
 0x3af   : > { %v1884_v38 = vadd.f32 %v1883_v37, %v5588_v10  ;;  %v1885_v39 = vpop.f32.mrb[121].mxu0  ;;  %v4872_v37 = vld [vmem:[#allocation2 + $0x240] ss:$8 sps:$4 sm:$0xff]   ;;  %2924 = vmatprep.subr.bf16.mxu1 %v4874_v32  ;;  %v4898_v32 = vld [vmem:[#allocation2 + $0x2c4] ss:$8 sps:$4 sm:$0xff]  }
 0x3b0   : > { %v1886_v40 = vadd.f32 %v1885_v39, %v5591_v7  ;;  %v1887_v41 = vpop.f32.mrb[122].mxu0  ;;  %2263 = vmatprep.mubr.bf16.mxu1 %v1993_v36 }
 0x3b1   : > { %v1888_v42 = vadd.f32 %v1887_v41, %v5588_v10  ;;  %v1889_v43 = vpop.f32.mrb[123].mxu0  ;;  %2264 = vmatmul.mubr.bf16.gmra.mrb[104].mxu1 %v1992_v35  ;;  %v1958_v45 = vmax.f32 %v1884_v38, 0.0  ;;  %v4877_v41 = vld [vmem:[#allocation2 + $0x254] ss:$8 sps:$4 sm:$0xff]  }
 0x3b2   : > { %v1890_v44 = vadd.f32 %v1889_v43, %v5591_v7  ;;  %v1959_v49 = vmax.f32 %v1886_v40, 0.0  ;;  %2925 = vmatpush1.bf16.msra.mxu1 %v4872_v37  ;;  %v4896_v37 = vld [vmem:[#allocation2 + $0x2c0] ss:$8 sps:$4 sm:$0xff]  }
 0x3b3   : > { %v1960_v47 = vmax.f32 %v1888_v42, 0.0  ;;  %2926 = vmatprep.subr.bf16.mxu1 %v4877_v41  ;;  %v4901_v41 = vld [vmem:[#allocation2 + $0x2d4] ss:$8 sps:$4 sm:$0xff]  }
 0x3b4   : > { %v1961_v50 = vmax.f32 %v1890_v44, 0.0 }
 0x3b5   : > { %v1994_v53 = vpack.c.bf16 %v1960_v47, %v1958_v45  ;;  %v4875_v45 = vld [vmem:[#allocation2 + $0x250] ss:$8 sps:$4 sm:$0xff]  }
 0x3b6   : > { %v1995_v54 = vpack.c.bf16 %v1961_v50, %v1959_v49  ;;  %v1893_v55 = vpop.f32.mrb[124].mxu0  ;;  %v4880_v49 = vld [vmem:[#allocation2 + $0x264] ss:$8 sps:$4 sm:$0xff]   ;;  %2927 = vmatpush1.bf16.msra.mxu1 %v4875_v45  ;;  %v4899_v45 = vld [vmem:[#allocation2 + $0x2d0] ss:$8 sps:$4 sm:$0xff]  }
 0x3b7   : > { %v1894_v56 = vadd.f32 %v1893_v55, %v5588_v10  ;;  %v1895_v57 = vpop.f32.mrb[125].mxu0  ;;  %2928 = vmatprep.subr.bf16.mxu1 %v4880_v49  ;;  %v4904_v49 = vld [vmem:[#allocation2 + $0x2e4] ss:$8 sps:$4 sm:$0xff]  }
 0x3b8   : > { %v1896_v58 = vadd.f32 %v1895_v57, %v5591_v7  ;;  %v1897_v59 = vpop.f32.mrb[126].mxu0  ;;  %2271 = vmatprep.mubr.bf16.mxu1 %v1995_v54 }
 0x3b9   : > { %v1898_v60 = vadd.f32 %v1897_v59, %v5588_v10  ;;  %v1899_v61 = vpop.f32.mrb[127].mxu0  ;;  %2272 = vmatmul.mubr.bf16.gmra.mrb[108].mxu1 %v1994_v53  ;;  %v1962_v63 = vmax.f32 %v1894_v56, 0.0  ;;  %v4878_v56 = vld [vmem:[#allocation2 + $0x260] ss:$8 sps:$4 sm:$0xff]  }
 0x3ba   : > { %v1900_v62 = vadd.f32 %v1899_v61, %v5591_v7  ;;  %v1963_v2 = vmax.f32 %v1896_v58, 0.0  ;;  %2929 = vmatpush1.bf16.msra.mxu1 %v4878_v56  ;;  %v4902_v56 = vld [vmem:[#allocation2 + $0x2e0] ss:$8 sps:$4 sm:$0xff]  }
 0x3bb   : > { %v1964_v1 = vmax.f32 %v1898_v60, 0.0  ;;  %v4883_v60 = vld [vmem:[#allocation2 + $0x274] ss:$8 sps:$4 sm:$0xff]  }
 0x3bc   : > { %v1965_v3 = vmax.f32 %v1900_v62, 0.0  ;;  %2930 = vmatprep.subr.bf16.mxu1 %v4883_v60 }
 0x3bd   : > { %v1996_v4 = vpack.c.bf16 %v1964_v1, %v1962_v63  ;;  %v4881_v1 = vld [vmem:[#allocation2 + $0x270] ss:$8 sps:$4 sm:$0xff]  }
 0x3be   : > { %v1997_v51 = vpack.c.bf16 %v1965_v3, %v1963_v2  ;;  %v4886_v3 = vld [vmem:[#allocation2 + $0x284] ss:$8 sps:$4 sm:$0xff]   ;;  %2931 = vmatpush1.bf16.msra.mxu1 %v4881_v1 }
 0x3bf   : > { %2932 = vmatprep.subr.bf16.mxu1 %v4886_v3 }
 0x3c0   : > { %2279 = vmatprep.mubr.bf16.mxu1 %v1997_v51 }
 0x3c1   : > { %2280 = vmatmul.mubr.bf16.gmra.mrb[112].mxu1 %v1996_v4 }
 0x41c   : > { %v4426_v52 = vpop.f32.mrb[128].mxu0 }
 0x41d   : > { %v4427_v6 = vpop.f32.mrb[129].mxu0 }
 0x41e   : > { %v4428_v10 = vadd.f32 %v4427_v6, %v4426_v52  ;;  %v4429_v9 = vpop.f32.mrb[130].mxu0 }
 0x41f   : > { %v4430_v7 = vpop.f32.mrb[131].mxu0 }
 0x420   : > { %v2162_v12 = vadd.f32 %v4428_v10, %v5678_v5  ;;  %v4431_v13 = vadd.f32 %v4430_v7, %v4429_v9  ;;  %v4884_v10 = vld [vmem:[#allocation2 + $0x280] ss:$8 sps:$4 sm:$0xff]   ;;  %v4889_v7 = vld [vmem:[#allocation2 + $0x294] ss:$8 sps:$4 sm:$0xff]  }
 0x421   : > { %2933 = vmatpush1.bf16.msra.mxu1 %v4884_v10 }
 0x422   : > { %v2165_v16 = vadd.f32 %v4431_v13, %v5678_v5  ;;  %v2288_v17 = vmax.f32 %v2162_v12, 0.0  ;;  %2934 = vmatprep.subr.bf16.mxu1 %v4889_v7 }
 0x424   : > { %v2289_v18 = vmax.f32 %v2165_v16, 0.0  ;;  %v4432_v19 = vpop.f32.mrb[132].mxu0 }
 0x425   : > { %v4433_v20 = vpop.f32.mrb[133].mxu0  ;;  %2935 = vmatpush1.bf16.msra.mxu1 %v4887_v15 }
 0x426   : > { %v2320_v22 = vpack.c.bf16 %v2289_v18, %v2288_v17  ;;  %v4434_v24 = vadd.f32 %v4433_v20, %v4432_v19  ;;  %v4435_v25 = vpop.f32.mrb[134].mxu0  ;;  %2936 = vmatprep.subr.bf16.mxu1 %v4892_v23 }
 0x427   : > { %v4436_v27 = vpop.f32.mrb[135].mxu0 }
 0x428   : > { %v2170_v28 = vadd.f32 %v4434_v24, %v5678_v5  ;;  %v4437_v29 = vadd.f32 %v4436_v27, %v4435_v25  ;;  %4306 = vmatmul.mubr.msk.bf16.vlgmr.msra.gmra.mrb[140].mxu0 %vm680_vm2, %v2320_v22 }
 0x429   : > { %2463 = vmatprep.mubr.bf16.mxu0 %v5135_v0  ;;  %2937 = vmatpush1.bf16.msra.mxu1 %v4890_v21 }
 0x42a   : > { %v2173_v31 = vadd.f32 %v4437_v29, %v5678_v5  ;;  %v2290_v33 = vmax.f32 %v2170_v28, 0.0  ;;  %2938 = vmatprep.subr.bf16.mxu1 %v4895_v26 }
 0x42c   : > { %v2291_v34 = vmax.f32 %v2173_v31, 0.0  ;;  %v4438_v35 = vpop.f32.mrb[136].mxu0 }
 0x42d   : > { %v4439_v36 = vpop.f32.mrb[137].mxu0  ;;  %2939 = vmatpush1.bf16.msra.mxu1 %v4893_v30 }
 0x42e   : > { %v2321_v38 = vpack.c.bf16 %v2291_v34, %v2290_v33  ;;  %v4440_v39 = vadd.f32 %v4439_v36, %v4438_v35  ;;  %v4441_v40 = vpop.f32.mrb[138].mxu0  ;;  %2940 = vmatprep.subr.bf16.mxu1 %v4898_v32 }
 0x42f   : > { %v4442_v42 = vpop.f32.mrb[139].mxu0 }
 0x430   : > { %v2178_v43 = vadd.f32 %v4440_v39, %v5678_v5  ;;  %v4443_v44 = vadd.f32 %v4442_v42, %v4441_v40  ;;  %4307 = vmatmul.mubr.msk.bf16.gmra.mrb[144].mxu0 %vm680_vm2, %v2321_v38 }
 0x431   : > { %2473 = vmatprep.mubr.bf16.mxu0 %v5135_v0  ;;  %2941 = vmatpush1.bf16.msra.mxu1 %v4896_v37 }
 0x432   : > { %v2181_v47 = vadd.f32 %v4443_v44, %v5678_v5  ;;  %v2292_v50 = vmax.f32 %v2178_v43, 0.0  ;;  %2942 = vmatprep.subr.bf16.mxu1 %v4901_v41 }
 0x434   : > { %v2293_v53 = vmax.f32 %v2181_v47, 0.0  ;;  %v4444_v54 = vpop.f32.mrb[64].mxu1 }
 0x435   : > { %v4445_v55 = vpop.f32.mrb[65].mxu1  ;;  %2943 = vmatpush1.bf16.msra.mxu1 %v4899_v45 }
 0x436   : > { %v2322_v57 = vpack.c.bf16 %v2293_v53, %v2292_v50  ;;  %v4446_v58 = vadd.f32 %v4445_v55, %v4444_v54  ;;  %v4447_v59 = vpop.f32.mrb[66].mxu1  ;;  %2944 = vmatprep.subr.bf16.mxu1 %v4904_v49 }
 0x437   : > { %v4448_v61 = vpop.f32.mrb[67].mxu1 }
 0x438   : > { %v2186_v62 = vadd.f32 %v4446_v58, %v5678_v5  ;;  %v4449_v63 = vadd.f32 %v4448_v61, %v4447_v59  ;;  %4308 = vmatmul.mubr.msk.bf16.gmra.mrb[148].mxu0 %vm680_vm2, %v2322_v57 }
 0x439   : > { %2483 = vmatprep.mubr.bf16.mxu0 %v5135_v0  ;;  %2945 = vmatpush1.bf16.msra.mxu1 %v4902_v56 }
 0x43a   : > { %v2189_v2 = vadd.f32 %v4449_v63, %v5678_v5  ;;  %v2294_v4 = vmax.f32 %v2186_v62, 0.0 }
 0x43c   : > { %v2295_v51 = vmax.f32 %v2189_v2, 0.0  ;;  %v4450_v52 = vpop.f32.mrb[68].mxu1 }
 0x43d   : > { %v4451_v6 = vpop.f32.mrb[69].mxu1 }
 0x43e   : > { %v2323_v9 = vpack.c.bf16 %v2295_v51, %v2294_v4  ;;  %v4452_v11 = vadd.f32 %v4451_v6, %v4450_v52  ;;  %v4453_v8 = vpop.f32.mrb[70].mxu1 }
 0x43f   : > { %v4454_v12 = vpop.f32.mrb[71].mxu1 }
 0x440   : > { %v2194_v13 = vadd.f32 %v4452_v11, %v5678_v5  ;;  %v4455_v14 = vadd.f32 %v4454_v12, %v4453_v8  ;;  %4309 = vmatmul.mubr.msk.bf16.gmra.mrb[152].mxu0 %vm680_vm2, %v2323_v9 }
 0x441   : > { %2493 = vmatprep.mubr.bf16.mxu0 %v5135_v0 }
 0x442   : > { %v2197_v16 = vadd.f32 %v4455_v14, %v5678_v5  ;;  %v2296_v17 = vmax.f32 %v2194_v13, 0.0 }
 0x444   : > { %v2297_v18 = vmax.f32 %v2197_v16, 0.0  ;;  %v4456_v19 = vpop.f32.mrb[72].mxu1 }
 0x445   : > { %v4457_v20 = vpop.f32.mrb[73].mxu1 }
 0x446   : > { %v2324_v22 = vpack.c.bf16 %v2297_v18, %v2296_v17  ;;  %v4458_v24 = vadd.f32 %v4457_v20, %v4456_v19  ;;  %v4459_v25 = vpop.f32.mrb[74].mxu1 }
 0x447   : > { %v4460_v27 = vpop.f32.mrb[75].mxu1 }
 0x448   : > { %v2202_v28 = vadd.f32 %v4458_v24, %v5678_v5  ;;  %v4461_v29 = vadd.f32 %v4460_v27, %v4459_v25  ;;  %4310 = vmatmul.mubr.msk.bf16.gmra.mrb[156].mxu0 %vm680_vm2, %v2324_v22 }
 0x449   : > { %2503 = vmatprep.mubr.bf16.mxu0 %v5135_v0 }
 0x44a   : > { %v2205_v31 = vadd.f32 %v4461_v29, %v5678_v5  ;;  %v2298_v33 = vmax.f32 %v2202_v28, 0.0 }
 0x44c   : > { %v2299_v34 = vmax.f32 %v2205_v31, 0.0  ;;  %v4462_v35 = vpop.f32.mrb[76].mxu1 }
 0x44d   : > { %v4463_v36 = vpop.f32.mrb[77].mxu1 }
 0x44e   : > { %v2325_v38 = vpack.c.bf16 %v2299_v34, %v2298_v33  ;;  %v4464_v39 = vadd.f32 %v4463_v36, %v4462_v35  ;;  %v4465_v40 = vpop.f32.mrb[78].mxu1 }
 0x44f   : > { %v4466_v42 = vpop.f32.mrb[79].mxu1 }
 0x450   : > { %v2210_v43 = vadd.f32 %v4464_v39, %v5678_v5  ;;  %v4467_v44 = vadd.f32 %v4466_v42, %v4465_v40  ;;  %4311 = vmatmul.mubr.msk.bf16.gmra.mrb[160].mxu0 %vm680_vm2, %v2325_v38 }
 0x451   : > { %2513 = vmatprep.mubr.bf16.mxu0 %v5135_v0 }
 0x452   : > { %v2213_v47 = vadd.f32 %v4467_v44, %v5678_v5  ;;  %v2300_v50 = vmax.f32 %v2210_v43, 0.0 }
 0x454   : > { %v2301_v53 = vmax.f32 %v2213_v47, 0.0  ;;  %v4468_v54 = vpop.f32.mrb[80].mxu1 }
 0x455   : > { %v4469_v55 = vpop.f32.mrb[81].mxu1 }
 0x456   : > { %v2326_v57 = vpack.c.bf16 %v2301_v53, %v2300_v50  ;;  %v4470_v58 = vadd.f32 %v4469_v55, %v4468_v54  ;;  %v4471_v59 = vpop.f32.mrb[82].mxu1 }
 0x457   : > { %v4472_v60 = vpop.f32.mrb[83].mxu1 }
 0x458   : > { %v2218_v61 = vadd.f32 %v4470_v58, %v5678_v5  ;;  %v4473_v62 = vadd.f32 %v4472_v60, %v4471_v59  ;;  %4312 = vmatmul.mubr.msk.bf16.gmra.mrb[164].mxu0 %vm680_vm2, %v2326_v57  ;;  %v4907_v58 = vld [vmem:[#allocation2 + $0x2f4] ss:$8 sps:$4 sm:$0xff]   ;;  %v4905_v59 = vld [vmem:[#allocation2 + $0x2f0] ss:$8 sps:$4 sm:$0xff]  }
 0x459   : > { %2523 = vmatprep.mubr.bf16.mxu0 %v5135_v0  ;;  %2946 = vmatprep.subr.bf16.mxu1 %v4907_v58 }
 0x45a   : > { %v2221_v63 = vadd.f32 %v4473_v62, %v5678_v5  ;;  %v2302_v1 = vmax.f32 %v2218_v61, 0.0  ;;  %2947 = vmatpush1.bf16.msra.mxu1 %v4905_v59 }
 0x45c   : > { %v2303_v2 = vmax.f32 %v2221_v63, 0.0  ;;  %v4474_v3 = vpop.f32.mrb[84].mxu1 }
 0x45d   : > { %v4475_v4 = vpop.f32.mrb[85].mxu1 }
 0x45e   : > { %v2327_v51 = vpack.c.bf16 %v2303_v2, %v2302_v1  ;;  %v4476_v52 = vadd.f32 %v4475_v4, %v4474_v3  ;;  %v4477_v6 = vpop.f32.mrb[86].mxu1 }
 0x45f   : > { %v4478_v10 = vpop.f32.mrb[87].mxu1 }
 0x460   : > { %v2226_v9 = vadd.f32 %v4476_v52, %v5678_v5  ;;  %v4479_v11 = vadd.f32 %v4478_v10, %v4477_v6  ;;  %4313 = vmatmul.mubr.msk.bf16.gmra.mrb[168].mxu0 %vm680_vm2, %v2327_v51 }
 0x461   : > { %2533 = vmatprep.mubr.bf16.mxu0 %v5135_v0 }
 0x462   : > { %v2229_v8 = vadd.f32 %v4479_v11, %v5678_v5  ;;  %v2304_v7 = vmax.f32 %v2226_v9, 0.0 }
 0x464   : > { %v2305_v12 = vmax.f32 %v2229_v8, 0.0  ;;  %v4480_v13 = vpop.f32.mrb[88].mxu1 }
 0x465   : > { %v4481_v14 = vpop.f32.mrb[89].mxu1 }
 0x466   : > { %v2328_v15 = vpack.c.bf16 %v2305_v12, %v2304_v7  ;;  %v4482_v16 = vadd.f32 %v4481_v14, %v4480_v13  ;;  %v4483_v23 = vpop.f32.mrb[90].mxu1 }
 0x467   : > { %v4484_v17 = vpop.f32.mrb[91].mxu1 }
 0x468   : > { %v2234_v18 = vadd.f32 %v4482_v16, %v5678_v5  ;;  %v4485_v19 = vadd.f32 %v4484_v17, %v4483_v23  ;;  %4314 = vmatmul.mubr.msk.bf16.gmra.mrb[172].mxu0 %vm680_vm2, %v2328_v15 }
 0x469   : > { %2543 = vmatprep.mubr.bf16.mxu0 %v5135_v0 }
 0x46a   : > { %v2237_v20 = vadd.f32 %v4485_v19, %v5678_v5  ;;  %v2306_v21 = vmax.f32 %v2234_v18, 0.0 }
 0x46c   : > { %v2307_v22 = vmax.f32 %v2237_v20, 0.0  ;;  %v4486_v24 = vpop.f32.mrb[92].mxu1 }
 0x46d   : > { %v4487_v25 = vpop.f32.mrb[93].mxu1 }
 0x46e   : > { %v2329_v26 = vpack.c.bf16 %v2307_v22, %v2306_v21  ;;  %v4488_v27 = vadd.f32 %v4487_v25, %v4486_v24  ;;  %v4489_v28 = vpop.f32.mrb[94].mxu1 }
 0x46f   : > { %v4490_v29 = vpop.f32.mrb[95].mxu1 }
 0x470   : > { %v2242_v30 = vadd.f32 %v4488_v27, %v5678_v5  ;;  %v4491_v31 = vadd.f32 %v4490_v29, %v4489_v28  ;;  %4315 = vmatmul.mubr.msk.bf16.gmra.mrb[176].mxu0 %vm680_vm2, %v2329_v26 }
 0x471   : > { %2553 = vmatprep.mubr.bf16.mxu0 %v5135_v0 }
 0x472   : > { %v2245_v32 = vadd.f32 %v4491_v31, %v5678_v5  ;;  %v2308_v33 = vmax.f32 %v2242_v30, 0.0 }
 0x474   : > { %v2309_v34 = vmax.f32 %v2245_v32, 0.0  ;;  %v4492_v35 = vpop.f32.mrb[96].mxu1 }
 0x475   : > { %v4493_v36 = vpop.f32.mrb[97].mxu1 }
 0x476   : > { %v2330_v37 = vpack.c.bf16 %v2309_v34, %v2308_v33  ;;  %v4494_v38 = vadd.f32 %v4493_v36, %v4492_v35  ;;  %v4495_v39 = vpop.f32.mrb[98].mxu1  ;;  %v4908_v33 = vld [vmem:[#allocation2 + $0x300] ss:$8 sps:$4 sm:$0xff]   ;;  %v4910_v34 = vld [vmem:[#allocation2 + $0x304] ss:$8 sps:$4 sm:$0xff]  }
 0x477   : > { %v4496_v40 = vpop.f32.mrb[99].mxu1  ;;  %3411 = vmatprep.subr.bf16.mxu0 %v4910_v34  ;;  %v4911_v35 = vld [vmem:[#allocation2 + $0x310] ss:$8 sps:$4 sm:$0xff]   ;;  %v4913_v36 = vld [vmem:[#allocation2 + $0x314] ss:$8 sps:$4 sm:$0xff]  }
 0x478   : > { %v2250_v41 = vadd.f32 %v4494_v38, %v5678_v5  ;;  %v4497_v42 = vadd.f32 %v4496_v40, %v4495_v39  ;;  %4316 = vmatmul.mubr.msk.bf16.gmra.mrb[180].mxu0 %vm680_vm2, %v2330_v37  ;;  %v4300_v37 = vld [vmem:[%s6143_s7 + $0x4] ss:$8 sm:$0x3]  ;;  %v4935_v34 = vld [vmem:[#allocation2 + $0x390] ss:$8 sps:$4 sm:$0xff]  }
 0x479   : > { %2563 = vmatprep.mubr.bf16.mxu0 %v5135_v0  ;;  %3412 = vmatpush1.bf16.msra.mxu0 %v4908_v33  ;;  %v4916_v38 = vld [vmem:[#allocation2 + $0x324] ss:$8 sps:$4 sm:$0xff]   ;;  %v5750_v39 = vrot.slane %v4300_v37, %v5391_v48 }
 0x47a   : > { %v2253_v43 = vadd.f32 %v4497_v42, %v5678_v5  ;;  %v2310_v44 = vmax.f32 %v2250_v41, 0.0  ;;  %3413 = vmatprep.subr.bf16.mxu0 %v4913_v36  ;;  %v4917_v41 = vld [vmem:[#allocation2 + $0x330] ss:$8 sps:$4 sm:$0xff]   ;;  %v4919_v42 = vld [vmem:[#allocation2 + $0x334] ss:$8 sps:$4 sm:$0xff]  }
 0x47c   : > { %v2311_v45 = vmax.f32 %v2253_v43, 0.0  ;;  %v4498_v47 = vpop.f32.mrb[100].mxu1 }
 0x47d   : > { %v4499_v49 = vpop.f32.mrb[101].mxu1  ;;  %3414 = vmatpush1.bf16.msra.mxu0 %v4911_v35 }
 0x47e   : > { %v2331_v50 = vpack.c.bf16 %v2311_v45, %v2310_v44  ;;  %v4500_v53 = vadd.f32 %v4499_v49, %v4498_v47  ;;  %v4501_v54 = vpop.f32.mrb[102].mxu1  ;;  %3415 = vmatprep.subr.bf16.mxu0 %v4916_v38 }
 0x47f   : > { %v4502_v55 = vpop.f32.mrb[103].mxu1 }
 0x480   : > { %v2258_v56 = vadd.f32 %v4500_v53, %v5678_v5  ;;  %v4503_v57 = vadd.f32 %v4502_v55, %v4501_v54  ;;  %4317 = vmatmul.mubr.msk.bf16.gmra.mrb[184].mxu0 %vm680_vm2, %v2331_v50  ;;  %v4920_v53 = vld [vmem:[#allocation2 + $0x340] ss:$8 sps:$4 sm:$0xff]   ;;  %v4922_v54 = vld [vmem:[#allocation2 + $0x344] ss:$8 sps:$4 sm:$0xff]  }
 0x481   : > { %2573 = vmatprep.mubr.bf16.mxu0 %v5135_v0 }
 0x482   : > { %v2261_v60 = vadd.f32 %v4503_v57, %v5678_v5  ;;  %v2312_v61 = vmax.f32 %v2258_v56, 0.0  ;;  %v4925_v56 = vld [vmem:[#allocation2 + $0x354] ss:$8 sps:$4 sm:$0xff]  }
 0x484   : > { %v2313_v62 = vmax.f32 %v2261_v60, 0.0  ;;  %v4504_v63 = vpop.f32.mrb[104].mxu1 }
 0x485   : > { %v4505_v1 = vpop.f32.mrb[105].mxu1 }
 0x486   : > { %v2332_v2 = vpack.c.bf16 %v2313_v62, %v2312_v61  ;;  %v4506_v3 = vadd.f32 %v4505_v1, %v4504_v63  ;;  %v4507_v4 = vpop.f32.mrb[106].mxu1  ;;  %v4923_v62 = vld [vmem:[#allocation2 + $0x350] ss:$8 sps:$4 sm:$0xff]  }
 0x487   : > { %v4508_v51 = vpop.f32.mrb[107].mxu1 }
 0x488   : > { %v2266_v52 = vadd.f32 %v4506_v3, %v5678_v5  ;;  %v4509_v6 = vadd.f32 %v4508_v51, %v4507_v4  ;;  %4318 = vmatmul.mubr.msk.bf16.gmra.mrb[188].mxu0 %vm680_vm2, %v2332_v2  ;;  %v4928_v2 = vld [vmem:[#allocation2 + $0x364] ss:$8 sps:$4 sm:$0xff]  }
 0x489   : > { %2583 = vmatprep.mubr.bf16.mxu0 %v5135_v0 }
 0x48a   : > { %v2269_v10 = vadd.f32 %v4509_v6, %v5678_v5  ;;  %v2314_v9 = vmax.f32 %v2266_v52, 0.0 }
 0x48c   : > { %v2315_v11 = vmax.f32 %v2269_v10, 0.0  ;;  %v4510_v8 = vpop.f32.mrb[108].mxu1 }
 0x48d   : > { %v4511_v7 = vpop.f32.mrb[109].mxu1 }
 0x48e   : > { %v2333_v12 = vpack.c.bf16 %v2315_v11, %v2314_v9  ;;  %v4512_v13 = vadd.f32 %v4511_v7, %v4510_v8  ;;  %v4513_v14 = vpop.f32.mrb[110].mxu1  ;;  %v4926_v9 = vld [vmem:[#allocation2 + $0x360] ss:$8 sps:$4 sm:$0xff]   ;;  %v4931_v8 = vld [vmem:[#allocation2 + $0x374] ss:$8 sps:$4 sm:$0xff]  }
 0x48f   : > { %v4514_v15 = vpop.f32.mrb[111].mxu1 }
 0x490   : > { %v2274_v16 = vadd.f32 %v4512_v13, %v5678_v5  ;;  %v4515_v23 = vadd.f32 %v4514_v15, %v4513_v14  ;;  %4319 = vmatmul.mubr.msk.bf16.gmra.mrb[192].mxu0 %vm680_vm2, %v2333_v12 }
 0x491   : > { %2593 = vmatprep.mubr.bf16.mxu0 %v5135_v0 }
 0x492   : > { %v2277_v17 = vadd.f32 %v4515_v23, %v5678_v5  ;;  %v2316_v18 = vmax.f32 %v2274_v16, 0.0  ;;  %v4929_v16 = vld [vmem:[#allocation2 + $0x370] ss:$8 sps:$4 sm:$0xff]  }
 0x494   : > { %v2317_v19 = vmax.f32 %v2277_v17, 0.0  ;;  %v4516_v20 = vpop.f32.mrb[112].mxu1 }
 0x495   : > { %v4517_v21 = vpop.f32.mrb[113].mxu1 }
 0x496   : > { %v2334_v22 = vpack.c.bf16 %v2317_v19, %v2316_v18  ;;  %v4518_v24 = vadd.f32 %v4517_v21, %v4516_v20  ;;  %v4519_v25 = vpop.f32.mrb[114].mxu1  ;;  %v4934_v18 = vld [vmem:[#allocation2 + $0x384] ss:$8 sps:$4 sm:$0xff]  }
 0x497   : > { %v4520_v26 = vpop.f32.mrb[115].mxu1 }
 0x498   : > { %v2282_v27 = vadd.f32 %v4518_v24, %v5678_v5  ;;  %v4521_v28 = vadd.f32 %v4520_v26, %v4519_v25  ;;  %4320 = vmatmul.mubr.msk.bf16.gmra.mrb[196].mxu0 %vm680_vm2, %v2334_v22  ;;  %v4932_v26 = vld [vmem:[#allocation2 + $0x380] ss:$8 sps:$4 sm:$0xff]  }
 0x499   : > { %2603 = vmatprep.mubr.bf16.mxu0 %v5135_v0  ;;  %v4914_v0 = vld [vmem:[#allocation2 + $0x320] ss:$8 sps:$4 sm:$0xff]  }
 0x49a   : > { %v2285_v29 = vadd.f32 %v4521_v28, %v5678_v5  ;;  %v2318_v30 = vmax.f32 %v2282_v27, 0.0  ;;  %v5747_v5 = vrot.slane %v4300_v37, %v5386_v46  ;;  %3416 = vmatpush1.bf16.msra.mxu0 %v4914_v0  ;;  %v4937_v28 = vld [vmem:[#allocation2 + $0x394] ss:$8 sps:$4 sm:$0xff]   ;;  %v4940_v37 = vld [vmem:[#allocation2 + $0x3a4] ss:$8 sps:$4 sm:$0xff]  }
 0x49b   : > { %3417 = vmatprep.subr.bf16.mxu0 %v4919_v42 }
 0x49c   : > { %v2319_v31 = vmax.f32 %v2285_v29, 0.0 }
 0x49e   : > { %v2335_v32 = vpack.c.bf16 %v2319_v31, %v2318_v30  ;;  %3418 = vmatpush1.bf16.msra.mxu0 %v4917_v41 }
 0x49f   : > { %3419 = vmatprep.subr.bf16.mxu0 %v4922_v54 }
 0x4a0   : > { %4321 = vmatmul.mubr.msk.bf16.gmra.mrb[200].mxu0 %vm680_vm2, %v2335_v32 }
 0x4a2   : > { %3420 = vmatpush1.bf16.msra.mxu0 %v4920_v53 }
 0x4a3   : > { %3421 = vmatprep.subr.bf16.mxu0 %v4925_v56  ;;  %v4941_v56 = vld [vmem:[#allocation2 + $0x3b0] ss:$8 sps:$4 sm:$0xff]  }
 0x4a6   : > { %3422 = vmatpush1.bf16.msra.mxu0 %v4923_v62 }
 0x4a7   : > { %3423 = vmatprep.subr.bf16.mxu0 %v4928_v2 }
 0x4aa   : > { %3424 = vmatpush1.bf16.msra.mxu0 %v4926_v9 }
 0x4ab   : > { %3425 = vmatprep.subr.bf16.mxu0 %v4931_v8  ;;  %v4947_v8 = vld [vmem:[#allocation2 + $0x3d0] ss:$8 sps:$4 sm:$0xff]  }
 0x4ae   : > { %3426 = vmatpush1.bf16.msra.mxu0 %v4929_v16 }
 0x4af   : > { %3427 = vmatprep.subr.bf16.mxu0 %v4934_v18 }
 0x4b2   : > { %3428 = vmatpush1.bf16.msra.mxu0 %v4932_v26 }
 0x4b3   : > { %3429 = vmatprep.subr.bf16.mxu0 %v4937_v28 }
 0x4b6   : > { %3430 = vmatpush1.bf16.msra.mxu0 %v4935_v34 }
 0x4b7   : > { %3431 = vmatprep.subr.bf16.mxu0 %v4940_v37 }
 0x4fb   : > { %v2455_v40 = vpop.f32.mrb[140].mxu0 }
 0x4fc   : > { %v2456_v43 = vadd.f32 %v2455_v40, %v5747_v5  ;;  %v2457_v44 = vpop.f32.mrb[141].mxu0 }
 0x4fd   : > { %v2458_v45 = vadd.f32 %v2457_v44, %v5750_v39  ;;  %v2459_v47 = vpop.f32.mrb[142].mxu0  ;;  %v4938_v44 = vld [vmem:[#allocation2 + $0x3a0] ss:$8 sps:$4 sm:$0xff]  }
 0x4fe   : > { %v2460_v49 = vadd.f32 %v2459_v47, %v5747_v5  ;;  %v2461_v50 = vpop.f32.mrb[143].mxu0  ;;  %v2614_v57 = vmax.f32 %v2456_v43, 0.0  ;;  %v4943_v47 = vld [vmem:[#allocation2 + $0x3b4] ss:$8 sps:$4 sm:$0xff]   ;;  %3432 = vmatpush1.bf16.msra.mxu0 %v4938_v44 }
 0x4ff   : > { %v2462_v55 = vadd.f32 %v2461_v50, %v5750_v39  ;;  %v2615_v59 = vmax.f32 %v2458_v45, 0.0  ;;  %3433 = vmatprep.subr.bf16.mxu0 %v4943_v47 }
 0x500   : > { %v2616_v58 = vmax.f32 %v2460_v49, 0.0 }
 0x501   : > { %v2617_v60 = vmax.f32 %v2462_v55, 0.0 }
 0x502   : > { %v2678_v61 = vpack.c.bf16 %v2616_v58, %v2614_v57  ;;  %3434 = vmatpush1.bf16.msra.mxu0 %v4941_v56 }
 0x503   : > { %v2679_v63 = vpack.c.bf16 %v2617_v60, %v2615_v59  ;;  %v2465_v1 = vpop.f32.mrb[144].mxu0  ;;  %v4946_v59 = vld [vmem:[#allocation2 + $0x3c4] ss:$8 sps:$4 sm:$0xff]  }
 0x504   : > { %v2466_v3 = vadd.f32 %v2465_v1, %v5747_v5  ;;  %v2467_v4 = vpop.f32.mrb[145].mxu0  ;;  %3435 = vmatprep.subr.bf16.mxu0 %v4946_v59 }
 0x505   : > { %v2468_v51 = vadd.f32 %v2467_v4, %v5750_v39  ;;  %v2469_v52 = vpop.f32.mrb[146].mxu0  ;;  %2948 = vmatprep.mubr.bf16.mxu1 %v2679_v63 }
 0x506   : > { %v2470_v6 = vadd.f32 %v2469_v52, %v5747_v5  ;;  %v2471_v10 = vpop.f32.mrb[147].mxu0  ;;  %2949 = vmatmul.mubr.bf16.vlgmr.msra.gmra.mrb[116].mxu1 %v2678_v61  ;;  %v2618_v7 = vmax.f32 %v2466_v3, 0.0  ;;  %v4944_v3 = vld [vmem:[#allocation2 + $0x3c0] ss:$8 sps:$4 sm:$0xff]  }
 0x507   : > { %v2472_v11 = vadd.f32 %v2471_v10, %v5750_v39  ;;  %v2619_v13 = vmax.f32 %v2468_v51, 0.0  ;;  %v4949_v51 = vld [vmem:[#allocation2 + $0x3d4] ss:$8 sps:$4 sm:$0xff]   ;;  %3436 = vmatpush1.bf16.msra.mxu0 %v4944_v3 }
 0x508   : > { %v2620_v12 = vmax.f32 %v2470_v6, 0.0  ;;  %3437 = vmatprep.subr.bf16.mxu0 %v4949_v51 }
 0x509   : > { %v2621_v14 = vmax.f32 %v2472_v11, 0.0 }
 0x50a   : > { %v2680_v15 = vpack.c.bf16 %v2620_v12, %v2618_v7 }
 0x50b   : > { %v2681_v23 = vpack.c.bf16 %v2621_v14, %v2619_v13  ;;  %v2475_v17 = vpop.f32.mrb[148].mxu0  ;;  %v4952_v13 = vld [vmem:[#allocation2 + $0x3e4] ss:$8 sps:$4 sm:$0xff]   ;;  %3438 = vmatpush1.bf16.msra.mxu0 %v4947_v8 }
 0x50c   : > { %v2476_v19 = vadd.f32 %v2475_v17, %v5747_v5  ;;  %v2477_v20 = vpop.f32.mrb[149].mxu0  ;;  %3439 = vmatprep.subr.bf16.mxu0 %v4952_v13 }
 0x50d   : > { %v2478_v21 = vadd.f32 %v2477_v20, %v5750_v39  ;;  %v2479_v22 = vpop.f32.mrb[150].mxu0  ;;  %2958 = vmatprep.mubr.bf16.mxu1 %v2681_v23 }
 0x50e   : > { %v2480_v24 = vadd.f32 %v2479_v22, %v5747_v5  ;;  %v2481_v25 = vpop.f32.mrb[151].mxu0  ;;  %2959 = vmatmul.mubr.bf16.gmra.mrb[120].mxu1 %v2680_v15  ;;  %v2622_v29 = vmax.f32 %v2476_v19, 0.0  ;;  %v4950_v19 = vld [vmem:[#allocation2 + $0x3e0] ss:$8 sps:$4 sm:$0xff]  }
 0x50f   : > { %v2482_v27 = vadd.f32 %v2481_v25, %v5750_v39  ;;  %v2623_v31 = vmax.f32 %v2478_v21, 0.0  ;;  %3440 = vmatpush1.bf16.msra.mxu0 %v4950_v19 }
 0x510   : > { %v2624_v30 = vmax.f32 %v2480_v24, 0.0 }
 0x511   : > { %v2625_v32 = vmax.f32 %v2482_v27, 0.0 }
 0x512   : > { %v2682_v33 = vpack.c.bf16 %v2624_v30, %v2622_v29 }
 0x513   : > { %v2683_v35 = vpack.c.bf16 %v2625_v32, %v2623_v31  ;;  %v2485_v36 = vpop.f32.mrb[152].mxu0 }
 0x514   : > { %v2486_v0 = vadd.f32 %v2485_v36, %v5747_v5  ;;  %v2487_v38 = vpop.f32.mrb[153].mxu0 }
 0x515   : > { %v2488_v40 = vadd.f32 %v2487_v38, %v5750_v39  ;;  %v2489_v41 = vpop.f32.mrb[154].mxu0  ;;  %2968 = vmatprep.mubr.bf16.mxu1 %v2683_v35 }
 0x516   : > { %v2490_v42 = vadd.f32 %v2489_v41, %v5747_v5  ;;  %v2491_v43 = vpop.f32.mrb[155].mxu0  ;;  %2969 = vmatmul.mubr.bf16.gmra.mrb[124].mxu1 %v2682_v33  ;;  %v2626_v49 = vmax.f32 %v2486_v0, 0.0 }
 0x517   : > { %v2492_v45 = vadd.f32 %v2491_v43, %v5750_v39  ;;  %v2627_v53 = vmax.f32 %v2488_v40, 0.0 }
 0x518   : > { %v2628_v50 = vmax.f32 %v2490_v42, 0.0 }
 0x519   : > { %v2629_v54 = vmax.f32 %v2492_v45, 0.0 }
 0x51a   : > { %v2684_v55 = vpack.c.bf16 %v2628_v50, %v2626_v49 }
 0x51b   : > { %v2685_v57 = vpack.c.bf16 %v2629_v54, %v2627_v53  ;;  %v2495_v58 = vpop.f32.mrb[156].mxu0 }
 0x51c   : > { %v2496_v60 = vadd.f32 %v2495_v58, %v5747_v5  ;;  %v2497_v61 = vpop.f32.mrb[157].mxu0 }
 0x51d   : > { %v2498_v62 = vadd.f32 %v2497_v61, %v5750_v39  ;;  %v2499_v63 = vpop.f32.mrb[158].mxu0  ;;  %2978 = vmatprep.mubr.bf16.mxu1 %v2685_v57 }
 0x51e   : > { %v2500_v1 = vadd.f32 %v2499_v63, %v5747_v5  ;;  %v2501_v2 = vpop.f32.mrb[159].mxu0  ;;  %2979 = vmatmul.mubr.bf16.gmra.mrb[128].mxu1 %v2684_v55  ;;  %v2630_v52 = vmax.f32 %v2496_v60, 0.0 }
 0x51f   : > { %v2502_v4 = vadd.f32 %v2501_v2, %v5750_v39  ;;  %v2631_v10 = vmax.f32 %v2498_v62, 0.0 }
 0x520   : > { %v2632_v6 = vmax.f32 %v2500_v1, 0.0 }
 0x521   : > { %v2633_v9 = vmax.f32 %v2502_v4, 0.0 }
 0x522   : > { %v2686_v11 = vpack.c.bf16 %v2632_v6, %v2630_v52 }
 0x523   : > { %v2687_v7 = vpack.c.bf16 %v2633_v9, %v2631_v10  ;;  %v2505_v12 = vpop.f32.mrb[160].mxu0 }
 0x524   : > { %v2506_v14 = vadd.f32 %v2505_v12, %v5747_v5  ;;  %v2507_v15 = vpop.f32.mrb[161].mxu0 }
 0x525   : > { %v2508_v16 = vadd.f32 %v2507_v15, %v5750_v39  ;;  %v2509_v23 = vpop.f32.mrb[162].mxu0  ;;  %2988 = vmatprep.mubr.bf16.mxu1 %v2687_v7 }
 0x526   : > { %v2510_v17 = vadd.f32 %v2509_v23, %v5747_v5  ;;  %v2511_v18 = vpop.f32.mrb[163].mxu0  ;;  %2989 = vmatmul.mubr.bf16.gmra.mrb[132].mxu1 %v2686_v11  ;;  %v2634_v21 = vmax.f32 %v2506_v14, 0.0 }
 0x527   : > { %v2512_v20 = vadd.f32 %v2511_v18, %v5750_v39  ;;  %v2635_v24 = vmax.f32 %v2508_v16, 0.0 }
 0x528   : > { %v2636_v22 = vmax.f32 %v2510_v17, 0.0 }
 0x529   : > { %v2637_v25 = vmax.f32 %v2512_v20, 0.0 }
 0x52a   : > { %v2688_v26 = vpack.c.bf16 %v2636_v22, %v2634_v21 }
 0x52b   : > { %v2689_v27 = vpack.c.bf16 %v2637_v25, %v2635_v24  ;;  %v2515_v28 = vpop.f32.mrb[164].mxu0 }
 0x52c   : > { %v2516_v29 = vadd.f32 %v2515_v28, %v5747_v5  ;;  %v2517_v30 = vpop.f32.mrb[165].mxu0 }
 0x52d   : > { %v2518_v31 = vadd.f32 %v2517_v30, %v5750_v39  ;;  %v2519_v32 = vpop.f32.mrb[166].mxu0  ;;  %2998 = vmatprep.mubr.bf16.mxu1 %v2689_v27 }
 0x52e   : > { %v2520_v33 = vadd.f32 %v2519_v32, %v5747_v5  ;;  %v2521_v34 = vpop.f32.mrb[167].mxu0  ;;  %2999 = vmatmul.mubr.bf16.gmra.mrb[136].mxu1 %v2688_v26  ;;  %v2638_v36 = vmax.f32 %v2516_v29, 0.0 }
 0x52f   : > { %v2522_v35 = vadd.f32 %v2521_v34, %v5750_v39  ;;  %v2639_v0 = vmax.f32 %v2518_v31, 0.0 }
 0x530   : > { %v2640_v37 = vmax.f32 %v2520_v33, 0.0 }
 0x531   : > { %v2641_v38 = vmax.f32 %v2522_v35, 0.0 }
 0x532   : > { %v2690_v40 = vpack.c.bf16 %v2640_v37, %v2638_v36 }
 0x533   : > { %v2691_v41 = vpack.c.bf16 %v2641_v38, %v2639_v0  ;;  %v2525_v42 = vpop.f32.mrb[168].mxu0 }
 0x534   : > { %v2526_v43 = vadd.f32 %v2525_v42, %v5747_v5  ;;  %v2527_v44 = vpop.f32.mrb[169].mxu0 }
 0x535   : > { %v2528_v45 = vadd.f32 %v2527_v44, %v5750_v39  ;;  %v2529_v47 = vpop.f32.mrb[170].mxu0  ;;  %3008 = vmatprep.mubr.bf16.mxu1 %v2691_v41 }
 0x536   : > { %v2530_v49 = vadd.f32 %v2529_v47, %v5747_v5  ;;  %v2531_v50 = vpop.f32.mrb[171].mxu0  ;;  %3009 = vmatmul.mubr.bf16.gmra.mrb[140].mxu1 %v2690_v40  ;;  %v2642_v54 = vmax.f32 %v2526_v43, 0.0 }
 0x537   : > { %v2532_v53 = vadd.f32 %v2531_v50, %v5750_v39  ;;  %v2643_v56 = vmax.f32 %v2528_v45, 0.0 }
 0x538   : > { %v2644_v55 = vmax.f32 %v2530_v49, 0.0 }
 0x539   : > { %v2645_v57 = vmax.f32 %v2532_v53, 0.0 }
 0x53a   : > { %v2692_v58 = vpack.c.bf16 %v2644_v55, %v2642_v54 }
 0x53b   : > { %v2693_v59 = vpack.c.bf16 %v2645_v57, %v2643_v56  ;;  %v2535_v60 = vpop.f32.mrb[172].mxu0 }
 0x53c   : > { %v2536_v61 = vadd.f32 %v2535_v60, %v5747_v5  ;;  %v2537_v62 = vpop.f32.mrb[173].mxu0 }
 0x53d   : > { %v2538_v63 = vadd.f32 %v2537_v62, %v5750_v39  ;;  %v2539_v1 = vpop.f32.mrb[174].mxu0  ;;  %3018 = vmatprep.mubr.bf16.mxu1 %v2693_v59 }
 0x53e   : > { %v2540_v2 = vadd.f32 %v2539_v1, %v5747_v5  ;;  %v2541_v3 = vpop.f32.mrb[175].mxu0  ;;  %3019 = vmatmul.mubr.bf16.gmra.mrb[144].mxu1 %v2692_v58  ;;  %v2646_v51 = vmax.f32 %v2536_v61, 0.0 }
 0x53f   : > { %v2542_v4 = vadd.f32 %v2541_v3, %v5750_v39  ;;  %v2647_v6 = vmax.f32 %v2538_v63, 0.0  ;;  %v4955_v63 = vld [vmem:[#allocation2 + $0x3f4] ss:$8 sps:$4 sm:$0xff]  }
 0x540   : > { %v2648_v52 = vmax.f32 %v2540_v2, 0.0  ;;  %v4953_v2 = vld [vmem:[#allocation2 + $0x3f0] ss:$8 sps:$4 sm:$0xff]   ;;  %3441 = vmatprep.subr.bf16.mxu0 %v4955_v63 }
 0x541   : > { %v2649_v10 = vmax.f32 %v2542_v4, 0.0  ;;  %3442 = vmatpush1.bf16.msra.mxu0 %v4953_v2 }
 0x542   : > { %v2694_v9 = vpack.c.bf16 %v2648_v52, %v2646_v51 }
 0x543   : > { %v2695_v11 = vpack.c.bf16 %v2649_v10, %v2647_v6  ;;  %v2545_v8 = vpop.f32.mrb[176].mxu0 }
 0x544   : > { %v2546_v7 = vadd.f32 %v2545_v8, %v5747_v5  ;;  %v2547_v12 = vpop.f32.mrb[177].mxu0 }
 0x545   : > { %v2548_v13 = vadd.f32 %v2547_v12, %v5750_v39  ;;  %v2549_v14 = vpop.f32.mrb[178].mxu0  ;;  %3028 = vmatprep.mubr.bf16.mxu1 %v2695_v11 }
 0x546   : > { %v2550_v15 = vadd.f32 %v2549_v14, %v5747_v5  ;;  %v2551_v16 = vpop.f32.mrb[179].mxu0  ;;  %3029 = vmatmul.mubr.bf16.gmra.mrb[148].mxu1 %v2694_v9  ;;  %v2650_v17 = vmax.f32 %v2546_v7, 0.0 }
 0x547   : > { %v2552_v23 = vadd.f32 %v2551_v16, %v5750_v39  ;;  %v2651_v19 = vmax.f32 %v2548_v13, 0.0 }
 0x548   : > { %v2652_v18 = vmax.f32 %v2550_v15, 0.0 }
 0x549   : > { %v2653_v20 = vmax.f32 %v2552_v23, 0.0 }
 0x54a   : > { %v2696_v21 = vpack.c.bf16 %v2652_v18, %v2650_v17 }
 0x54b   : > { %v2697_v22 = vpack.c.bf16 %v2653_v20, %v2651_v19  ;;  %v2555_v24 = vpop.f32.mrb[180].mxu0 }
 0x54c   : > { %v2556_v25 = vadd.f32 %v2555_v24, %v5747_v5  ;;  %v2557_v26 = vpop.f32.mrb[181].mxu0 }
 0x54d   : > { %v2558_v27 = vadd.f32 %v2557_v26, %v5750_v39  ;;  %v2559_v28 = vpop.f32.mrb[182].mxu0  ;;  %3038 = vmatprep.mubr.bf16.mxu1 %v2697_v22 }
 0x54e   : > { %v2560_v29 = vadd.f32 %v2559_v28, %v5747_v5  ;;  %v2561_v30 = vpop.f32.mrb[183].mxu0  ;;  %3039 = vmatmul.mubr.bf16.gmra.mrb[152].mxu1 %v2696_v21  ;;  %v2654_v32 = vmax.f32 %v2556_v25, 0.0 }
 0x54f   : > { %v2562_v31 = vadd.f32 %v2561_v30, %v5750_v39  ;;  %v2655_v34 = vmax.f32 %v2558_v27, 0.0 }
 0x550   : > { %v2656_v33 = vmax.f32 %v2560_v29, 0.0 }
 0x551   : > { %v2657_v35 = vmax.f32 %v2562_v31, 0.0 }
 0x552   : > { %v2698_v36 = vpack.c.bf16 %v2656_v33, %v2654_v32 }
 0x553   : > { %v2699_v37 = vpack.c.bf16 %v2657_v35, %v2655_v34  ;;  %v2565_v0 = vpop.f32.mrb[184].mxu0 }
 0x554   : > { %v2566_v38 = vadd.f32 %v2565_v0, %v5747_v5  ;;  %v2567_v40 = vpop.f32.mrb[185].mxu0 }
 0x555   : > { %v2568_v41 = vadd.f32 %v2567_v40, %v5750_v39  ;;  %v2569_v42 = vpop.f32.mrb[186].mxu0  ;;  %3048 = vmatprep.mubr.bf16.mxu1 %v2699_v37 }
 0x556   : > { %v2570_v43 = vadd.f32 %v2569_v42, %v5747_v5  ;;  %v2571_v44 = vpop.f32.mrb[187].mxu0  ;;  %3049 = vmatmul.mubr.bf16.gmra.mrb[156].mxu1 %v2698_v36  ;;  %v2658_v47 = vmax.f32 %v2566_v38, 0.0 }
 0x557   : > { %v2572_v45 = vadd.f32 %v2571_v44, %v5750_v39  ;;  %v2659_v50 = vmax.f32 %v2568_v41, 0.0 }
 0x558   : > { %v2660_v49 = vmax.f32 %v2570_v43, 0.0 }
 0x559   : > { %v2661_v53 = vmax.f32 %v2572_v45, 0.0 }
 0x55a   : > { %v2700_v54 = vpack.c.bf16 %v2660_v49, %v2658_v47 }
 0x55b   : > { %v2701_v55 = vpack.c.bf16 %v2661_v53, %v2659_v50  ;;  %v2575_v56 = vpop.f32.mrb[188].mxu0 }
 0x55c   : > { %v2576_v57 = vadd.f32 %v2575_v56, %v5747_v5  ;;  %v2577_v58 = vpop.f32.mrb[189].mxu0  ;;  %v4959_v56 = vld [vmem:[%s6142_s6 + $0x8] sm:$0xff]  }
 0x55d   : > { %v2578_v59 = vadd.f32 %v2577_v58, %v5750_v39  ;;  %v2579_v60 = vpop.f32.mrb[190].mxu0  ;;  %3058 = vmatprep.mubr.bf16.mxu1 %v2701_v55  ;;  %v4958_v55 = vld [vmem:[%s6142_s6 + $0x48] sm:$0xff]  }
 0x55e   : > { %v2580_v61 = vadd.f32 %v2579_v60, %v5747_v5  ;;  %v2581_v62 = vpop.f32.mrb[191].mxu0  ;;  %3059 = vmatmul.mubr.bf16.gmra.mrb[160].mxu1 %v2700_v54  ;;  %v2662_v3 = vmax.f32 %v2576_v57, 0.0  ;;  %v4956_v54 = vld [vmem:[%s6142_s6 + $0x40] sm:$0xff]  }
 0x55f   : > { %v2582_v1 = vadd.f32 %v2581_v62, %v5750_v39  ;;  %v2663_v51 = vmax.f32 %v2578_v59, 0.0  ;;  %4522 = vmatprep.subr.bf16.mxu1 %v4956_v54 }
 0x560   : > { %v2664_v4 = vmax.f32 %v2580_v61, 0.0 }
 0x561   : > { %v2665_v52 = vmax.f32 %v2582_v1, 0.0 }
 0x562   : > { %v2702_v6 = vpack.c.bf16 %v2664_v4, %v2662_v3  ;;  %v4960_v3 = vld [vmem:[%s6142_s6 + $0x50] sm:$0xff]  }
 0x563   : > { %v2703_v10 = vpack.c.bf16 %v2665_v52, %v2663_v51  ;;  %v2585_v9 = vpop.f32.mrb[192].mxu0  ;;  %v4961_v4 = vld [vmem:[%s6142_s6 + $0x10] sm:$0xff]   ;;  %v4962_v51 = vld [vmem:[%s6142_s6 + $0x58] sm:$0xff]  }
 0x564   : > { %v2586_v11 = vadd.f32 %v2585_v9, %v5747_v5  ;;  %v2587_v8 = vpop.f32.mrb[193].mxu0 }
 0x565   : > { %v2588_v7 = vadd.f32 %v2587_v8, %v5750_v39  ;;  %v2589_v12 = vpop.f32.mrb[194].mxu0  ;;  %3068 = vmatprep.mubr.bf16.mxu1 %v2703_v10  ;;  %v4963_v8 = vld [vmem:[%s6142_s6 + $0x18] sm:$0xff]  }
 0x566   : > { %v2590_v13 = vadd.f32 %v2589_v12, %v5747_v5  ;;  %v2591_v14 = vpop.f32.mrb[195].mxu0  ;;  %3069 = vmatmul.mubr.bf16.gmra.mrb[164].mxu1 %v2702_v6  ;;  %v2666_v16 = vmax.f32 %v2586_v11, 0.0  ;;  %v4964_v12 = vld [vmem:[%s6142_s6 + $0x60] sm:$0xff]  }
 0x567   : > { %v2592_v15 = vadd.f32 %v2591_v14, %v5750_v39  ;;  %v2667_v17 = vmax.f32 %v2588_v7, 0.0 }
 0x568   : > { %v2668_v23 = vmax.f32 %v2590_v13, 0.0 }
 0x569   : > { %v2669_v18 = vmax.f32 %v2592_v15, 0.0 }
 0x56a   : > { %v2704_v19 = vpack.c.bf16 %v2668_v23, %v2666_v16 }
 0x56b   : > { %v2705_v20 = vpack.c.bf16 %v2669_v18, %v2667_v17  ;;  %v2595_v21 = vpop.f32.mrb[196].mxu0  ;;  %v4965_v18 = vld [vmem:[%s6142_s6 + $0x20] sm:$0xff]  }
 0x56c   : > { %v2596_v22 = vadd.f32 %v2595_v21, %v5747_v5  ;;  %v2597_v24 = vpop.f32.mrb[197].mxu0  ;;  %v4966_v21 = vld [vmem:[%s6142_s6 + $0x68] sm:$0xff]  }
 0x56d   : > { %v2598_v25 = vadd.f32 %v2597_v24, %v5750_v39  ;;  %v2599_v26 = vpop.f32.mrb[198].mxu0  ;;  %3078 = vmatprep.mubr.bf16.mxu1 %v2705_v20 }
 0x56e   : > { %v2600_v27 = vadd.f32 %v2599_v26, %v5747_v5  ;;  %v2601_v28 = vpop.f32.mrb[199].mxu0  ;;  %3079 = vmatmul.mubr.bf16.gmra.mrb[168].mxu1 %v2704_v19  ;;  %v2670_v30 = vmax.f32 %v2596_v22, 0.0 }
 0x56f   : > { %v2602_v29 = vadd.f32 %v2601_v28, %v5750_v39  ;;  %v2671_v32 = vmax.f32 %v2598_v25, 0.0  ;;  %v4967_v28 = vld [vmem:[%s6142_s6 + $0x28] sm:$0xff]  }
 0x570   : > { %v2672_v31 = vmax.f32 %v2600_v27, 0.0 }
 0x571   : > { %v2673_v33 = vmax.f32 %v2602_v29, 0.0 }
 0x572   : > { %v2706_v34 = vpack.c.bf16 %v2672_v31, %v2670_v30  ;;  %v4968_v30 = vld [vmem:[%s6142_s6 + $0x70] sm:$0xff]  }
 0x573   : > { %v2707_v35 = vpack.c.bf16 %v2673_v33, %v2671_v32  ;;  %v2605_v36 = vpop.f32.mrb[200].mxu0 }
 0x574   : > { %v2606_v37 = vadd.f32 %v2605_v36, %v5747_v5  ;;  %v2607_v0 = vpop.f32.mrb[201].mxu0 }
 0x575   : > { %v2608_v38 = vadd.f32 %v2607_v0, %v5750_v39  ;;  %v2609_v40 = vpop.f32.mrb[202].mxu0  ;;  %3088 = vmatprep.mubr.bf16.mxu1 %v2707_v35 }
 0x576   : > { %v2610_v41 = vadd.f32 %v2609_v40, %v5747_v5  ;;  %v2611_v42 = vpop.f32.mrb[203].mxu0  ;;  %3089 = vmatmul.mubr.bf16.gmra.mrb[172].mxu1 %v2706_v34  ;;  %v2674_v44 = vmax.f32 %v2606_v37, 0.0  ;;  %v4957_v5 = vld [vmem:[%s6142_s6] sm:$0xff]   ;;  %v4969_v37 = vld [vmem:[%s6142_s6 + $0x30] sm:$0xff]   ;;  %v4970_v40 = vld [vmem:[%s6142_s6 + $0x78] sm:$0xff]  }
 0x577   : > { %v2612_v43 = vadd.f32 %v2611_v42, %v5750_v39  ;;  %v2675_v47 = vmax.f32 %v2608_v38, 0.0  ;;  %4523 = vmatpush3.bf16.msra.mxu1 %v4957_v5  ;;  %v4322_v39 = vld [vmem:[%s6143_s7 + $0x5] ss:$8 sm:$0x3] }
 0x578   : > { %v2676_v45 = vmax.f32 %v2610_v41, 0.0  ;;  %v5832_v57 = vrot.slane %v4322_v39, %v5386_v46  ;;  %4524 = vmatprep.subr.bf16.mxu1 %v4958_v55  ;;  %v5835_v58 = vrot.slane %v4322_v39, %v5391_v48 }
 0x579   : > { %v2677_v49 = vmax.f32 %v2612_v43, 0.0 }
 0x57a   : > { %v2708_v50 = vpack.c.bf16 %v2676_v45, %v2674_v44 }
 0x57b   : > { %v2709_v53 = vpack.c.bf16 %v2677_v49, %v2675_v47  ;;  %4525 = vmatpush3.bf16.msra.mxu1 %v4959_v56  ;;  %v4971_v47 = vld [vmem:[%s6142_s6 + $0x38] sm:$0xff]  }
 0x57c   : > { %4526 = vmatprep.subr.bf16.mxu1 %v4960_v3 }
 0x57d   : > { %3098 = vmatprep.mubr.bf16.mxu1 %v2709_v53 }
 0x57e   : > { %3099 = vmatmul.mubr.bf16.gmra.mrb[176].mxu1 %v2708_v50 }
 0x57f   : > { %4527 = vmatpush3.bf16.msra.mxu1 %v4961_v4 }
 0x580   : > { %4528 = vmatprep.subr.bf16.mxu1 %v4962_v51 }
 0x583   : > { %4529 = vmatpush3.bf16.msra.mxu1 %v4963_v8 }
 0x584   : > { %4530 = vmatprep.subr.bf16.mxu1 %v4964_v12 }
 0x587   : > { %4531 = vmatpush3.bf16.msra.mxu1 %v4965_v18 }
 0x588   : > { %4532 = vmatprep.subr.bf16.mxu1 %v4966_v21 }
 0x58b   : > { %4533 = vmatpush3.bf16.msra.mxu1 %v4967_v28 }
 0x58c   : > { %4534 = vmatprep.subr.bf16.mxu1 %v4968_v30 }
 0x58f   : > { %4535 = vmatpush3.bf16.msra.mxu1 %v4969_v37 }
 0x590   : > { %4536 = vmatprep.subr.bf16.mxu1 %v4970_v40 }
 0x593   : > { %4537 = vmatpush3.bf16.msra.mxu1 %v4971_v47 }
 0x5d9   : > { %v2950_v59 = vpop.f32.mrb[116].mxu1 }
 0x5da   : > { %v2951_v60 = vadd.f32 %v2950_v59, %v5832_v57  ;;  %v2952_v61 = vpop.f32.mrb[117].mxu1 }
 0x5db   : > { %v2953_v62 = vadd.f32 %v2952_v61, %v5835_v58  ;;  %v2954_v63 = vpop.f32.mrb[118].mxu1 }
 0x5dc   : > { %v2955_v1 = vadd.f32 %v2954_v63, %v5832_v57  ;;  %v2956_v2 = vpop.f32.mrb[119].mxu1  ;;  %v3109_v6 = vmax.f32 %v2951_v60, 0.0 }
 0x5dd   : > { %v2957_v52 = vadd.f32 %v2956_v2, %v5835_v58  ;;  %v3110_v9 = vmax.f32 %v2953_v62, 0.0 }
 0x5de   : > { %v3111_v10 = vmax.f32 %v2955_v1, 0.0 }
 0x5df   : > { %v3112_v11 = vmax.f32 %v2957_v52, 0.0 }
 0x5e0   : > { %v3173_v7 = vpack.c.bf16 %v3111_v10, %v3109_v6 }
 0x5e1   : > { %v3174_v13 = vpack.c.bf16 %v3112_v11, %v3110_v9  ;;  %v2960_v14 = vpop.f32.mrb[120].mxu1 }
 0x5e2   : > { %v2961_v15 = vadd.f32 %v2960_v14, %v5832_v57  ;;  %v2962_v16 = vpop.f32.mrb[121].mxu1 }
 0x5e3   : > { %v2963_v23 = vadd.f32 %v2962_v16, %v5835_v58  ;;  %v2964_v17 = vpop.f32.mrb[122].mxu1  ;;  %3443 = vmatprep.mubr.bf16.mxu0 %v3174_v13 }
 0x5e4   : > { %v2965_v19 = vadd.f32 %v2964_v17, %v5832_v57  ;;  %v2966_v20 = vpop.f32.mrb[123].mxu1  ;;  %3444 = vmatmul.mubr.bf16.vlgmr.msra.gmra.mrb[204].mxu0 %v3173_v7  ;;  %v3113_v24 = vmax.f32 %v2961_v15, 0.0 }
 0x5e5   : > { %v2967_v22 = vadd.f32 %v2966_v20, %v5835_v58  ;;  %v3114_v26 = vmax.f32 %v2963_v23, 0.0 }
 0x5e6   : > { %v3115_v25 = vmax.f32 %v2965_v19, 0.0 }
 0x5e7   : > { %v3116_v27 = vmax.f32 %v2967_v22, 0.0 }
 0x5e8   : > { %v3175_v29 = vpack.c.bf16 %v3115_v25, %v3113_v24 }
 0x5e9   : > { %v3176_v31 = vpack.c.bf16 %v3116_v27, %v3114_v26  ;;  %v2970_v32 = vpop.f32.mrb[124].mxu1 }
 0x5ea   : > { %v2971_v33 = vadd.f32 %v2970_v32, %v5832_v57  ;;  %v2972_v34 = vpop.f32.mrb[125].mxu1 }
 0x5eb   : > { %v2973_v35 = vadd.f32 %v2972_v34, %v5835_v58  ;;  %v2974_v36 = vpop.f32.mrb[126].mxu1  ;;  %3453 = vmatprep.mubr.bf16.mxu0 %v3176_v31 }
 0x5ec   : > { %v2975_v0 = vadd.f32 %v2974_v36, %v5832_v57  ;;  %v2976_v38 = vpop.f32.mrb[127].mxu1  ;;  %3454 = vmatmul.mubr.bf16.gmra.mrb[208].mxu0 %v3175_v29  ;;  %v3117_v42 = vmax.f32 %v2971_v33, 0.0 }
 0x5ed   : > { %v2977_v41 = vadd.f32 %v2976_v38, %v5835_v58  ;;  %v3118_v44 = vmax.f32 %v2973_v35, 0.0 }
 0x5ee   : > { %v3119_v43 = vmax.f32 %v2975_v0, 0.0 }
 0x5ef   : > { %v3120_v45 = vmax.f32 %v2977_v41, 0.0 }
 0x5f0   : > { %v3177_v49 = vpack.c.bf16 %v3119_v43, %v3117_v42 }
 0x5f1   : > { %v3178_v50 = vpack.c.bf16 %v3120_v45, %v3118_v44  ;;  %v2980_v53 = vpop.f32.mrb[128].mxu1 }
 0x5f2   : > { %v2981_v54 = vadd.f32 %v2980_v53, %v5832_v57  ;;  %v2982_v5 = vpop.f32.mrb[129].mxu1 }
 0x5f3   : > { %v2983_v39 = vadd.f32 %v2982_v5, %v5835_v58  ;;  %v2984_v55 = vpop.f32.mrb[130].mxu1  ;;  %3463 = vmatprep.mubr.bf16.mxu0 %v3178_v50 }
 0x5f4   : > { %v2985_v56 = vadd.f32 %v2984_v55, %v5832_v57  ;;  %v2986_v59 = vpop.f32.mrb[131].mxu1  ;;  %3464 = vmatmul.mubr.bf16.gmra.mrb[212].mxu0 %v3177_v49  ;;  %v3121_v61 = vmax.f32 %v2981_v54, 0.0 }
 0x5f5   : > { %v2987_v60 = vadd.f32 %v2986_v59, %v5835_v58  ;;  %v3122_v63 = vmax.f32 %v2983_v39, 0.0 }
 0x5f6   : > { %v3123_v62 = vmax.f32 %v2985_v56, 0.0 }
 0x5f7   : > { %v3124_v1 = vmax.f32 %v2987_v60, 0.0 }
 0x5f8   : > { %v3179_v2 = vpack.c.bf16 %v3123_v62, %v3121_v61 }
 0x5f9   : > { %v3180_v3 = vpack.c.bf16 %v3124_v1, %v3122_v63  ;;  %v2990_v4 = vpop.f32.mrb[132].mxu1 }
 0x5fa   : > { %v2991_v51 = vadd.f32 %v2990_v4, %v5832_v57  ;;  %v2992_v52 = vpop.f32.mrb[133].mxu1 }
 0x5fb   : > { %v2993_v6 = vadd.f32 %v2992_v52, %v5835_v58  ;;  %v2994_v10 = vpop.f32.mrb[134].mxu1  ;;  %3473 = vmatprep.mubr.bf16.mxu0 %v3180_v3 }
 0x5fc   : > { %v2995_v9 = vadd.f32 %v2994_v10, %v5832_v57  ;;  %v2996_v11 = vpop.f32.mrb[135].mxu1  ;;  %3474 = vmatmul.mubr.bf16.gmra.mrb[216].mxu0 %v3179_v2  ;;  %v3125_v7 = vmax.f32 %v2991_v51, 0.0 }
 0x5fd   : > { %v2997_v8 = vadd.f32 %v2996_v11, %v5835_v58  ;;  %v3126_v13 = vmax.f32 %v2993_v6, 0.0 }
 0x5fe   : > { %v3127_v12 = vmax.f32 %v2995_v9, 0.0 }
 0x5ff   : > { %v3128_v14 = vmax.f32 %v2997_v8, 0.0 }
 0x600   : > { %v3181_v15 = vpack.c.bf16 %v3127_v12, %v3125_v7 }
 0x601   : > { %v3182_v16 = vpack.c.bf16 %v3128_v14, %v3126_v13  ;;  %v3000_v23 = vpop.f32.mrb[136].mxu1 }
 0x602   : > { %v3001_v17 = vadd.f32 %v3000_v23, %v5832_v57  ;;  %v3002_v18 = vpop.f32.mrb[137].mxu1 }
 0x603   : > { %v3003_v19 = vadd.f32 %v3002_v18, %v5835_v58  ;;  %v3004_v20 = vpop.f32.mrb[138].mxu1  ;;  %3483 = vmatprep.mubr.bf16.mxu0 %v3182_v16 }
 0x604   : > { %v3005_v21 = vadd.f32 %v3004_v20, %v5832_v57  ;;  %v3006_v22 = vpop.f32.mrb[139].mxu1  ;;  %3484 = vmatmul.mubr.bf16.gmra.mrb[220].mxu0 %v3181_v15  ;;  %v3129_v25 = vmax.f32 %v3001_v17, 0.0 }
 0x605   : > { %v3007_v24 = vadd.f32 %v3006_v22, %v5835_v58  ;;  %v3130_v27 = vmax.f32 %v3003_v19, 0.0 }
 0x606   : > { %v3131_v26 = vmax.f32 %v3005_v21, 0.0 }
 0x607   : > { %v3132_v28 = vmax.f32 %v3007_v24, 0.0 }
 0x608   : > { %v3183_v29 = vpack.c.bf16 %v3131_v26, %v3129_v25 }
 0x609   : > { %v3184_v30 = vpack.c.bf16 %v3132_v28, %v3130_v27  ;;  %v3010_v31 = vpop.f32.mrb[140].mxu1 }
 0x60a   : > { %v3011_v32 = vadd.f32 %v3010_v31, %v5832_v57  ;;  %v3012_v33 = vpop.f32.mrb[141].mxu1 }
 0x60b   : > { %v3013_v34 = vadd.f32 %v3012_v33, %v5835_v58  ;;  %v3014_v35 = vpop.f32.mrb[142].mxu1  ;;  %3493 = vmatprep.mubr.bf16.mxu0 %v3184_v30 }
 0x60c   : > { %v3015_v36 = vadd.f32 %v3014_v35, %v5832_v57  ;;  %v3016_v37 = vpop.f32.mrb[143].mxu1  ;;  %3494 = vmatmul.mubr.bf16.gmra.mrb[224].mxu0 %v3183_v29  ;;  %v3133_v38 = vmax.f32 %v3011_v32, 0.0 }
 0x60d   : > { %v3017_v0 = vadd.f32 %v3016_v37, %v5835_v58  ;;  %v3134_v41 = vmax.f32 %v3013_v34, 0.0 }
 0x60e   : > { %v3135_v40 = vmax.f32 %v3015_v36, 0.0 }
 0x60f   : > { %v3136_v42 = vmax.f32 %v3017_v0, 0.0 }
 0x610   : > { %v3185_v43 = vpack.c.bf16 %v3135_v40, %v3133_v38 }
 0x611   : > { %v3186_v44 = vpack.c.bf16 %v3136_v42, %v3134_v41  ;;  %v3020_v45 = vpop.f32.mrb[144].mxu1 }
 0x612   : > { %v3021_v47 = vadd.f32 %v3020_v45, %v5832_v57  ;;  %v3022_v49 = vpop.f32.mrb[145].mxu1 }
 0x613   : > { %v3023_v50 = vadd.f32 %v3022_v49, %v5835_v58  ;;  %v3024_v53 = vpop.f32.mrb[146].mxu1  ;;  %3503 = vmatprep.mubr.bf16.mxu0 %v3186_v44 }
 0x614   : > { %v3025_v54 = vadd.f32 %v3024_v53, %v5832_v57  ;;  %v3026_v5 = vpop.f32.mrb[147].mxu1  ;;  %3504 = vmatmul.mubr.bf16.gmra.mrb[228].mxu0 %v3185_v43  ;;  %v3137_v55 = vmax.f32 %v3021_v47, 0.0 }
 0x615   : > { %v3027_v39 = vadd.f32 %v3026_v5, %v5835_v58  ;;  %v3138_v59 = vmax.f32 %v3023_v50, 0.0 }
 0x616   : > { %v3139_v56 = vmax.f32 %v3025_v54, 0.0 }
 0x617   : > { %v3140_v60 = vmax.f32 %v3027_v39, 0.0 }
 0x618   : > { %v3187_v61 = vpack.c.bf16 %v3139_v56, %v3137_v55 }
 0x619   : > { %v3188_v62 = vpack.c.bf16 %v3140_v60, %v3138_v59  ;;  %v3030_v63 = vpop.f32.mrb[148].mxu1 }
 0x61a   : > { %v3031_v1 = vadd.f32 %v3030_v63, %v5832_v57  ;;  %v3032_v2 = vpop.f32.mrb[149].mxu1 }
 0x61b   : > { %v3033_v3 = vadd.f32 %v3032_v2, %v5835_v58  ;;  %v3034_v4 = vpop.f32.mrb[150].mxu1  ;;  %3513 = vmatprep.mubr.bf16.mxu0 %v3188_v62 }
 0x61c   : > { %v3035_v51 = vadd.f32 %v3034_v4, %v5832_v57  ;;  %v3036_v52 = vpop.f32.mrb[151].mxu1  ;;  %3514 = vmatmul.mubr.bf16.gmra.mrb[232].mxu0 %v3187_v61  ;;  %v3141_v10 = vmax.f32 %v3031_v1, 0.0 }
 0x61d   : > { %v3037_v6 = vadd.f32 %v3036_v52, %v5835_v58  ;;  %v3142_v11 = vmax.f32 %v3033_v3, 0.0 }
 0x61e   : > { %v3143_v9 = vmax.f32 %v3035_v51, 0.0 }
 0x61f   : > { %v3144_v8 = vmax.f32 %v3037_v6, 0.0 }
 0x620   : > { %v3189_v7 = vpack.c.bf16 %v3143_v9, %v3141_v10 }
 0x621   : > { %v3190_v12 = vpack.c.bf16 %v3144_v8, %v3142_v11  ;;  %v3040_v13 = vpop.f32.mrb[152].mxu1 }
 0x622   : > { %v3041_v14 = vadd.f32 %v3040_v13, %v5832_v57  ;;  %v3042_v15 = vpop.f32.mrb[153].mxu1 }
 0x623   : > { %v3043_v16 = vadd.f32 %v3042_v15, %v5835_v58  ;;  %v3044_v23 = vpop.f32.mrb[154].mxu1  ;;  %3523 = vmatprep.mubr.bf16.mxu0 %v3190_v12 }
 0x624   : > { %v3045_v17 = vadd.f32 %v3044_v23, %v5832_v57  ;;  %v3046_v18 = vpop.f32.mrb[155].mxu1  ;;  %3524 = vmatmul.mubr.bf16.gmra.mrb[236].mxu0 %v3189_v7  ;;  %v3145_v20 = vmax.f32 %v3041_v14, 0.0 }
 0x625   : > { %v3047_v19 = vadd.f32 %v3046_v18, %v5835_v58  ;;  %v3146_v22 = vmax.f32 %v3043_v16, 0.0 }
 0x626   : > { %v3147_v21 = vmax.f32 %v3045_v17, 0.0 }
 0x627   : > { %v3148_v24 = vmax.f32 %v3047_v19, 0.0 }
 0x628   : > { %v3191_v25 = vpack.c.bf16 %v3147_v21, %v3145_v20 }
 0x629   : > { %v3192_v26 = vpack.c.bf16 %v3148_v24, %v3146_v22  ;;  %v3050_v27 = vpop.f32.mrb[156].mxu1 }
 0x62a   : > { %v3051_v28 = vadd.f32 %v3050_v27, %v5832_v57  ;;  %v3052_v29 = vpop.f32.mrb[157].mxu1 }
 0x62b   : > { %v3053_v30 = vadd.f32 %v3052_v29, %v5835_v58  ;;  %v3054_v31 = vpop.f32.mrb[158].mxu1  ;;  %3533 = vmatprep.mubr.bf16.mxu0 %v3192_v26 }
 0x62c   : > { %v3055_v32 = vadd.f32 %v3054_v31, %v5832_v57  ;;  %v3056_v33 = vpop.f32.mrb[159].mxu1  ;;  %3534 = vmatmul.mubr.bf16.gmra.mrb[240].mxu0 %v3191_v25  ;;  %v3149_v35 = vmax.f32 %v3051_v28, 0.0 }
 0x62d   : > { %v3057_v34 = vadd.f32 %v3056_v33, %v5835_v58  ;;  %v3150_v37 = vmax.f32 %v3053_v30, 0.0 }
 0x62e   : > { %v3151_v36 = vmax.f32 %v3055_v32, 0.0 }
 0x62f   : > { %v3152_v0 = vmax.f32 %v3057_v34, 0.0 }
 0x630   : > { %v3193_v38 = vpack.c.bf16 %v3151_v36, %v3149_v35 }
 0x631   : > { %v3194_v40 = vpack.c.bf16 %v3152_v0, %v3150_v37  ;;  %v3060_v41 = vpop.f32.mrb[160].mxu1 }
 0x632   : > { %v3061_v42 = vadd.f32 %v3060_v41, %v5832_v57  ;;  %v3062_v43 = vpop.f32.mrb[161].mxu1 }
 0x633   : > { %v3063_v44 = vadd.f32 %v3062_v43, %v5835_v58  ;;  %v3064_v45 = vpop.f32.mrb[162].mxu1  ;;  %3543 = vmatprep.mubr.bf16.mxu0 %v3194_v40 }
 0x634   : > { %v3065_v47 = vadd.f32 %v3064_v45, %v5832_v57  ;;  %v3066_v49 = vpop.f32.mrb[163].mxu1  ;;  %3544 = vmatmul.mubr.bf16.gmra.mrb[244].mxu0 %v3193_v38  ;;  %v3153_v53 = vmax.f32 %v3061_v42, 0.0 }
 0x635   : > { %v3067_v50 = vadd.f32 %v3066_v49, %v5835_v58  ;;  %v3154_v5 = vmax.f32 %v3063_v44, 0.0 }
 0x636   : > { %v3155_v54 = vmax.f32 %v3065_v47, 0.0 }
 0x637   : > { %v3156_v39 = vmax.f32 %v3067_v50, 0.0 }
 0x638   : > { %v3195_v55 = vpack.c.bf16 %v3155_v54, %v3153_v53 }
 0x639   : > { %v3196_v56 = vpack.c.bf16 %v3156_v39, %v3154_v5  ;;  %v3070_v59 = vpop.f32.mrb[164].mxu1  ;;  %v4355_v5 = vld [vmem:[%s6143_s7 + $0x6] ss:$8 sm:$0x3] }
 0x63a   : > { %v3071_v60 = vadd.f32 %v3070_v59, %v5832_v57  ;;  %v3072_v61 = vpop.f32.mrb[165].mxu1  ;;  %v5941_v39 = vrot.slane %v4355_v5, %v5386_v46 }
 0x63b   : > { %v3073_v62 = vadd.f32 %v3072_v61, %v5835_v58  ;;  %v3074_v63 = vpop.f32.mrb[166].mxu1  ;;  %3553 = vmatprep.mubr.bf16.mxu0 %v3196_v56 }
 0x63c   : > { %v3075_v1 = vadd.f32 %v3074_v63, %v5832_v57  ;;  %v3076_v2 = vpop.f32.mrb[167].mxu1  ;;  %3554 = vmatmul.mubr.bf16.gmra.mrb[248].mxu0 %v3195_v55  ;;  %v3157_v4 = vmax.f32 %v3071_v60, 0.0 }
 0x63d   : > { %v3077_v3 = vadd.f32 %v3076_v2, %v5835_v58  ;;  %v3158_v52 = vmax.f32 %v3073_v62, 0.0 }
 0x63e   : > { %v3159_v51 = vmax.f32 %v3075_v1, 0.0 }
 0x63f   : > { %v3160_v6 = vmax.f32 %v3077_v3, 0.0 }
 0x640   : > { %v3197_v10 = vpack.c.bf16 %v3159_v51, %v3157_v4 }
 0x641   : > { %v3198_v9 = vpack.c.bf16 %v3160_v6, %v3158_v52  ;;  %v3080_v11 = vpop.f32.mrb[168].mxu1 }
 0x642   : > { %v3081_v8 = vadd.f32 %v3080_v11, %v5832_v57  ;;  %v3082_v7 = vpop.f32.mrb[169].mxu1 }
 0x643   : > { %v3083_v12 = vadd.f32 %v3082_v7, %v5835_v58  ;;  %v3084_v13 = vpop.f32.mrb[170].mxu1  ;;  %3563 = vmatprep.mubr.bf16.mxu0 %v3198_v9 }
 0x644   : > { %v3085_v14 = vadd.f32 %v3084_v13, %v5832_v57  ;;  %v3086_v15 = vpop.f32.mrb[171].mxu1  ;;  %3564 = vmatmul.mubr.bf16.gmra.mrb[252].mxu0 %v3197_v10  ;;  %v3161_v23 = vmax.f32 %v3081_v8, 0.0 }
 0x645   : > { %v3087_v16 = vadd.f32 %v3086_v15, %v5835_v58  ;;  %v3162_v18 = vmax.f32 %v3083_v12, 0.0 }
 0x646   : > { %v3163_v17 = vmax.f32 %v3085_v14, 0.0 }
 0x647   : > { %v3164_v19 = vmax.f32 %v3087_v16, 0.0 }
 0x648   : > { %v3199_v20 = vpack.c.bf16 %v3163_v17, %v3161_v23 }
 0x649   : > { %v3200_v21 = vpack.c.bf16 %v3164_v19, %v3162_v18  ;;  %v3090_v22 = vpop.f32.mrb[172].mxu1 }
 0x64a   : > { %v3091_v24 = vadd.f32 %v3090_v22, %v5832_v57  ;;  %v3092_v25 = vpop.f32.mrb[173].mxu1 }
 0x64b   : > { %v3093_v26 = vadd.f32 %v3092_v25, %v5835_v58  ;;  %v3094_v27 = vpop.f32.mrb[174].mxu1  ;;  %3573 = vmatprep.mubr.bf16.mxu0 %v3200_v21 }
 0x64c   : > { %v3095_v28 = vadd.f32 %v3094_v27, %v5832_v57  ;;  %v3096_v29 = vpop.f32.mrb[175].mxu1  ;;  %3574 = vmatmul.mubr.bf16.gmra.mrb[0].mxu0 %v3199_v20  ;;  %v3165_v31 = vmax.f32 %v3091_v24, 0.0 }
 0x64d   : > { %v3097_v30 = vadd.f32 %v3096_v29, %v5835_v58  ;;  %v3166_v33 = vmax.f32 %v3093_v26, 0.0 }
 0x64e   : > { %v3167_v32 = vmax.f32 %v3095_v28, 0.0 }
 0x64f   : > { %v3168_v34 = vmax.f32 %v3097_v30, 0.0 }
 0x650   : > { %v3201_v35 = vpack.c.bf16 %v3167_v32, %v3165_v31 }
 0x651   : > { %v3202_v36 = vpack.c.bf16 %v3168_v34, %v3166_v33  ;;  %v3100_v37 = vpop.f32.mrb[176].mxu1 }
 0x652   : > { %v3101_v0 = vadd.f32 %v3100_v37, %v5832_v57  ;;  %v3102_v38 = vpop.f32.mrb[177].mxu1 }
 0x653   : > { %v3103_v40 = vadd.f32 %v3102_v38, %v5835_v58  ;;  %v3104_v41 = vpop.f32.mrb[178].mxu1  ;;  %3583 = vmatprep.mubr.bf16.mxu0 %v3202_v36 }
 0x654   : > { %v3105_v42 = vadd.f32 %v3104_v41, %v5832_v57  ;;  %v3106_v43 = vpop.f32.mrb[179].mxu1  ;;  %3584 = vmatmul.mubr.bf16.gmra.mrb[4].mxu0 %v3201_v35  ;;  %v3169_v45 = vmax.f32 %v3101_v0, 0.0  ;;  %v5944_v57 = vrot.slane %v4355_v5, %v5391_v48 }
 0x655   : > { %v3107_v44 = vadd.f32 %v3106_v43, %v5835_v58  ;;  %v3170_v49 = vmax.f32 %v3103_v40, 0.0 }
 0x656   : > { %v3171_v47 = vmax.f32 %v3105_v42, 0.0 }
 0x657   : > { %v3172_v50 = vmax.f32 %v3107_v44, 0.0 }
 0x658   : > { %v3203_v53 = vpack.c.bf16 %v3171_v47, %v3169_v45 }
 0x659   : > { %v3204_v54 = vpack.c.bf16 %v3172_v50, %v3170_v49 }
 0x65b   : > { %3593 = vmatprep.mubr.bf16.mxu0 %v3204_v54 }
 0x65c   : > { %3594 = vmatmul.mubr.bf16.gmra.mrb[8].mxu0 %v3203_v53 }
 0x6b7   : > { %v3445_v55 = vpop.f32.mrb[204].mxu0 }
 0x6b8   : > { %v3446_v58 = vadd.f32 %v3445_v55, %v5941_v39  ;;  %v3447_v56 = vpop.f32.mrb[205].mxu0 }
 0x6b9   : > { %v3448_v59 = vadd.f32 %v3447_v56, %v5944_v57  ;;  %v3449_v60 = vpop.f32.mrb[206].mxu0 }
 0x6ba   : > { %v3450_v61 = vadd.f32 %v3449_v60, %v5941_v39  ;;  %v3451_v62 = vpop.f32.mrb[207].mxu0  ;;  %v3604_v1 = vmax.f32 %v3446_v58, 0.0 }
 0x6bb   : > { %v3452_v63 = vadd.f32 %v3451_v62, %v5944_v57  ;;  %v3605_v3 = vmax.f32 %v3448_v59, 0.0 }
 0x6bc   : > { %v3606_v2 = vmax.f32 %v3450_v61, 0.0 }
 0x6bd   : > { %v3607_v46 = vmax.f32 %v3452_v63, 0.0 }
 0x6be   : > { %v3668_v4 = vpack.c.bf16 %v3606_v2, %v3604_v1 }
 0x6bf   : > { %v3669_v51 = vpack.c.bf16 %v3607_v46, %v3605_v3  ;;  %v3455_v48 = vpop.f32.mrb[208].mxu0 }
 0x6c0   : > { %v3456_v52 = vadd.f32 %v3455_v48, %v5941_v39  ;;  %v3457_v6 = vpop.f32.mrb[209].mxu0 }
 0x6c1   : > { %v3458_v10 = vadd.f32 %v3457_v6, %v5944_v57  ;;  %v3459_v9 = vpop.f32.mrb[210].mxu0  ;;  %3861 = vmatprep.mubr.bf16.mxu1 %v3669_v51 }
 0x6c2   : > { %v3460_v11 = vadd.f32 %v3459_v9, %v5941_v39  ;;  %v3461_v8 = vpop.f32.mrb[211].mxu0  ;;  %3862 = vmatmul.mubr.bf16.vlgmr.msra.gmra.mrb[180].mxu1 %v3668_v4  ;;  %v3608_v12 = vmax.f32 %v3456_v52, 0.0 }
 0x6c3   : > { %v3462_v7 = vadd.f32 %v3461_v8, %v5944_v57  ;;  %v3609_v14 = vmax.f32 %v3458_v10, 0.0 }
 0x6c4   : > { %v3610_v13 = vmax.f32 %v3460_v11, 0.0 }
 0x6c5   : > { %v3611_v15 = vmax.f32 %v3462_v7, 0.0 }
 0x6c6   : > { %v3670_v16 = vpack.c.bf16 %v3610_v13, %v3608_v12 }
 0x6c7   : > { %v3671_v23 = vpack.c.bf16 %v3611_v15, %v3609_v14  ;;  %v3465_v17 = vpop.f32.mrb[212].mxu0 }
 0x6c8   : > { %v3466_v18 = vadd.f32 %v3465_v17, %v5941_v39  ;;  %v3467_v19 = vpop.f32.mrb[213].mxu0 }
 0x6c9   : > { %v3468_v20 = vadd.f32 %v3467_v19, %v5944_v57  ;;  %v3469_v21 = vpop.f32.mrb[214].mxu0  ;;  %3869 = vmatprep.mubr.bf16.mxu1 %v3671_v23 }
 0x6ca   : > { %v3470_v22 = vadd.f32 %v3469_v21, %v5941_v39  ;;  %v3471_v24 = vpop.f32.mrb[215].mxu0  ;;  %3870 = vmatmul.mubr.bf16.gmra.mrb[184].mxu1 %v3670_v16  ;;  %v3612_v26 = vmax.f32 %v3466_v18, 0.0 }
 0x6cb   : > { %v3472_v25 = vadd.f32 %v3471_v24, %v5944_v57  ;;  %v3613_v28 = vmax.f32 %v3468_v20, 0.0 }
 0x6cc   : > { %v3614_v27 = vmax.f32 %v3470_v22, 0.0 }
 0x6cd   : > { %v3615_v29 = vmax.f32 %v3472_v25, 0.0 }
 0x6ce   : > { %v3672_v30 = vpack.c.bf16 %v3614_v27, %v3612_v26 }
 0x6cf   : > { %v3673_v31 = vpack.c.bf16 %v3615_v29, %v3613_v28  ;;  %v3475_v32 = vpop.f32.mrb[216].mxu0 }
 0x6d0   : > { %v3476_v33 = vadd.f32 %v3475_v32, %v5941_v39  ;;  %v3477_v34 = vpop.f32.mrb[217].mxu0 }
 0x6d1   : > { %v3478_v35 = vadd.f32 %v3477_v34, %v5944_v57  ;;  %v3479_v36 = vpop.f32.mrb[218].mxu0  ;;  %3877 = vmatprep.mubr.bf16.mxu1 %v3673_v31 }
 0x6d2   : > { %v3480_v37 = vadd.f32 %v3479_v36, %v5941_v39  ;;  %v3481_v0 = vpop.f32.mrb[219].mxu0  ;;  %3878 = vmatmul.mubr.bf16.gmra.mrb[188].mxu1 %v3672_v30  ;;  %v3616_v40 = vmax.f32 %v3476_v33, 0.0 }
 0x6d3   : > { %v3482_v38 = vadd.f32 %v3481_v0, %v5944_v57  ;;  %v3617_v42 = vmax.f32 %v3478_v35, 0.0 }
 0x6d4   : > { %v3618_v41 = vmax.f32 %v3480_v37, 0.0 }
 0x6d5   : > { %v3619_v43 = vmax.f32 %v3482_v38, 0.0 }
 0x6d6   : > { %v3674_v44 = vpack.c.bf16 %v3618_v41, %v3616_v40 }
 0x6d7   : > { %v3675_v45 = vpack.c.bf16 %v3619_v43, %v3617_v42  ;;  %v3485_v47 = vpop.f32.mrb[220].mxu0 }
 0x6d8   : > { %v3486_v49 = vadd.f32 %v3485_v47, %v5941_v39  ;;  %v3487_v50 = vpop.f32.mrb[221].mxu0 }
 0x6d9   : > { %v3488_v53 = vadd.f32 %v3487_v50, %v5944_v57  ;;  %v3489_v54 = vpop.f32.mrb[222].mxu0  ;;  %3885 = vmatprep.mubr.bf16.mxu1 %v3675_v45 }
 0x6da   : > { %v3490_v5 = vadd.f32 %v3489_v54, %v5941_v39  ;;  %v3491_v55 = vpop.f32.mrb[223].mxu0  ;;  %3886 = vmatmul.mubr.bf16.gmra.mrb[192].mxu1 %v3674_v44  ;;  %v3620_v56 = vmax.f32 %v3486_v49, 0.0 }
 0x6db   : > { %v3492_v58 = vadd.f32 %v3491_v55, %v5944_v57  ;;  %v3621_v60 = vmax.f32 %v3488_v53, 0.0 }
 0x6dc   : > { %v3622_v59 = vmax.f32 %v3490_v5, 0.0 }
 0x6dd   : > { %v3623_v61 = vmax.f32 %v3492_v58, 0.0 }
 0x6de   : > { %v3676_v62 = vpack.c.bf16 %v3622_v59, %v3620_v56 }
 0x6df   : > { %v3677_v63 = vpack.c.bf16 %v3623_v61, %v3621_v60  ;;  %v3495_v1 = vpop.f32.mrb[224].mxu0 }
 0x6e0   : > { %v3496_v2 = vadd.f32 %v3495_v1, %v5941_v39  ;;  %v3497_v3 = vpop.f32.mrb[225].mxu0 }
 0x6e1   : > { %v3498_v46 = vadd.f32 %v3497_v3, %v5944_v57  ;;  %v3499_v4 = vpop.f32.mrb[226].mxu0  ;;  %3893 = vmatprep.mubr.bf16.mxu1 %v3677_v63 }
 0x6e2   : > { %v3500_v51 = vadd.f32 %v3499_v4, %v5941_v39  ;;  %v3501_v48 = vpop.f32.mrb[227].mxu0  ;;  %3894 = vmatmul.mubr.bf16.gmra.mrb[196].mxu1 %v3676_v62  ;;  %v3624_v6 = vmax.f32 %v3496_v2, 0.0 }
 0x6e3   : > { %v3502_v52 = vadd.f32 %v3501_v48, %v5944_v57  ;;  %v3625_v9 = vmax.f32 %v3498_v46, 0.0 }
 0x6e4   : > { %v3626_v10 = vmax.f32 %v3500_v51, 0.0 }
 0x6e5   : > { %v3627_v11 = vmax.f32 %v3502_v52, 0.0 }
 0x6e6   : > { %v3678_v8 = vpack.c.bf16 %v3626_v10, %v3624_v6 }
 0x6e7   : > { %v3679_v7 = vpack.c.bf16 %v3627_v11, %v3625_v9  ;;  %v3505_v12 = vpop.f32.mrb[228].mxu0 }
 0x6e8   : > { %v3506_v13 = vadd.f32 %v3505_v12, %v5941_v39  ;;  %v3507_v14 = vpop.f32.mrb[229].mxu0 }
 0x6e9   : > { %v3508_v15 = vadd.f32 %v3507_v14, %v5944_v57  ;;  %v3509_v16 = vpop.f32.mrb[230].mxu0  ;;  %3901 = vmatprep.mubr.bf16.mxu1 %v3679_v7 }
 0x6ea   : > { %v3510_v23 = vadd.f32 %v3509_v16, %v5941_v39  ;;  %v3511_v17 = vpop.f32.mrb[231].mxu0  ;;  %3902 = vmatmul.mubr.bf16.gmra.mrb[200].mxu1 %v3678_v8  ;;  %v3628_v19 = vmax.f32 %v3506_v13, 0.0 }
 0x6eb   : > { %v3512_v18 = vadd.f32 %v3511_v17, %v5944_v57  ;;  %v3629_v21 = vmax.f32 %v3508_v15, 0.0 }
 0x6ec   : > { %v3630_v20 = vmax.f32 %v3510_v23, 0.0 }
 0x6ed   : > { %v3631_v22 = vmax.f32 %v3512_v18, 0.0 }
 0x6ee   : > { %v3680_v24 = vpack.c.bf16 %v3630_v20, %v3628_v19 }
 0x6ef   : > { %v3681_v25 = vpack.c.bf16 %v3631_v22, %v3629_v21  ;;  %v3515_v26 = vpop.f32.mrb[232].mxu0 }
 0x6f0   : > { %v3516_v27 = vadd.f32 %v3515_v26, %v5941_v39  ;;  %v3517_v28 = vpop.f32.mrb[233].mxu0 }
 0x6f1   : > { %v3518_v29 = vadd.f32 %v3517_v28, %v5944_v57  ;;  %v3519_v30 = vpop.f32.mrb[234].mxu0  ;;  %3909 = vmatprep.mubr.bf16.mxu1 %v3681_v25 }
 0x6f2   : > { %v3520_v31 = vadd.f32 %v3519_v30, %v5941_v39  ;;  %v3521_v32 = vpop.f32.mrb[235].mxu0  ;;  %3910 = vmatmul.mubr.bf16.gmra.mrb[204].mxu1 %v3680_v24  ;;  %v3632_v34 = vmax.f32 %v3516_v27, 0.0 }
 0x6f3   : > { %v3522_v33 = vadd.f32 %v3521_v32, %v5944_v57  ;;  %v3633_v36 = vmax.f32 %v3518_v29, 0.0 }
 0x6f4   : > { %v3634_v35 = vmax.f32 %v3520_v31, 0.0 }
 0x6f5   : > { %v3635_v37 = vmax.f32 %v3522_v33, 0.0 }
 0x6f6   : > { %v3682_v0 = vpack.c.bf16 %v3634_v35, %v3632_v34 }
 0x6f7   : > { %v3683_v38 = vpack.c.bf16 %v3635_v37, %v3633_v36  ;;  %v3525_v40 = vpop.f32.mrb[236].mxu0 }
 0x6f8   : > { %v3526_v41 = vadd.f32 %v3525_v40, %v5941_v39  ;;  %v3527_v42 = vpop.f32.mrb[237].mxu0 }
 0x6f9   : > { %v3528_v43 = vadd.f32 %v3527_v42, %v5944_v57  ;;  %v3529_v44 = vpop.f32.mrb[238].mxu0  ;;  %3917 = vmatprep.mubr.bf16.mxu1 %v3683_v38 }
 0x6fa   : > { %v3530_v45 = vadd.f32 %v3529_v44, %v5941_v39  ;;  %v3531_v47 = vpop.f32.mrb[239].mxu0  ;;  %3918 = vmatmul.mubr.bf16.gmra.mrb[208].mxu1 %v3682_v0  ;;  %v3636_v50 = vmax.f32 %v3526_v41, 0.0 }
 0x6fb   : > { %v3532_v49 = vadd.f32 %v3531_v47, %v5944_v57  ;;  %v3637_v54 = vmax.f32 %v3528_v43, 0.0 }
 0x6fc   : > { %v3638_v53 = vmax.f32 %v3530_v45, 0.0 }
 0x6fd   : > { %v3639_v5 = vmax.f32 %v3532_v49, 0.0 }
 0x6fe   : > { %v3684_v55 = vpack.c.bf16 %v3638_v53, %v3636_v50 }
 0x6ff   : > { %v3685_v58 = vpack.c.bf16 %v3639_v5, %v3637_v54  ;;  %v3535_v56 = vpop.f32.mrb[240].mxu0 }
 0x700   : > { %v3536_v59 = vadd.f32 %v3535_v56, %v5941_v39  ;;  %v3537_v60 = vpop.f32.mrb[241].mxu0 }
 0x701   : > { %v3538_v61 = vadd.f32 %v3537_v60, %v5944_v57  ;;  %v3539_v62 = vpop.f32.mrb[242].mxu0  ;;  %3925 = vmatprep.mubr.bf16.mxu1 %v3685_v58 }
 0x702   : > { %v3540_v63 = vadd.f32 %v3539_v62, %v5941_v39  ;;  %v3541_v1 = vpop.f32.mrb[243].mxu0  ;;  %3926 = vmatmul.mubr.bf16.gmra.mrb[212].mxu1 %v3684_v55  ;;  %v3640_v3 = vmax.f32 %v3536_v59, 0.0 }
 0x703   : > { %v3542_v2 = vadd.f32 %v3541_v1, %v5944_v57  ;;  %v3641_v4 = vmax.f32 %v3538_v61, 0.0 }
 0x704   : > { %v3642_v46 = vmax.f32 %v3540_v63, 0.0 }
 0x705   : > { %v3643_v51 = vmax.f32 %v3542_v2, 0.0 }
 0x706   : > { %v3686_v48 = vpack.c.bf16 %v3642_v46, %v3640_v3 }
 0x707   : > { %v3687_v52 = vpack.c.bf16 %v3643_v51, %v3641_v4  ;;  %v3545_v6 = vpop.f32.mrb[244].mxu0 }
 0x708   : > { %v3546_v10 = vadd.f32 %v3545_v6, %v5941_v39  ;;  %v3547_v9 = vpop.f32.mrb[245].mxu0 }
 0x709   : > { %v3548_v11 = vadd.f32 %v3547_v9, %v5944_v57  ;;  %v3549_v8 = vpop.f32.mrb[246].mxu0  ;;  %3933 = vmatprep.mubr.bf16.mxu1 %v3687_v52 }
 0x70a   : > { %v3550_v7 = vadd.f32 %v3549_v8, %v5941_v39  ;;  %v3551_v12 = vpop.f32.mrb[247].mxu0  ;;  %3934 = vmatmul.mubr.bf16.gmra.mrb[216].mxu1 %v3686_v48  ;;  %v3644_v14 = vmax.f32 %v3546_v10, 0.0 }
 0x70b   : > { %v3552_v13 = vadd.f32 %v3551_v12, %v5944_v57  ;;  %v3645_v16 = vmax.f32 %v3548_v11, 0.0 }
 0x70c   : > { %v3646_v15 = vmax.f32 %v3550_v7, 0.0 }
 0x70d   : > { %v3647_v23 = vmax.f32 %v3552_v13, 0.0 }
 0x70e   : > { %v3688_v17 = vpack.c.bf16 %v3646_v15, %v3644_v14 }
 0x70f   : > { %v3689_v18 = vpack.c.bf16 %v3647_v23, %v3645_v16  ;;  %v3555_v19 = vpop.f32.mrb[248].mxu0 }
 0x710   : > { %v3556_v20 = vadd.f32 %v3555_v19, %v5941_v39  ;;  %v3557_v21 = vpop.f32.mrb[249].mxu0 }
 0x711   : > { %v3558_v22 = vadd.f32 %v3557_v21, %v5944_v57  ;;  %v3559_v24 = vpop.f32.mrb[250].mxu0  ;;  %3941 = vmatprep.mubr.bf16.mxu1 %v3689_v18 }
 0x712   : > { %v3560_v25 = vadd.f32 %v3559_v24, %v5941_v39  ;;  %v3561_v26 = vpop.f32.mrb[251].mxu0  ;;  %3942 = vmatmul.mubr.bf16.gmra.mrb[220].mxu1 %v3688_v17  ;;  %v3648_v28 = vmax.f32 %v3556_v20, 0.0 }
 0x713   : > { %v3562_v27 = vadd.f32 %v3561_v26, %v5944_v57  ;;  %v3649_v30 = vmax.f32 %v3558_v22, 0.0 }
 0x714   : > { %v3650_v29 = vmax.f32 %v3560_v25, 0.0 }
 0x715   : > { %v3651_v31 = vmax.f32 %v3562_v27, 0.0 }
 0x716   : > { %v3690_v32 = vpack.c.bf16 %v3650_v29, %v3648_v28  ;;  %v6013_v29 = vld [vmem:[%s6143_s7 + $0x7] ss:$0 sm:$0xff] }
 0x717   : > { %v3691_v33 = vpack.c.bf16 %v3651_v31, %v3649_v30  ;;  %v3565_v34 = vpop.f32.mrb[252].mxu0 }
 0x718   : > { %v3566_v35 = vadd.f32 %v3565_v34, %v5941_v39  ;;  %v3567_v36 = vpop.f32.mrb[253].mxu0 }
 0x719   : > { %v3568_v37 = vadd.f32 %v3567_v36, %v5944_v57  ;;  %v3569_v0 = vpop.f32.mrb[254].mxu0  ;;  %3949 = vmatprep.mubr.bf16.mxu1 %v3691_v33 }
 0x71a   : > { %v3570_v38 = vadd.f32 %v3569_v0, %v5941_v39  ;;  %v3571_v40 = vpop.f32.mrb[255].mxu0  ;;  %3950 = vmatmul.mubr.bf16.gmra.mrb[224].mxu1 %v3690_v32  ;;  %v3652_v42 = vmax.f32 %v3566_v35, 0.0 }
 0x71b   : > { %v3572_v41 = vadd.f32 %v3571_v40, %v5944_v57  ;;  %v3653_v44 = vmax.f32 %v3568_v37, 0.0 }
 0x71c   : > { %v3654_v43 = vmax.f32 %v3570_v38, 0.0 }
 0x71d   : > { %v3655_v45 = vmax.f32 %v3572_v41, 0.0 }
 0x71e   : > { %v3692_v47 = vpack.c.bf16 %v3654_v43, %v3652_v42 }
 0x71f   : > { %v3693_v49 = vpack.c.bf16 %v3655_v45, %v3653_v44  ;;  %v3575_v50 = vpop.f32.mrb[0].mxu0 }
 0x720   : > { %v3576_v53 = vadd.f32 %v3575_v50, %v5941_v39  ;;  %v3577_v54 = vpop.f32.mrb[1].mxu0 }
 0x721   : > { %v3578_v5 = vadd.f32 %v3577_v54, %v5944_v57  ;;  %v3579_v55 = vpop.f32.mrb[2].mxu0  ;;  %3957 = vmatprep.mubr.bf16.mxu1 %v3693_v49 }
 0x722   : > { %v3580_v58 = vadd.f32 %v3579_v55, %v5941_v39  ;;  %v3581_v56 = vpop.f32.mrb[3].mxu0  ;;  %3958 = vmatmul.mubr.bf16.gmra.mrb[228].mxu1 %v3692_v47  ;;  %v3656_v60 = vmax.f32 %v3576_v53, 0.0 }
 0x723   : > { %v3582_v59 = vadd.f32 %v3581_v56, %v5944_v57  ;;  %v3657_v62 = vmax.f32 %v3578_v5, 0.0 }
 0x724   : > { %v3658_v61 = vmax.f32 %v3580_v58, 0.0 }
 0x725   : > { %v3659_v63 = vmax.f32 %v3582_v59, 0.0 }
 0x726   : > { %v3694_v1 = vpack.c.bf16 %v3658_v61, %v3656_v60 }
 0x727   : > { %v3695_v2 = vpack.c.bf16 %v3659_v63, %v3657_v62  ;;  %v3585_v3 = vpop.f32.mrb[4].mxu0 }
 0x728   : > { %v3586_v46 = vadd.f32 %v3585_v3, %v5941_v39  ;;  %v3587_v4 = vpop.f32.mrb[5].mxu0 }
 0x729   : > { %v3588_v51 = vadd.f32 %v3587_v4, %v5944_v57  ;;  %v3589_v48 = vpop.f32.mrb[6].mxu0  ;;  %3965 = vmatprep.mubr.bf16.mxu1 %v3695_v2 }
 0x72a   : > { %v3590_v52 = vadd.f32 %v3589_v48, %v5941_v39  ;;  %v3591_v6 = vpop.f32.mrb[7].mxu0  ;;  %3966 = vmatmul.mubr.bf16.gmra.mrb[232].mxu1 %v3694_v1  ;;  %v3660_v9 = vmax.f32 %v3586_v46, 0.0 }
 0x72b   : > { %v3592_v10 = vadd.f32 %v3591_v6, %v5944_v57  ;;  %v3661_v8 = vmax.f32 %v3588_v51, 0.0 }
 0x72c   : > { %v3662_v11 = vmax.f32 %v3590_v52, 0.0 }
 0x72d   : > { %v3663_v7 = vmax.f32 %v3592_v10, 0.0 }
 0x72e   : > { %v3696_v12 = vpack.c.bf16 %v3662_v11, %v3660_v9 }
 0x72f   : > { %v3697_v13 = vpack.c.bf16 %v3663_v7, %v3661_v8  ;;  %v3595_v14 = vpop.f32.mrb[8].mxu0 }
 0x730   : > { %v3596_v15 = vadd.f32 %v3595_v14, %v5941_v39  ;;  %v3597_v16 = vpop.f32.mrb[9].mxu0 }
 0x731   : > { %v3598_v23 = vadd.f32 %v3597_v16, %v5944_v57  ;;  %v3599_v17 = vpop.f32.mrb[10].mxu0  ;;  %3973 = vmatprep.mubr.bf16.mxu1 %v3697_v13 }
 0x732   : > { %v3600_v18 = vadd.f32 %v3599_v17, %v5941_v39  ;;  %v3601_v19 = vpop.f32.mrb[11].mxu0  ;;  %3974 = vmatmul.mubr.bf16.gmra.mrb[236].mxu1 %v3696_v12  ;;  %v3664_v21 = vmax.f32 %v3596_v15, 0.0 }
 0x733   : > { %v3602_v20 = vadd.f32 %v3601_v19, %v5944_v57  ;;  %v3665_v24 = vmax.f32 %v3598_v23, 0.0 }
 0x734   : > { %v3666_v22 = vmax.f32 %v3600_v18, 0.0 }
 0x735   : > { %v3667_v25 = vmax.f32 %v3602_v20, 0.0 }
 0x736   : > { %v3698_v26 = vpack.c.bf16 %v3666_v22, %v3664_v21 }
 0x737   : > { %v3699_v27 = vpack.c.bf16 %v3667_v25, %v3665_v24 }
 0x739   : > { %3981 = vmatprep.mubr.bf16.mxu1 %v3699_v27 }
 0x73a   : > { %3982 = vmatmul.mubr.bf16.gmra.mrb[240].mxu1 %v3698_v26 }
 0x795   : > { %v4538_v28 = vpop.f32.mrb[180].mxu1 }
 0x796   : > { %v4539_v39 = vpop.f32.mrb[181].mxu1 }
 0x797   : > { %v4540_v30 = vadd.f32 %v4539_v39, %v4538_v28  ;;  %v4541_v31 = vpop.f32.mrb[182].mxu1 }
 0x798   : > { %v4542_v57 = vpop.f32.mrb[183].mxu1 }
 0x799   : > { %v3864_v32 = vadd.f32 %v4540_v30, %v6013_v29  ;;  %v4543_v33 = vadd.f32 %v4542_v57, %v4541_v31 }
 0x79b   : > { %4972 = vtanh.f32 %v3864_v32  ;;  %v3867_v34 = vadd.f32 %v4543_v33, %v6013_v29 }
 0x79d   : > { %4974 = vtanh.f32 %v3867_v34  ;;  %v4544_v35 = vpop.f32.mrb[184].mxu1 }
 0x79e   : > { %v4545_v36 = vpop.f32.mrb[185].mxu1 }
 0x79f   : > { %v4546_v37 = vadd.f32 %v4545_v36, %v4544_v35  ;;  %v4547_v0 = vpop.f32.mrb[186].mxu1 }
 0x7a0   : > { %v4548_v38 = vpop.f32.mrb[187].mxu1 }
 0x7a1   : > { %v3872_v40 = vadd.f32 %v4546_v37, %v6013_v29  ;;  %v4549_v41 = vadd.f32 %v4548_v38, %v4547_v0 }
 0x7a3   : > { %4976 = vtanh.f32 %v3872_v40  ;;  %v3875_v42 = vadd.f32 %v4549_v41, %v6013_v29 }
 0x7a5   : > { %v4973_v43 = vpop.eup %4972  ;;  %4978 = vtanh.f32 %v3875_v42  ;;  %v4550_v44 = vpop.f32.mrb[188].mxu1 }
 0x7a6   : > { %4022 = vst [vmem:[%s6022_s22] sm:$0xff] %v4973_v43  ;;  %v4551_v45 = vpop.f32.mrb[189].mxu1 }
 0x7a7   : > { %v4975_v47 = vpop.eup %4974  ;;  %v4552_v49 = vadd.f32 %v4551_v45, %v4550_v44  ;;  %v4553_v50 = vpop.f32.mrb[190].mxu1 }
 0x7a8   : > { %4023 = vst [vmem:[%s6022_s22 + $0x8] sm:$0xff] %v4975_v47  ;;  %v4554_v53 = vpop.f32.mrb[191].mxu1 }
 0x7a9   : > { %v3880_v54 = vadd.f32 %v4552_v49, %v6013_v29  ;;  %v4555_v5 = vadd.f32 %v4554_v53, %v4553_v50 }
 0x7ab   : > { %4980 = vtanh.f32 %v3880_v54  ;;  %v3883_v55 = vadd.f32 %v4555_v5, %v6013_v29 }
 0x7ad   : > { %v4977_v58 = vpop.eup %4976  ;;  %4982 = vtanh.f32 %v3883_v55  ;;  %v4556_v56 = vpop.f32.mrb[192].mxu1 }
 0x7ae   : > { %4024 = vst [vmem:[%s6022_s22 + $0x10] sm:$0xff] %v4977_v58  ;;  %v4557_v59 = vpop.f32.mrb[193].mxu1 }
 0x7af   : > { %v4979_v60 = vpop.eup %4978  ;;  %v4558_v61 = vadd.f32 %v4557_v59, %v4556_v56  ;;  %v4559_v62 = vpop.f32.mrb[194].mxu1 }
 0x7b0   : > { %4025 = vst [vmem:[%s6022_s22 + $0x18] sm:$0xff] %v4979_v60  ;;  %v4560_v63 = vpop.f32.mrb[195].mxu1 }
 0x7b1   : > { %v3888_v1 = vadd.f32 %v4558_v61, %v6013_v29  ;;  %v4561_v2 = vadd.f32 %v4560_v63, %v4559_v62 }
 0x7b3   : > { %4984 = vtanh.f32 %v3888_v1  ;;  %v3891_v3 = vadd.f32 %v4561_v2, %v6013_v29 }
 0x7b5   : > { %v4981_v46 = vpop.eup %4980  ;;  %4986 = vtanh.f32 %v3891_v3  ;;  %v4562_v4 = vpop.f32.mrb[196].mxu1 }
 0x7b6   : > { %4026 = vst [vmem:[%s6022_s22 + $0x20] sm:$0xff] %v4981_v46  ;;  %v4563_v51 = vpop.f32.mrb[197].mxu1 }
 0x7b7   : > { %v4983_v48 = vpop.eup %4982  ;;  %v4564_v52 = vadd.f32 %v4563_v51, %v4562_v4  ;;  %v4565_v6 = vpop.f32.mrb[198].mxu1 }
 0x7b8   : > { %4027 = vst [vmem:[%s6022_s22 + $0x28] sm:$0xff] %v4983_v48  ;;  %v4566_v10 = vpop.f32.mrb[199].mxu1 }
 0x7b9   : > { %v3896_v9 = vadd.f32 %v4564_v52, %v6013_v29  ;;  %v4567_v11 = vadd.f32 %v4566_v10, %v4565_v6 }
 0x7bb   : > { %4988 = vtanh.f32 %v3896_v9  ;;  %v3899_v8 = vadd.f32 %v4567_v11, %v6013_v29 }
 0x7bd   : > { %v4985_v7 = vpop.eup %4984  ;;  %4990 = vtanh.f32 %v3899_v8  ;;  %v4568_v12 = vpop.f32.mrb[200].mxu1 }
 0x7be   : > { %4028 = vst [vmem:[%s6022_s22 + $0x30] sm:$0xff] %v4985_v7  ;;  %v4569_v13 = vpop.f32.mrb[201].mxu1 }
 0x7bf   : > { %v4987_v14 = vpop.eup %4986  ;;  %v4570_v15 = vadd.f32 %v4569_v13, %v4568_v12  ;;  %v4571_v16 = vpop.f32.mrb[202].mxu1 }
 0x7c0   : > { %4029 = vst [vmem:[%s6022_s22 + $0x38] sm:$0xff] %v4987_v14  ;;  %v4572_v23 = vpop.f32.mrb[203].mxu1 }
 0x7c1   : > { %v3904_v17 = vadd.f32 %v4570_v15, %v6013_v29  ;;  %v4573_v18 = vadd.f32 %v4572_v23, %v4571_v16 }
 0x7c3   : > { %4992 = vtanh.f32 %v3904_v17  ;;  %v3907_v19 = vadd.f32 %v4573_v18, %v6013_v29 }
 0x7c5   : > { %v4989_v20 = vpop.eup %4988  ;;  %4994 = vtanh.f32 %v3907_v19  ;;  %v4574_v21 = vpop.f32.mrb[204].mxu1 }
 0x7c6   : > { %4030 = vst [vmem:[%s6022_s22 + $0x40] sm:$0xff] %v4989_v20  ;;  %v4575_v22 = vpop.f32.mrb[205].mxu1 }
 0x7c7   : > { %v4991_v24 = vpop.eup %4990  ;;  %v4576_v25 = vadd.f32 %v4575_v22, %v4574_v21  ;;  %v4577_v26 = vpop.f32.mrb[206].mxu1 }
 0x7c8   : > { %4031 = vst [vmem:[%s6022_s22 + $0x48] sm:$0xff] %v4991_v24  ;;  %v4578_v27 = vpop.f32.mrb[207].mxu1 }
 0x7c9   : > { %v3912_v28 = vadd.f32 %v4576_v25, %v6013_v29  ;;  %v4579_v39 = vadd.f32 %v4578_v27, %v4577_v26 }
 0x7cb   : > { %4996 = vtanh.f32 %v3912_v28  ;;  %v3915_v30 = vadd.f32 %v4579_v39, %v6013_v29 }
 0x7cd   : > { %v4993_v31 = vpop.eup %4992  ;;  %4998 = vtanh.f32 %v3915_v30  ;;  %v4580_v57 = vpop.f32.mrb[208].mxu1 }
 0x7ce   : > { %4032 = vst [vmem:[%s6022_s22 + $0x50] sm:$0xff] %v4993_v31  ;;  %v4581_v32 = vpop.f32.mrb[209].mxu1 }
 0x7cf   : > { %v4995_v33 = vpop.eup %4994  ;;  %v4582_v34 = vadd.f32 %v4581_v32, %v4580_v57  ;;  %v4583_v35 = vpop.f32.mrb[210].mxu1 }
 0x7d0   : > { %4033 = vst [vmem:[%s6022_s22 + $0x58] sm:$0xff] %v4995_v33  ;;  %v4584_v36 = vpop.f32.mrb[211].mxu1 }
 0x7d1   : > { %v3920_v37 = vadd.f32 %v4582_v34, %v6013_v29  ;;  %v4585_v0 = vadd.f32 %v4584_v36, %v4583_v35 }
 0x7d3   : > { %5000 = vtanh.f32 %v3920_v37  ;;  %v3923_v38 = vadd.f32 %v4585_v0, %v6013_v29 }
 0x7d5   : > { %v4997_v40 = vpop.eup %4996  ;;  %5002 = vtanh.f32 %v3923_v38  ;;  %v4586_v41 = vpop.f32.mrb[212].mxu1 }
 0x7d6   : > { %4034 = vst [vmem:[%s6022_s22 + $0x60] sm:$0xff] %v4997_v40  ;;  %v4587_v42 = vpop.f32.mrb[213].mxu1 }
 0x7d7   : > { %v4999_v43 = vpop.eup %4998  ;;  %v4588_v44 = vadd.f32 %v4587_v42, %v4586_v41  ;;  %v4589_v45 = vpop.f32.mrb[214].mxu1 }
 0x7d8   : > { %4035 = vst [vmem:[%s6022_s22 + $0x68] sm:$0xff] %v4999_v43  ;;  %v4590_v47 = vpop.f32.mrb[215].mxu1 }
 0x7d9   : > { %v3928_v49 = vadd.f32 %v4588_v44, %v6013_v29  ;;  %v4591_v50 = vadd.f32 %v4590_v47, %v4589_v45 }
 0x7db   : > { %5004 = vtanh.f32 %v3928_v49  ;;  %v3931_v53 = vadd.f32 %v4591_v50, %v6013_v29 }
 0x7dd   : > { %v5001_v54 = vpop.eup %5000  ;;  %5006 = vtanh.f32 %v3931_v53  ;;  %v4592_v5 = vpop.f32.mrb[216].mxu1 }
 0x7de   : > { %4036 = vst [vmem:[%s6022_s22 + $0x70] sm:$0xff] %v5001_v54  ;;  %v4593_v55 = vpop.f32.mrb[217].mxu1 }
 0x7df   : > { %v5003_v58 = vpop.eup %5002  ;;  %v4594_v56 = vadd.f32 %v4593_v55, %v4592_v5  ;;  %v4595_v59 = vpop.f32.mrb[218].mxu1 }
 0x7e0   : > { %4037 = vst [vmem:[%s6022_s22 + $0x78] sm:$0xff] %v5003_v58  ;;  %v4596_v60 = vpop.f32.mrb[219].mxu1 }
 0x7e1   : > { %v3936_v61 = vadd.f32 %v4594_v56, %v6013_v29  ;;  %v4597_v62 = vadd.f32 %v4596_v60, %v4595_v59 }
 0x7e3   : > { %5008 = vtanh.f32 %v3936_v61  ;;  %v3939_v63 = vadd.f32 %v4597_v62, %v6013_v29 }
 0x7e5   : > { %v5005_v1 = vpop.eup %5004  ;;  %5010 = vtanh.f32 %v3939_v63  ;;  %v4598_v2 = vpop.f32.mrb[220].mxu1 }
 0x7e6   : > { %4038 = vst [vmem:[%s6022_s22 + $0x80] sm:$0xff] %v5005_v1  ;;  %v4599_v3 = vpop.f32.mrb[221].mxu1 }
 0x7e7   : > { %v5007_v46 = vpop.eup %5006  ;;  %v4600_v4 = vadd.f32 %v4599_v3, %v4598_v2  ;;  %v4601_v51 = vpop.f32.mrb[222].mxu1 }
 0x7e8   : > { %4039 = vst [vmem:[%s6022_s22 + $0x88] sm:$0xff] %v5007_v46  ;;  %v4602_v48 = vpop.f32.mrb[223].mxu1 }
 0x7e9   : > { %v3944_v52 = vadd.f32 %v4600_v4, %v6013_v29  ;;  %v4603_v6 = vadd.f32 %v4602_v48, %v4601_v51 }
 0x7eb   : > { %5012 = vtanh.f32 %v3944_v52  ;;  %v3947_v10 = vadd.f32 %v4603_v6, %v6013_v29 }
 0x7ed   : > { %v5009_v9 = vpop.eup %5008  ;;  %5014 = vtanh.f32 %v3947_v10  ;;  %v4604_v11 = vpop.f32.mrb[224].mxu1 }
 0x7ee   : > { %4040 = vst [vmem:[%s6022_s22 + $0x90] sm:$0xff] %v5009_v9  ;;  %v4605_v8 = vpop.f32.mrb[225].mxu1 }
 0x7ef   : > { %v5011_v7 = vpop.eup %5010  ;;  %v4606_v12 = vadd.f32 %v4605_v8, %v4604_v11  ;;  %v4607_v13 = vpop.f32.mrb[226].mxu1 }
 0x7f0   : > { %4041 = vst [vmem:[%s6022_s22 + $0x98] sm:$0xff] %v5011_v7  ;;  %v4608_v14 = vpop.f32.mrb[227].mxu1 }
 0x7f1   : > { %v3952_v15 = vadd.f32 %v4606_v12, %v6013_v29  ;;  %v4609_v16 = vadd.f32 %v4608_v14, %v4607_v13 }
 0x7f3   : > { %5016 = vtanh.f32 %v3952_v15  ;;  %v3955_v23 = vadd.f32 %v4609_v16, %v6013_v29 }
 0x7f5   : > { %v5013_v17 = vpop.eup %5012  ;;  %5018 = vtanh.f32 %v3955_v23  ;;  %v4610_v18 = vpop.f32.mrb[228].mxu1 }
 0x7f6   : > { %4042 = vst [vmem:[%s6022_s22 + $0xa0] sm:$0xff] %v5013_v17  ;;  %v4611_v19 = vpop.f32.mrb[229].mxu1 }
 0x7f7   : > { %v5015_v20 = vpop.eup %5014  ;;  %v4612_v21 = vadd.f32 %v4611_v19, %v4610_v18  ;;  %v4613_v22 = vpop.f32.mrb[230].mxu1 }
 0x7f8   : > { %4043 = vst [vmem:[%s6022_s22 + $0xa8] sm:$0xff] %v5015_v20  ;;  %v4614_v24 = vpop.f32.mrb[231].mxu1 }
 0x7f9   : > { %v3960_v25 = vadd.f32 %v4612_v21, %v6013_v29  ;;  %v4615_v26 = vadd.f32 %v4614_v24, %v4613_v22 }
 0x7fb   : > { %5020 = vtanh.f32 %v3960_v25  ;;  %v3963_v27 = vadd.f32 %v4615_v26, %v6013_v29 }
 0x7fd   : > { %v5017_v28 = vpop.eup %5016  ;;  %5022 = vtanh.f32 %v3963_v27  ;;  %v4616_v39 = vpop.f32.mrb[232].mxu1 }
 0x7fe   : > { %4044 = vst [vmem:[%s6022_s22 + $0xb0] sm:$0xff] %v5017_v28  ;;  %v4617_v30 = vpop.f32.mrb[233].mxu1 }
 0x7ff   : > { %v5019_v31 = vpop.eup %5018  ;;  %v4618_v57 = vadd.f32 %v4617_v30, %v4616_v39  ;;  %v4619_v32 = vpop.f32.mrb[234].mxu1 }
 0x800   : > { %4045 = vst [vmem:[%s6022_s22 + $0xb8] sm:$0xff] %v5019_v31  ;;  %v4620_v33 = vpop.f32.mrb[235].mxu1 }
 0x801   : > { %v3968_v34 = vadd.f32 %v4618_v57, %v6013_v29  ;;  %v4621_v35 = vadd.f32 %v4620_v33, %v4619_v32 }
 0x803   : > { %5024 = vtanh.f32 %v3968_v34  ;;  %v3971_v36 = vadd.f32 %v4621_v35, %v6013_v29 }
 0x805   : > { %v5021_v37 = vpop.eup %5020  ;;  %5026 = vtanh.f32 %v3971_v36  ;;  %v4622_v0 = vpop.f32.mrb[236].mxu1 }
 0x806   : > { %4046 = vst [vmem:[%s6022_s22 + $0xc0] sm:$0xff] %v5021_v37  ;;  %v4623_v38 = vpop.f32.mrb[237].mxu1 }
 0x807   : > { %v5023_v40 = vpop.eup %5022  ;;  %v4624_v41 = vadd.f32 %v4623_v38, %v4622_v0  ;;  %v4625_v42 = vpop.f32.mrb[238].mxu1 }
 0x808   : > { %4047 = vst [vmem:[%s6022_s22 + $0xc8] sm:$0xff] %v5023_v40  ;;  %v4626_v43 = vpop.f32.mrb[239].mxu1 }
 0x809   : > { %v3976_v44 = vadd.f32 %v4624_v41, %v6013_v29  ;;  %v4627_v45 = vadd.f32 %v4626_v43, %v4625_v42 }
 0x80b   : > { %5028 = vtanh.f32 %v3976_v44  ;;  %v3979_v47 = vadd.f32 %v4627_v45, %v6013_v29 }
 0x80d   : > { %v5025_v49 = vpop.eup %5024  ;;  %5030 = vtanh.f32 %v3979_v47  ;;  %v4628_v50 = vpop.f32.mrb[240].mxu1 }
 0x80e   : > { %4048 = vst [vmem:[%s6022_s22 + $0xd0] sm:$0xff] %v5025_v49  ;;  %v4629_v53 = vpop.f32.mrb[241].mxu1 }
 0x80f   : > { %v5027_v54 = vpop.eup %5026  ;;  %v4630_v5 = vadd.f32 %v4629_v53, %v4628_v50  ;;  %v4631_v55 = vpop.f32.mrb[242].mxu1 }
 0x810   : > { %4049 = vst [vmem:[%s6022_s22 + $0xd8] sm:$0xff] %v5027_v54  ;;  %v4632_v58 = vpop.f32.mrb[243].mxu1 }
 0x811   : > { %v3984_v56 = vadd.f32 %v4630_v5, %v6013_v29  ;;  %v4633_v59 = vadd.f32 %v4632_v58, %v4631_v55 }
 0x813   : > { %5032 = vtanh.f32 %v3984_v56  ;;  %v3987_v60 = vadd.f32 %v4633_v59, %v6013_v29 }
 0x815   : > { %v5029_v61 = vpop.eup %5028  ;;  %5034 = vtanh.f32 %v3987_v60 }
 0x816   : > { %4050 = vst [vmem:[%s6022_s22 + $0xe0] sm:$0xff] %v5029_v61 }
 0x817   : > { %v5031_v62 = vpop.eup %5030 }
 0x818   : > { %4051 = vst [vmem:[%s6022_s22 + $0xe8] sm:$0xff] %v5031_v62 }
 0x81d   : > { %v5033_v63 = vpop.eup %5032 }
 0x81e   : > { %4052 = vst [vmem:[%s6022_s22 + $0xf0] sm:$0xff] %v5033_v63 }
 0x81f   : > { %v5035_v29 = vpop.eup %5034 }
 0x820   : > { %4053 = vst [vmem:[%s6022_s22 + $0xf8] sm:$0xff] %v5035_v29 }
 0x821   : > { %5077 = shalt.err (!%p5074_p7)
}
 0x822   : > { %s5078_s13 = scalar_lea.hbm %s6087_s19, 4096  ;;  %s5082_s22 = scalar_lea.hbm %s6144_s8, 8192 }
 0x823   : > { %p5079_p8 = scmp.ne.s32.totalorder %s6087_s19, %s5078_s13  ;;  %p5083_p1 = scmp.lt.u32.totalorder %s6087_s19, %s6144_s8 }
 0x824   : > { %p5084_p0 = scmp.lt.u32.totalorder %s5082_s22, %s5078_s13  ;;  %p5086_p6 = scmp.lt.u32.totalorder %s5078_s13, %s6087_s19 }
 0x825   : > { %p5080_p11 = pnand %p5079_p8, %p6155_p9 }
 0x826   : > { %p5085_p5 = por %p5084_p0, %p5083_p1 }
 0x827   : > { %p5081_p13 = pneg %p5080_p11 }
 0x828   : > { %p5087_p10 = por %p5086_p6, %p5085_p5 }
 0x82a   : > { %p5088_p12 = pnand %p5087_p10, %p5081_p13 }
 0x82c   : > { %5091 = shalt.err (!%p5088_p12)
}
 0x82d   : > { %s5138_s25 = smov 128   ;;  %s5139_s26 = smov 8  }
 0x82e   : > { %4654 = dma.vmem_to_hbm [thread:$0]  (%p6155_p9), %s6089_s24, 4096, %s6087_s19, %s6095_s17, %s5138_s25, %s5138_s25, %s5139_s26  }
 0x82f PF: > { %p4666_p2 = scmp.ge.s32.totalorder %s5130_s30, 2  ;;  %s4083_s9 = sand.u32 1, %s5118_s27  }
 0x830   : > { %p6156_p3 = scmp.ne.s32.totalorder %s6149_s16, 0  ;;  %s4084_s10 = scalar_lea.sflag [#allocation4], %s4083_s9 }
 0x832   : > { %p4661_p4 = pnand %p4666_p2, %p6156_p3 }
 0x834   : > { %5113 = dma.done.wait (!%p4661_p4), %s4084_s10, 4096  }
 0x835   : > { %5115 = vsyncadd (!%p4661_p4), %s4084_s10, 4294963200  ;;  %p19_p7 = scmp.ge.s32.totalorder %s5210_s11, 4   ;;  %s6157_s27 = smov %s5122_s28 }
 0x836   : > { %s6158_s28 = smov %s5126_s29  ;;  %s6159_s29 = smov %s5221_s14 }
 0x837   : > { %s6160_s30 = smov %s5210_s11  ;;  %21 = sbr.rel (!%p19_p7) target bundleno = 4 (0x4), region = 103 }
 0x83e   :  { %4089 = vsyncpa [#allocation3], 1 }
 0x83f   :  { %4091 = vsyncpa [#allocation3 + $0x1], 1 }
 0x840   :  { %4092 = vsyncpa [#allocation4], 1 }
 0x841   :  { %4094 = vsyncpa [#allocation4 + $0x1], 1 }

</bundles_post_ra>
